<compile_context>
chip_gen: v5e
topology: v5e:2x2
jax: 0.10.0
libtpu: 0.0.40
codegen_flags: <defaults>
</compile_context>

<pallas_src>
import functools
import math

import jax
import jax.numpy as jnp
from jax.experimental import pallas as pl
from jax.experimental.pallas import tpu as pltpu


def _attention_kernel(
    x_ref, xp_ref, y_ref, yp_ref,
    pw1_ref, pb1_ref, pw2_ref, pb2_ref,
    qg_ref, qbeta_ref, qw1_ref, qb1_ref, qw2_ref, qb2_ref,
    kg_ref, kbeta_ref, kw1_ref, kb1_ref,
    vg_ref, vbeta_ref, vw_ref, vb_ref,
    p1w_ref, p1b_ref, p2w_ref, p2wsum_ref, p2b_ref,
    out_ref, attn_ref,
    *, n_heads, head_dim, pos_dim, seq_q, seq_k, batch_block, alpha_q, ln_eps):
  f32 = jnp.float32
  bf16 = jnp.bfloat16
  H, C, D = n_heads, head_dim, pos_dim
  N, L, Bt = seq_q, seq_k, batch_block
  E = H * C

  def dot(a, b):
    return jax.lax.dot_general(a, b, (((1,), (0,)), ((), ())),
                               preferred_element_type=f32)

  def dot_t(a, b):
    return jax.lax.dot_general(a, b, (((1,), (1,)), ((), ())),
                               preferred_element_type=f32)

  def layer_norm(a, g, b):
    mu = jnp.mean(a, axis=-1, keepdims=True)
    var = jnp.mean((a - mu) * (a - mu), axis=-1, keepdims=True)
    return (a - mu) * jax.lax.rsqrt(var + ln_eps) * g + b

  # Flatten the (Bt, seq, feat) blocks into (Bt*seq, feat) slabs so every encoder
  # matmul runs with a tall M dimension.
  x2d = x_ref[...].reshape(Bt * N, E)
  xp2d = xp_ref[...].reshape(Bt * N, D)
  y2d = y_ref[...].reshape(Bt * L, E)
  yp2d = yp_ref[...].reshape(Bt * L, D)

  # --- PositionEncoder (kept in f32: tiny K=D matmuls, cos/sin phase-sensitive) ---
  px = alpha_q * xp2d
  py = alpha_q * yp2d
  p1x = dot(px, pw1_ref[...]) + pb1_ref[...]   # add_bias=True for xp
  p2x = dot(px, pw2_ref[...]) + pb2_ref[...]
  p1y = dot(py, pw1_ref[...])                  # add_bias=False for yp
  p2y = dot(py, pw2_ref[...])

  # --- Query / Key / Value encoders: LN in f32, matmuls in bf16 (f32 accumulate) ---
  xn = layer_norm(x2d, qg_ref[...], qbeta_ref[...]).astype(bf16)
  x1 = dot(xn, qw1_ref[...]) + qb1_ref[...]
  x2 = dot(xn, qw2_ref[...]) + qb2_ref[...]

  yn = layer_norm(y2d, kg_ref[...], kbeta_ref[...]).astype(bf16)
  y1 = dot(yn, kw1_ref[...]) + kb1_ref[...]

  vn = layer_norm(y2d, vg_ref[...], vbeta_ref[...]).astype(bf16)
  v = (dot(vn, vw_ref[...]) + vb_ref[...]).astype(bf16)

  # q / k chunk products (f32 elementwise, cast once for the score matmuls).
  qa = (x1 * jnp.cos(p1x)).astype(bf16)
  qb = (x1 * jnp.sin(p1x)).astype(bf16)
  qc = (x2 * jnp.cos(p2x)).astype(bf16)
  qd = (x2 * jnp.sin(p2x)).astype(bf16)
  ka = (y1 * jnp.cos(p1y)).astype(bf16)
  kb = (y1 * jnp.sin(p1y)).astype(bf16)
  kc = jnp.cos(p2y).astype(bf16)
  kd = jnp.sin(p2y).astype(bf16)

  scale = float((4 * C) ** -0.5)
  p2w = p2w_ref[...]

  # Reassociated xp contribution of proj2: sum_h (-xp) @ p2w_h == -xp @ sum_h p2w_h.
  xp_term = dot(xp2d, p2wsum_ref[...])          # (Bt*N, E) f32

  # TODO(synk): attn_mask renormalization and dropout not implemented — forward
  # is exercised with attn_mask=None and attn_drop=0, so both are identity.
  out_rows = []
  attn_rows = []
  for b in range(Bt):
    rx = slice(b * N, (b + 1) * N)
    ry = slice(b * L, (b + 1) * L)
    yp_b = yp2d[ry]                             # (L, D) f32

    attn_heads = []
    o1_heads = []
    w2y_heads = []
    for h in range(H):
      lo, hi = h * C, (h + 1) * C
      # Concatenate the 4 chunks along the contraction dim -> single K=4C matmul.
      q_cat = jnp.concatenate(
          [qa[rx, lo:hi], qb[rx, lo:hi], qc[rx, lo:hi], qd[rx, lo:hi]], axis=-1)
      k_cat = jnp.concatenate(
          [ka[ry, lo:hi], kb[ry, lo:hi], kc[ry, lo:hi], kd[ry, lo:hi]], axis=-1)
      s = dot_t(q_cat, k_cat) * scale           # (N, L) f32
      s = s - jnp.max(s, axis=-1, keepdims=True)
      e = jnp.exp(s)
      attn_h = e * pl.reciprocal(jnp.sum(e, axis=-1, keepdims=True), approx=True)
      attn_heads.append(attn_h)
      o1_heads.append(dot(attn_h.astype(bf16), v[ry, lo:hi]))       # (N, C)
      w2y_heads.append(dot(yp_b, p2w[h * D:(h + 1) * D, :]))        # (L, E) f32

    attn_cat = jnp.concatenate(attn_heads, axis=-1)   # (N, H*L) f32, lane-dense
    o1 = jnp.concatenate(o1_heads, axis=-1)           # (N, E)
    w2y = jnp.concatenate(w2y_heads, axis=0)          # (H*L, E)

    out_b = (dot(o1.astype(bf16), p1w_ref[...])                     # proj1: one big dot
             + dot(attn_cat.astype(bf16), w2y.astype(bf16)))        # proj2 head sum
    out_rows.append(out_b)
    attn_rows.append(attn_cat)

  out_all = jnp.concatenate(out_rows, axis=0)         # (Bt*N, E)
  attn_all = jnp.concatenate(attn_rows, axis=0)       # (Bt*N, H*L)

  out_all = out_all - xp_term + p1b_ref[...] + p2b_ref[...]
  out_ref[...] = out_all.reshape(Bt, N, E)
  attn_ref[...] = attn_all.reshape(Bt, N, H * L)      # single lane-dense store


def attention_forward(x, xp, y, yp, params, *, n_heads, alpha_q, ln_eps=1e-5,
                      batch_block=None):
  B, N, E = x.shape
  L = y.shape[1]
  D = xp.shape[2]
  C = E // n_heads
  f32 = jnp.float32
  bf16 = jnp.bfloat16

  # Pick the largest batch block (divisor of B) keeping the flattened slab modest.
  if batch_block is None:
    batch_block = 1
    for bt in range(1, B + 1):
      if B % bt == 0 and bt * max(N, L) <= 256:
        batch_block = bt
  assert B % batch_block == 0
  Bt = batch_block

  p2w = params['proj2_w'].astype(f32)
  p2w_sum = p2w.reshape(n_heads, D, E).sum(axis=0)     # for the reassociated -xp term

  # Big matmul weights pre-cast to bf16 (f32 accumulation in-kernel); everything
  # feeding cos/sin or used in tiny-K matmuls stays f32.
  weights = [
      params['P_w1'].astype(f32), params['P_b1'].astype(f32),
      params['P_w2'].astype(f32), params['P_b2'].astype(f32),
      params['Q_gamma'].astype(f32), params['Q_beta'].astype(f32),
      params['Q_w1'].astype(bf16), params['Q_b1'].astype(f32),
      params['Q_w2'].astype(bf16), params['Q_b2'].astype(f32),
      params['K_gamma'].astype(f32), params['K_beta'].astype(f32),
      params['K_w1'].astype(bf16), params['K_b1'].astype(f32),
      params['V_gamma'].astype(f32), params['V_beta'].astype(f32),
      params['V_w'].astype(bf16), params['V_b'].astype(f32),
      params['proj1_w'].astype(bf16), params['proj1_b'].astype(f32),
      p2w, p2w_sum, params['proj2_b'].astype(f32),
  ]

  act_specs = [
      pl.BlockSpec((Bt, N, E), lambda b: (b, 0, 0)),
      pl.BlockSpec((Bt, N, D), lambda b: (b, 0, 0)),
      pl.BlockSpec((Bt, L, E), lambda b: (b, 0, 0)),
      pl.BlockSpec((Bt, L, D), lambda b: (b, 0, 0)),
  ]
  w_specs = [pl.BlockSpec(tuple(w.shape), lambda b: (0, 0)) for w in weights]

  kernel = functools.partial(
      _attention_kernel, n_heads=n_heads, head_dim=C, pos_dim=D,
      seq_q=N, seq_k=L, batch_block=Bt,
      alpha_q=float(alpha_q), ln_eps=float(ln_eps))

  out, attn_lane = pl.pallas_call(
      kernel,
      out_shape=(jax.ShapeDtypeStruct((B, N, E), jnp.float32),
                 jax.ShapeDtypeStruct((B, N, n_heads * L), jnp.float32)),
      grid=(B // Bt,),
      in_specs=act_specs + w_specs,
      out_specs=(pl.BlockSpec((Bt, N, E), lambda b: (b, 0, 0)),
                 pl.BlockSpec((Bt, N, n_heads * L), lambda b: (b, 0, 0))),
      compiler_params=pltpu.CompilerParams(dimension_semantics=("parallel",)),
  )(x, xp, y, yp, *weights)

  # Lane-dense kernel layout (B, N, H*L) -> module layout (B, H, N, L).
  attn = attn_lane.reshape(B, N, n_heads, L).transpose(0, 2, 1, 3)
  return out, attn


def init_params(key, n_heads, embed_dim, pos_dim):
  E, D = embed_dim, pos_dim
  ks = jax.random.split(key, 16)
  u = lambda k, shape, lo, hi: jax.random.uniform(k, shape, jnp.float32, lo, hi)
  n = lambda k, shape: 0.1 * jax.random.normal(k, shape, jnp.float32)
  return dict(
      # PositionEncoder (weights stored as (pos_dim, embed_dim) == torch W^T)
      P_w1=u(ks[0], (D, E), -1.0 / D, 1.0 / D),
      P_b1=u(ks[1], (1, E), 0.0, math.pi),
      P_w2=u(ks[2], (D, E), -1.0 / D, 1.0 / D),
      P_b2=u(ks[3], (1, E), 0.0, math.pi),
      # QueryEncoder
      Q_gamma=jnp.ones((1, E), jnp.float32), Q_beta=jnp.zeros((1, E), jnp.float32),
      Q_w1=n(ks[4], (E, E)), Q_b1=n(ks[5], (1, E)),
      Q_w2=n(ks[6], (E, E)), Q_b2=n(ks[7], (1, E)),
      # KeyEncoder
      K_gamma=jnp.ones((1, E), jnp.float32), K_beta=jnp.zeros((1, E), jnp.float32),
      K_w1=n(ks[8], (E, E)), K_b1=n(ks[9], (1, E)),
      # V = Sequential(LayerNorm, Linear)
      V_gamma=jnp.ones((1, E), jnp.float32), V_beta=jnp.zeros((1, E), jnp.float32),
      V_w=n(ks[10], (E, E)), V_b=n(ks[11], (1, E)),
      # output projections
      proj1_w=n(ks[12], (E, E)), proj1_b=n(ks[13], (1, E)),
      proj2_w=n(ks[14], (D * n_heads, E)), proj2_b=n(ks[15], (1, E)),
  )


def reference_forward(x, xp, y, yp, params, n_heads, alpha_q, ln_eps=1e-5):
  """Pure-JAX (f32) mirror of the PyTorch forward (for validation)."""
  B, N, E = x.shape
  L = y.shape[1]
  D = xp.shape[2]
  H = n_heads
  C = E // H

  def ln(a, g, b):
    mu = a.mean(-1, keepdims=True)
    var = ((a - mu) ** 2).mean(-1, keepdims=True)
    return (a - mu) / jnp.sqrt(var + ln_eps) * g + b

  px = alpha_q * xp
  py = alpha_q * yp
  p1x = px @ params['P_w1'] + params['P_b1']
  p2x = px @ params['P_w2'] + params['P_b2']
  p1y = py @ params['P_w1']
  p2y = py @ params['P_w2']
  xp_code = [jnp.cos(p1x), jnp.sin(p1x), jnp.cos(p2x), jnp.sin(p2x)]
  yp_code = [jnp.cos(p1y), jnp.sin(p1y), jnp.cos(p2y), jnp.sin(p2y)]

  xn = ln(x, params['Q_gamma'], params['Q_beta'])
  x1 = xn @ params['Q_w1'] + params['Q_b1']
  x2 = xn @ params['Q_w2'] + params['Q_b2']
  q = jnp.concatenate([
      (x1 * xp_code[0]).reshape(B, N, H, C),
      (x1 * xp_code[1]).reshape(B, N, H, C),
      (x2 * xp_code[2]).reshape(B, N, H, C),
      (x2 * xp_code[3]).reshape(B, N, H, C)], axis=-1).transpose(0, 2, 1, 3)

  yn = ln(y, params['K_gamma'], params['K_beta'])
  y1 = yn @ params['K_w1'] + params['K_b1']
  k = jnp.concatenate([
      (y1 * yp_code[0]).reshape(B, L, H, C),
      (y1 * yp_code[1]).reshape(B, L, H, C),
      yp_code[2].reshape(B, L, H, C),
      yp_code[3].reshape(B, L, H, C)], axis=-1).transpose(0, 2, 1, 3)

  scale = q.shape[-1] ** -0.5
  attn = jnp.einsum('bhnd,bhld->bhnl', q, k) * scale
  attn = jax.nn.softmax(attn, axis=-1)

  v = ln(y, params['V_gamma'], params['V_beta']) @ params['V_w'] + params['V_b']
  v = v.reshape(B, L, H, C).transpose(0, 2, 1, 3)
  out1 = jnp.einsum('bhnl,bhlc->bhnc', attn, v)
  out1 = out1.transpose(0, 2, 1, 3).reshape(B, N, E)
  out1 = out1 @ params['proj1_w'] + params['proj1_b']

  out2 = jnp.einsum('bhnl,bld->bhnd', attn, yp) - xp[:, None]
  out2 = out2.transpose(0, 2, 1, 3).reshape(B, N, H * D)
  out2 = out2 @ params['proj2_w'] + params['proj2_b']
  return out1 + out2, attn


if __name__ == "__main__":
  B, N, L, E, H, D = 2, 8, 8, 32, 4, 2
  alpha_q = 1.0

  key = jax.random.PRNGKey(0)
  k1, k2, k3, k4, kp = jax.random.split(key, 5)
  x = jax.random.normal(k1, (B, N, E), jnp.float32)
  xp = jax.random.normal(k2, (B, N, D), jnp.float32)
  y = jax.random.normal(k3, (B, L, E), jnp.float32)
  yp = jax.random.normal(k4, (B, L, D), jnp.float32)
  params = init_params(kp, H, E, D)

  out, attn = attention_forward(x, xp, y, yp, params, n_heads=H, alpha_q=alpha_q)
  jax.block_until_ready((out, attn))

  out_ref, attn_ref = reference_forward(x, xp, y, yp, params, H, alpha_q)
  assert out.shape == (B, N, E) and attn.shape == (B, H, N, L)
  # Tolerances loosened vs. the pure-f32 kernel: matmuls use bf16 operands
  # (f32 accumulation) and the softmax denominator uses an approx reciprocal.
  assert jnp.allclose(attn, attn_ref, atol=3e-2, rtol=3e-2), "attn mismatch"
  assert jnp.allclose(out, out_ref, atol=7.5e-2, rtol=5e-2), "out mismatch"

  print("KERNEL_OK")
</pallas_src>

<mosaic_0001>
module attributes {stable_mosaic.version = 11 : i64} {
  func.func @_attention_kernel(%arg0: i32, %arg1: memref<2x8x32xf32, #tpu.memory_space<vmem>>, %arg2: memref<2x8x2xf32, #tpu.memory_space<vmem>>, %arg3: memref<2x8x32xf32, #tpu.memory_space<vmem>>, %arg4: memref<2x8x2xf32, #tpu.memory_space<vmem>>, %arg5: memref<2x32xf32, #tpu.memory_space<vmem>>, %arg6: memref<1x32xf32, #tpu.memory_space<vmem>>, %arg7: memref<2x32xf32, #tpu.memory_space<vmem>>, %arg8: memref<1x32xf32, #tpu.memory_space<vmem>>, %arg9: memref<1x32xf32, #tpu.memory_space<vmem>>, %arg10: memref<1x32xf32, #tpu.memory_space<vmem>>, %arg11: memref<32x32xbf16, #tpu.memory_space<vmem>>, %arg12: memref<1x32xf32, #tpu.memory_space<vmem>>, %arg13: memref<32x32xbf16, #tpu.memory_space<vmem>>, %arg14: memref<1x32xf32, #tpu.memory_space<vmem>>, %arg15: memref<1x32xf32, #tpu.memory_space<vmem>>, %arg16: memref<1x32xf32, #tpu.memory_space<vmem>>, %arg17: memref<32x32xbf16, #tpu.memory_space<vmem>>, %arg18: memref<1x32xf32, #tpu.memory_space<vmem>>, %arg19: memref<1x32xf32, #tpu.memory_space<vmem>>, %arg20: memref<1x32xf32, #tpu.memory_space<vmem>>, %arg21: memref<32x32xbf16, #tpu.memory_space<vmem>>, %arg22: memref<1x32xf32, #tpu.memory_space<vmem>>, %arg23: memref<32x32xbf16, #tpu.memory_space<vmem>>, %arg24: memref<1x32xf32, #tpu.memory_space<vmem>>, %arg25: memref<8x32xf32, #tpu.memory_space<vmem>>, %arg26: memref<2x32xf32, #tpu.memory_space<vmem>>, %arg27: memref<1x32xf32, #tpu.memory_space<vmem>>, %arg28: memref<2x8x32xf32, #tpu.memory_space<vmem>>, %arg29: memref<2x8x32xf32, #tpu.memory_space<vmem>>) attributes {dimension_semantics = [#tpu.dimension_semantics<parallel>], iteration_bounds = array<i64: 1>, scalar_prefetch = 0 : i64, scratch_operands = 0 : i64, tpu.core_type = #tpu.core_type<tc>, window_params = [{transform_indices = @transform_0, window_bounds = array<i64: 2, 8, 32>}, {transform_indices = @transform_1, window_bounds = array<i64: 2, 8, 2>}, {transform_indices = @transform_2, window_bounds = array<i64: 2, 8, 32>}, {transform_indices = @transform_3, window_bounds = array<i64: 2, 8, 2>}, {pipeline_mode = #tpu.pipeline_mode<synchronous>, transform_indices = @transform_4, window_bounds = array<i64: 2, 32>}, {pipeline_mode = #tpu.pipeline_mode<synchronous>, transform_indices = @transform_5, window_bounds = array<i64: 1, 32>}, {pipeline_mode = #tpu.pipeline_mode<synchronous>, transform_indices = @transform_6, window_bounds = array<i64: 2, 32>}, {pipeline_mode = #tpu.pipeline_mode<synchronous>, transform_indices = @transform_7, window_bounds = array<i64: 1, 32>}, {pipeline_mode = #tpu.pipeline_mode<synchronous>, transform_indices = @transform_8, window_bounds = array<i64: 1, 32>}, {pipeline_mode = #tpu.pipeline_mode<synchronous>, transform_indices = @transform_9, window_bounds = array<i64: 1, 32>}, {pipeline_mode = #tpu.pipeline_mode<synchronous>, transform_indices = @transform_10, window_bounds = array<i64: 32, 32>}, {pipeline_mode = #tpu.pipeline_mode<synchronous>, transform_indices = @transform_11, window_bounds = array<i64: 1, 32>}, {pipeline_mode = #tpu.pipeline_mode<synchronous>, transform_indices = @transform_12, window_bounds = array<i64: 32, 32>}, {pipeline_mode = #tpu.pipeline_mode<synchronous>, transform_indices = @transform_13, window_bounds = array<i64: 1, 32>}, {pipeline_mode = #tpu.pipeline_mode<synchronous>, transform_indices = @transform_14, window_bounds = array<i64: 1, 32>}, {pipeline_mode = #tpu.pipeline_mode<synchronous>, transform_indices = @transform_15, window_bounds = array<i64: 1, 32>}, {pipeline_mode = #tpu.pipeline_mode<synchronous>, transform_indices = @transform_16, window_bounds = array<i64: 32, 32>}, {pipeline_mode = #tpu.pipeline_mode<synchronous>, transform_indices = @transform_17, window_bounds = array<i64: 1, 32>}, {pipeline_mode = #tpu.pipeline_mode<synchronous>, transform_indices = @transform_18, window_bounds = array<i64: 1, 32>}, {pipeline_mode = #tpu.pipeline_mode<synchronous>, transform_indices = @transform_19, window_bounds = array<i64: 1, 32>}, {pipeline_mode = #tpu.pipeline_mode<synchronous>, transform_indices = @transform_20, window_bounds = array<i64: 32, 32>}, {pipeline_mode = #tpu.pipeline_mode<synchronous>, transform_indices = @transform_21, window_bounds = array<i64: 1, 32>}, {pipeline_mode = #tpu.pipeline_mode<synchronous>, transform_indices = @transform_22, window_bounds = array<i64: 32, 32>}, {pipeline_mode = #tpu.pipeline_mode<synchronous>, transform_indices = @transform_23, window_bounds = array<i64: 1, 32>}, {pipeline_mode = #tpu.pipeline_mode<synchronous>, transform_indices = @transform_24, window_bounds = array<i64: 8, 32>}, {pipeline_mode = #tpu.pipeline_mode<synchronous>, transform_indices = @transform_25, window_bounds = array<i64: 2, 32>}, {pipeline_mode = #tpu.pipeline_mode<synchronous>, transform_indices = @transform_26, window_bounds = array<i64: 1, 32>}, {transform_indices = @transform_27, window_bounds = array<i64: 2, 8, 32>}, {transform_indices = @transform_28, window_bounds = array<i64: 2, 8, 32>}]} {
    %c0 = arith.constant 0 : index
    %c0_0 = arith.constant 0 : index
    %c0_1 = arith.constant 0 : index
    %0 = vector.load %arg1[%c0, %c0_0, %c0_1] : memref<2x8x32xf32, #tpu.memory_space<vmem>>, vector<2x8x32xf32>
    %1 = vector.shape_cast %0 : vector<2x8x32xf32> to vector<16x32xf32>
    %c0_2 = arith.constant 0 : index
    %c0_3 = arith.constant 0 : index
    %c0_4 = arith.constant 0 : index
    %2 = vector.load %arg2[%c0_2, %c0_3, %c0_4] : memref<2x8x2xf32, #tpu.memory_space<vmem>>, vector<2x8x2xf32>
    %3 = vector.shape_cast %2 : vector<2x8x2xf32> to vector<16x2xf32>
    %c0_5 = arith.constant 0 : index
    %c0_6 = arith.constant 0 : index
    %c0_7 = arith.constant 0 : index
    %4 = vector.load %arg3[%c0_5, %c0_6, %c0_7] : memref<2x8x32xf32, #tpu.memory_space<vmem>>, vector<2x8x32xf32>
    %5 = vector.shape_cast %4 : vector<2x8x32xf32> to vector<16x32xf32>
    %c0_8 = arith.constant 0 : index
    %c0_9 = arith.constant 0 : index
    %c0_10 = arith.constant 0 : index
    %6 = vector.load %arg4[%c0_8, %c0_9, %c0_10] : memref<2x8x2xf32, #tpu.memory_space<vmem>>, vector<2x8x2xf32>
    %7 = vector.shape_cast %6 : vector<2x8x2xf32> to vector<16x2xf32>
    %cst = arith.constant 1.000000e+00 : f32
    %8 = vector.broadcast %cst : f32 to vector<16x2xf32>
    %9 = arith.mulf %8, %3 : vector<16x2xf32>
    %cst_11 = arith.constant 1.000000e+00 : f32
    %10 = vector.broadcast %cst_11 : f32 to vector<16x2xf32>
    %11 = arith.mulf %10, %7 : vector<16x2xf32>
    %c0_12 = arith.constant 0 : index
    %c0_13 = arith.constant 0 : index
    %12 = vector.load %arg5[%c0_12, %c0_13] : memref<2x32xf32, #tpu.memory_space<vmem>>, vector<2x32xf32>
    %cst_14 = arith.constant dense<0.000000e+00> : vector<16x32xf32>
    %13 = tpu.matmul %9, %12, %cst_14 {dimension_numbers = #tpu.dot_dimension_numbers<[1], [0], [0], [1], [0, 0, 1, 1], [], []>} : vector<16x2xf32>, vector<2x32xf32>, vector<16x32xf32> -> vector<16x32xf32>
    %c0_15 = arith.constant 0 : index
    %c0_16 = arith.constant 0 : index
    %14 = vector.load %arg6[%c0_15, %c0_16] : memref<1x32xf32, #tpu.memory_space<vmem>>, vector<1x32xf32>
    %15 = vector.broadcast %14 : vector<1x32xf32> to vector<16x32xf32>
    %16 = arith.addf %13, %15 : vector<16x32xf32>
    %c0_17 = arith.constant 0 : index
    %c0_18 = arith.constant 0 : index
    %17 = vector.load %arg7[%c0_17, %c0_18] : memref<2x32xf32, #tpu.memory_space<vmem>>, vector<2x32xf32>
    %cst_19 = arith.constant dense<0.000000e+00> : vector<16x32xf32>
    %18 = tpu.matmul %9, %17, %cst_19 {dimension_numbers = #tpu.dot_dimension_numbers<[1], [0], [0], [1], [0, 0, 1, 1], [], []>} : vector<16x2xf32>, vector<2x32xf32>, vector<16x32xf32> -> vector<16x32xf32>
    %c0_20 = arith.constant 0 : index
    %c0_21 = arith.constant 0 : index
    %19 = vector.load %arg8[%c0_20, %c0_21] : memref<1x32xf32, #tpu.memory_space<vmem>>, vector<1x32xf32>
    %20 = vector.broadcast %19 : vector<1x32xf32> to vector<16x32xf32>
    %21 = arith.addf %18, %20 : vector<16x32xf32>
    %c0_22 = arith.constant 0 : index
    %c0_23 = arith.constant 0 : index
    %22 = vector.load %arg5[%c0_22, %c0_23] : memref<2x32xf32, #tpu.memory_space<vmem>>, vector<2x32xf32>
    %cst_24 = arith.constant dense<0.000000e+00> : vector<16x32xf32>
    %23 = tpu.matmul %11, %22, %cst_24 {dimension_numbers = #tpu.dot_dimension_numbers<[1], [0], [0], [1], [0, 0, 1, 1], [], []>} : vector<16x2xf32>, vector<2x32xf32>, vector<16x32xf32> -> vector<16x32xf32>
    %c0_25 = arith.constant 0 : index
    %c0_26 = arith.constant 0 : index
    %24 = vector.load %arg7[%c0_25, %c0_26] : memref<2x32xf32, #tpu.memory_space<vmem>>, vector<2x32xf32>
    %cst_27 = arith.constant dense<0.000000e+00> : vector<16x32xf32>
    %25 = tpu.matmul %11, %24, %cst_27 {dimension_numbers = #tpu.dot_dimension_numbers<[1], [0], [0], [1], [0, 0, 1, 1], [], []>} : vector<16x2xf32>, vector<2x32xf32>, vector<16x32xf32> -> vector<16x32xf32>
    %c0_28 = arith.constant 0 : index
    %c0_29 = arith.constant 0 : index
    %26 = vector.load %arg9[%c0_28, %c0_29] : memref<1x32xf32, #tpu.memory_space<vmem>>, vector<1x32xf32>
    %c0_30 = arith.constant 0 : index
    %c0_31 = arith.constant 0 : index
    %27 = vector.load %arg10[%c0_30, %c0_31] : memref<1x32xf32, #tpu.memory_space<vmem>>, vector<1x32xf32>
    %cst_32 = arith.constant dense<0.000000e+00> : vector<16xf32>
    %28 = vector.multi_reduction <add>, %1, %cst_32 [1] : vector<16x32xf32> to vector<16xf32>
    %29 = vector.shape_cast %28 : vector<16xf32> to vector<16x1xf32>
    %cst_33 = arith.constant 3.200000e+01 : f32
    %30 = vector.broadcast %cst_33 : f32 to vector<16x1xf32>
    %31 = arith.divf %29, %30 : vector<16x1xf32>
    %32 = vector.broadcast %31 : vector<16x1xf32> to vector<16x32xf32>
    %33 = arith.subf %1, %32 : vector<16x32xf32>
    %34 = vector.broadcast %31 : vector<16x1xf32> to vector<16x32xf32>
    %35 = arith.subf %1, %34 : vector<16x32xf32>
    %36 = arith.mulf %33, %35 : vector<16x32xf32>
    %cst_34 = arith.constant dense<0.000000e+00> : vector<16xf32>
    %37 = vector.multi_reduction <add>, %36, %cst_34 [1] : vector<16x32xf32> to vector<16xf32>
    %38 = vector.shape_cast %37 : vector<16xf32> to vector<16x1xf32>
    %cst_35 = arith.constant 3.200000e+01 : f32
    %39 = vector.broadcast %cst_35 : f32 to vector<16x1xf32>
    %40 = arith.divf %38, %39 : vector<16x1xf32>
    %41 = vector.broadcast %31 : vector<16x1xf32> to vector<16x32xf32>
    %42 = arith.subf %1, %41 : vector<16x32xf32>
    %cst_36 = arith.constant 9.99999974E-6 : f32
    %43 = vector.broadcast %cst_36 : f32 to vector<16x1xf32>
    %44 = arith.addf %40, %43 : vector<16x1xf32>
    %45 = math.rsqrt %44 : vector<16x1xf32>
    %46 = vector.broadcast %45 : vector<16x1xf32> to vector<16x32xf32>
    %47 = arith.mulf %42, %46 : vector<16x32xf32>
    %48 = vector.broadcast %26 : vector<1x32xf32> to vector<16x32xf32>
    %49 = arith.mulf %47, %48 : vector<16x32xf32>
    %50 = vector.broadcast %27 : vector<1x32xf32> to vector<16x32xf32>
    %51 = arith.addf %49, %50 : vector<16x32xf32>
    %52 = arith.truncf %51 : vector<16x32xf32> to vector<16x32xbf16>
    %c0_37 = arith.constant 0 : index
    %c0_38 = arith.constant 0 : index
    %53 = vector.load %arg11[%c0_37, %c0_38] : memref<32x32xbf16, #tpu.memory_space<vmem>>, vector<32x32xbf16>
    %cst_39 = arith.constant dense<0.000000e+00> : vector<16x32xf32>
    %54 = tpu.matmul %52, %53, %cst_39 {dimension_numbers = #tpu.dot_dimension_numbers<[1], [0], [0], [1], [0, 0, 1, 1], [], []>} : vector<16x32xbf16>, vector<32x32xbf16>, vector<16x32xf32> -> vector<16x32xf32>
    %c0_40 = arith.constant 0 : index
    %c0_41 = arith.constant 0 : index
    %55 = vector.load %arg12[%c0_40, %c0_41] : memref<1x32xf32, #tpu.memory_space<vmem>>, vector<1x32xf32>
    %56 = vector.broadcast %55 : vector<1x32xf32> to vector<16x32xf32>
    %57 = arith.addf %54, %56 : vector<16x32xf32>
    %c0_42 = arith.constant 0 : index
    %c0_43 = arith.constant 0 : index
    %58 = vector.load %arg13[%c0_42, %c0_43] : memref<32x32xbf16, #tpu.memory_space<vmem>>, vector<32x32xbf16>
    %cst_44 = arith.constant dense<0.000000e+00> : vector<16x32xf32>
    %59 = tpu.matmul %52, %58, %cst_44 {dimension_numbers = #tpu.dot_dimension_numbers<[1], [0], [0], [1], [0, 0, 1, 1], [], []>} : vector<16x32xbf16>, vector<32x32xbf16>, vector<16x32xf32> -> vector<16x32xf32>
    %c0_45 = arith.constant 0 : index
    %c0_46 = arith.constant 0 : index
    %60 = vector.load %arg14[%c0_45, %c0_46] : memref<1x32xf32, #tpu.memory_space<vmem>>, vector<1x32xf32>
    %61 = vector.broadcast %60 : vector<1x32xf32> to vector<16x32xf32>
    %62 = arith.addf %59, %61 : vector<16x32xf32>
    %c0_47 = arith.constant 0 : index
    %c0_48 = arith.constant 0 : index
    %63 = vector.load %arg15[%c0_47, %c0_48] : memref<1x32xf32, #tpu.memory_space<vmem>>, vector<1x32xf32>
    %c0_49 = arith.constant 0 : index
    %c0_50 = arith.constant 0 : index
    %64 = vector.load %arg16[%c0_49, %c0_50] : memref<1x32xf32, #tpu.memory_space<vmem>>, vector<1x32xf32>
    %cst_51 = arith.constant dense<0.000000e+00> : vector<16xf32>
    %65 = vector.multi_reduction <add>, %5, %cst_51 [1] : vector<16x32xf32> to vector<16xf32>
    %66 = vector.shape_cast %65 : vector<16xf32> to vector<16x1xf32>
    %cst_52 = arith.constant 3.200000e+01 : f32
    %67 = vector.broadcast %cst_52 : f32 to vector<16x1xf32>
    %68 = arith.divf %66, %67 : vector<16x1xf32>
    %69 = vector.broadcast %68 : vector<16x1xf32> to vector<16x32xf32>
    %70 = arith.subf %5, %69 : vector<16x32xf32>
    %71 = vector.broadcast %68 : vector<16x1xf32> to vector<16x32xf32>
    %72 = arith.subf %5, %71 : vector<16x32xf32>
    %73 = arith.mulf %70, %72 : vector<16x32xf32>
    %cst_53 = arith.constant dense<0.000000e+00> : vector<16xf32>
    %74 = vector.multi_reduction <add>, %73, %cst_53 [1] : vector<16x32xf32> to vector<16xf32>
    %75 = vector.shape_cast %74 : vector<16xf32> to vector<16x1xf32>
    %cst_54 = arith.constant 3.200000e+01 : f32
    %76 = vector.broadcast %cst_54 : f32 to vector<16x1xf32>
    %77 = arith.divf %75, %76 : vector<16x1xf32>
    %78 = vector.broadcast %68 : vector<16x1xf32> to vector<16x32xf32>
    %79 = arith.subf %5, %78 : vector<16x32xf32>
    %cst_55 = arith.constant 9.99999974E-6 : f32
    %80 = vector.broadcast %cst_55 : f32 to vector<16x1xf32>
    %81 = arith.addf %77, %80 : vector<16x1xf32>
    %82 = math.rsqrt %81 : vector<16x1xf32>
    %83 = vector.broadcast %82 : vector<16x1xf32> to vector<16x32xf32>
    %84 = arith.mulf %79, %83 : vector<16x32xf32>
    %85 = vector.broadcast %63 : vector<1x32xf32> to vector<16x32xf32>
    %86 = arith.mulf %84, %85 : vector<16x32xf32>
    %87 = vector.broadcast %64 : vector<1x32xf32> to vector<16x32xf32>
    %88 = arith.addf %86, %87 : vector<16x32xf32>
    %89 = arith.truncf %88 : vector<16x32xf32> to vector<16x32xbf16>
    %c0_56 = arith.constant 0 : index
    %c0_57 = arith.constant 0 : index
    %90 = vector.load %arg17[%c0_56, %c0_57] : memref<32x32xbf16, #tpu.memory_space<vmem>>, vector<32x32xbf16>
    %cst_58 = arith.constant dense<0.000000e+00> : vector<16x32xf32>
    %91 = tpu.matmul %89, %90, %cst_58 {dimension_numbers = #tpu.dot_dimension_numbers<[1], [0], [0], [1], [0, 0, 1, 1], [], []>} : vector<16x32xbf16>, vector<32x32xbf16>, vector<16x32xf32> -> vector<16x32xf32>
    %c0_59 = arith.constant 0 : index
    %c0_60 = arith.constant 0 : index
    %92 = vector.load %arg18[%c0_59, %c0_60] : memref<1x32xf32, #tpu.memory_space<vmem>>, vector<1x32xf32>
    %93 = vector.broadcast %92 : vector<1x32xf32> to vector<16x32xf32>
    %94 = arith.addf %91, %93 : vector<16x32xf32>
    %c0_61 = arith.constant 0 : index
    %c0_62 = arith.constant 0 : index
    %95 = vector.load %arg19[%c0_61, %c0_62] : memref<1x32xf32, #tpu.memory_space<vmem>>, vector<1x32xf32>
    %c0_63 = arith.constant 0 : index
    %c0_64 = arith.constant 0 : index
    %96 = vector.load %arg20[%c0_63, %c0_64] : memref<1x32xf32, #tpu.memory_space<vmem>>, vector<1x32xf32>
    %cst_65 = arith.constant dense<0.000000e+00> : vector<16xf32>
    %97 = vector.multi_reduction <add>, %5, %cst_65 [1] : vector<16x32xf32> to vector<16xf32>
    %98 = vector.shape_cast %97 : vector<16xf32> to vector<16x1xf32>
    %cst_66 = arith.constant 3.200000e+01 : f32
    %99 = vector.broadcast %cst_66 : f32 to vector<16x1xf32>
    %100 = arith.divf %98, %99 : vector<16x1xf32>
    %101 = vector.broadcast %100 : vector<16x1xf32> to vector<16x32xf32>
    %102 = arith.subf %5, %101 : vector<16x32xf32>
    %103 = vector.broadcast %100 : vector<16x1xf32> to vector<16x32xf32>
    %104 = arith.subf %5, %103 : vector<16x32xf32>
    %105 = arith.mulf %102, %104 : vector<16x32xf32>
    %cst_67 = arith.constant dense<0.000000e+00> : vector<16xf32>
    %106 = vector.multi_reduction <add>, %105, %cst_67 [1] : vector<16x32xf32> to vector<16xf32>
    %107 = vector.shape_cast %106 : vector<16xf32> to vector<16x1xf32>
    %cst_68 = arith.constant 3.200000e+01 : f32
    %108 = vector.broadcast %cst_68 : f32 to vector<16x1xf32>
    %109 = arith.divf %107, %108 : vector<16x1xf32>
    %110 = vector.broadcast %100 : vector<16x1xf32> to vector<16x32xf32>
    %111 = arith.subf %5, %110 : vector<16x32xf32>
    %cst_69 = arith.constant 9.99999974E-6 : f32
    %112 = vector.broadcast %cst_69 : f32 to vector<16x1xf32>
    %113 = arith.addf %109, %112 : vector<16x1xf32>
    %114 = math.rsqrt %113 : vector<16x1xf32>
    %115 = vector.broadcast %114 : vector<16x1xf32> to vector<16x32xf32>
    %116 = arith.mulf %111, %115 : vector<16x32xf32>
    %117 = vector.broadcast %95 : vector<1x32xf32> to vector<16x32xf32>
    %118 = arith.mulf %116, %117 : vector<16x32xf32>
    %119 = vector.broadcast %96 : vector<1x32xf32> to vector<16x32xf32>
    %120 = arith.addf %118, %119 : vector<16x32xf32>
    %121 = arith.truncf %120 : vector<16x32xf32> to vector<16x32xbf16>
    %c0_70 = arith.constant 0 : index
    %c0_71 = arith.constant 0 : index
    %122 = vector.load %arg21[%c0_70, %c0_71] : memref<32x32xbf16, #tpu.memory_space<vmem>>, vector<32x32xbf16>
    %cst_72 = arith.constant dense<0.000000e+00> : vector<16x32xf32>
    %123 = tpu.matmul %121, %122, %cst_72 {dimension_numbers = #tpu.dot_dimension_numbers<[1], [0], [0], [1], [0, 0, 1, 1], [], []>} : vector<16x32xbf16>, vector<32x32xbf16>, vector<16x32xf32> -> vector<16x32xf32>
    %c0_73 = arith.constant 0 : index
    %c0_74 = arith.constant 0 : index
    %124 = vector.load %arg22[%c0_73, %c0_74] : memref<1x32xf32, #tpu.memory_space<vmem>>, vector<1x32xf32>
    %125 = vector.broadcast %124 : vector<1x32xf32> to vector<16x32xf32>
    %126 = arith.addf %123, %125 : vector<16x32xf32>
    %127 = arith.truncf %126 : vector<16x32xf32> to vector<16x32xbf16>
    %128 = math.cos %16 : vector<16x32xf32>
    %129 = arith.mulf %57, %128 : vector<16x32xf32>
    %130 = arith.truncf %129 : vector<16x32xf32> to vector<16x32xbf16>
    %131 = math.sin %16 : vector<16x32xf32>
    %132 = arith.mulf %57, %131 : vector<16x32xf32>
    %133 = arith.truncf %132 : vector<16x32xf32> to vector<16x32xbf16>
    %134 = math.cos %21 : vector<16x32xf32>
    %135 = arith.mulf %62, %134 : vector<16x32xf32>
    %136 = arith.truncf %135 : vector<16x32xf32> to vector<16x32xbf16>
    %137 = math.sin %21 : vector<16x32xf32>
    %138 = arith.mulf %62, %137 : vector<16x32xf32>
    %139 = arith.truncf %138 : vector<16x32xf32> to vector<16x32xbf16>
    %140 = math.cos %23 : vector<16x32xf32>
    %141 = arith.mulf %94, %140 : vector<16x32xf32>
    %142 = arith.truncf %141 : vector<16x32xf32> to vector<16x32xbf16>
    %143 = math.sin %23 : vector<16x32xf32>
    %144 = arith.mulf %94, %143 : vector<16x32xf32>
    %145 = arith.truncf %144 : vector<16x32xf32> to vector<16x32xbf16>
    %146 = math.cos %25 : vector<16x32xf32>
    %147 = arith.truncf %146 : vector<16x32xf32> to vector<16x32xbf16>
    %148 = math.sin %25 : vector<16x32xf32>
    %149 = arith.truncf %148 : vector<16x32xf32> to vector<16x32xbf16>
    %c0_75 = arith.constant 0 : index
    %c0_76 = arith.constant 0 : index
    %150 = vector.load %arg25[%c0_75, %c0_76] : memref<8x32xf32, #tpu.memory_space<vmem>>, vector<8x32xf32>
    %c0_77 = arith.constant 0 : index
    %c0_78 = arith.constant 0 : index
    %151 = vector.load %arg26[%c0_77, %c0_78] : memref<2x32xf32, #tpu.memory_space<vmem>>, vector<2x32xf32>
    %cst_79 = arith.constant dense<0.000000e+00> : vector<16x32xf32>
    %152 = tpu.matmul %3, %151, %cst_79 {dimension_numbers = #tpu.dot_dimension_numbers<[1], [0], [0], [1], [0, 0, 1, 1], [], []>} : vector<16x2xf32>, vector<2x32xf32>, vector<16x32xf32> -> vector<16x32xf32>
    %153 = vector.extract_strided_slice %7 {offsets = [0, 0], sizes = [8, 2], strides = [1, 1]} : vector<16x2xf32> to vector<8x2xf32>
    %154 = vector.extract_strided_slice %130 {offsets = [0, 0], sizes = [8, 8], strides = [1, 1]} : vector<16x32xbf16> to vector<8x8xbf16>
    %155 = vector.extract_strided_slice %133 {offsets = [0, 0], sizes = [8, 8], strides = [1, 1]} : vector<16x32xbf16> to vector<8x8xbf16>
    %156 = vector.extract_strided_slice %136 {offsets = [0, 0], sizes = [8, 8], strides = [1, 1]} : vector<16x32xbf16> to vector<8x8xbf16>
    %157 = vector.extract_strided_slice %139 {offsets = [0, 0], sizes = [8, 8], strides = [1, 1]} : vector<16x32xbf16> to vector<8x8xbf16>
    %158 = tpu.concatenate %154, %155, %156, %157 in 1 : vector<8x8xbf16>, vector<8x8xbf16>, vector<8x8xbf16>, vector<8x8xbf16> -> vector<8x32xbf16>
    %159 = vector.extract_strided_slice %142 {offsets = [0, 0], sizes = [8, 8], strides = [1, 1]} : vector<16x32xbf16> to vector<8x8xbf16>
    %160 = vector.extract_strided_slice %145 {offsets = [0, 0], sizes = [8, 8], strides = [1, 1]} : vector<16x32xbf16> to vector<8x8xbf16>
    %161 = vector.extract_strided_slice %147 {offsets = [0, 0], sizes = [8, 8], strides = [1, 1]} : vector<16x32xbf16> to vector<8x8xbf16>
    %162 = vector.extract_strided_slice %149 {offsets = [0, 0], sizes = [8, 8], strides = [1, 1]} : vector<16x32xbf16> to vector<8x8xbf16>
    %163 = tpu.concatenate %159, %160, %161, %162 in 1 : vector<8x8xbf16>, vector<8x8xbf16>, vector<8x8xbf16>, vector<8x8xbf16> -> vector<8x32xbf16>
    %cst_80 = arith.constant dense<0.000000e+00> : vector<8x8xf32>
    %164 = tpu.matmul %158, %163, %cst_80 {dimension_numbers = #tpu.dot_dimension_numbers<[1], [1], [0], [0], [0, 0, 1, 0], [], []>} : vector<8x32xbf16>, vector<8x32xbf16>, vector<8x8xf32> -> vector<8x8xf32>
    %cst_81 = arith.constant 0.176776692 : f32
    %165 = vector.broadcast %cst_81 : f32 to vector<8x8xf32>
    %166 = arith.mulf %164, %165 : vector<8x8xf32>
    %cst_82 = arith.constant dense<0xFF800000> : vector<8xf32>
    %167 = vector.multi_reduction <maximumf>, %166, %cst_82 [1] : vector<8x8xf32> to vector<8xf32>
    %168 = vector.shape_cast %167 : vector<8xf32> to vector<8x1xf32>
    %169 = vector.broadcast %168 : vector<8x1xf32> to vector<8x8xf32>
    %170 = arith.subf %166, %169 : vector<8x8xf32>
    %171 = math.exp %170 : vector<8x8xf32>
    %cst_83 = arith.constant dense<0.000000e+00> : vector<8xf32>
    %172 = vector.multi_reduction <add>, %171, %cst_83 [1] : vector<8x8xf32> to vector<8xf32>
    %173 = vector.shape_cast %172 : vector<8xf32> to vector<8x1xf32>
    %174 = tpu.reciprocal %173 {approx = true} : vector<8x1xf32> -> vector<8x1xf32>
    %175 = vector.broadcast %174 : vector<8x1xf32> to vector<8x8xf32>
    %176 = arith.mulf %171, %175 : vector<8x8xf32>
    %177 = arith.truncf %176 : vector<8x8xf32> to vector<8x8xbf16>
    %178 = vector.extract_strided_slice %127 {offsets = [0, 0], sizes = [8, 8], strides = [1, 1]} : vector<16x32xbf16> to vector<8x8xbf16>
    %cst_84 = arith.constant dense<0.000000e+00> : vector<8x8xf32>
    %179 = tpu.matmul %177, %178, %cst_84 {dimension_numbers = #tpu.dot_dimension_numbers<[1], [0], [0], [1], [0, 0, 1, 1], [], []>} : vector<8x8xbf16>, vector<8x8xbf16>, vector<8x8xf32> -> vector<8x8xf32>
    %180 = vector.extract_strided_slice %150 {offsets = [0, 0], sizes = [2, 32], strides = [1, 1]} : vector<8x32xf32> to vector<2x32xf32>
    %cst_85 = arith.constant dense<0.000000e+00> : vector<8x32xf32>
    %181 = tpu.matmul %153, %180, %cst_85 {dimension_numbers = #tpu.dot_dimension_numbers<[1], [0], [0], [1], [0, 0, 1, 1], [], []>} : vector<8x2xf32>, vector<2x32xf32>, vector<8x32xf32> -> vector<8x32xf32>
    %182 = vector.extract_strided_slice %130 {offsets = [0, 8], sizes = [8, 8], strides = [1, 1]} : vector<16x32xbf16> to vector<8x8xbf16>
    %183 = vector.extract_strided_slice %133 {offsets = [0, 8], sizes = [8, 8], strides = [1, 1]} : vector<16x32xbf16> to vector<8x8xbf16>
    %184 = vector.extract_strided_slice %136 {offsets = [0, 8], sizes = [8, 8], strides = [1, 1]} : vector<16x32xbf16> to vector<8x8xbf16>
    %185 = vector.extract_strided_slice %139 {offsets = [0, 8], sizes = [8, 8], strides = [1, 1]} : vector<16x32xbf16> to vector<8x8xbf16>
    %186 = tpu.concatenate %182, %183, %184, %185 in 1 : vector<8x8xbf16>, vector<8x8xbf16>, vector<8x8xbf16>, vector<8x8xbf16> -> vector<8x32xbf16>
    %187 = vector.extract_strided_slice %142 {offsets = [0, 8], sizes = [8, 8], strides = [1, 1]} : vector<16x32xbf16> to vector<8x8xbf16>
    %188 = vector.extract_strided_slice %145 {offsets = [0, 8], sizes = [8, 8], strides = [1, 1]} : vector<16x32xbf16> to vector<8x8xbf16>
    %189 = vector.extract_strided_slice %147 {offsets = [0, 8], sizes = [8, 8], strides = [1, 1]} : vector<16x32xbf16> to vector<8x8xbf16>
    %190 = vector.extract_strided_slice %149 {offsets = [0, 8], sizes = [8, 8], strides = [1, 1]} : vector<16x32xbf16> to vector<8x8xbf16>
    %191 = tpu.concatenate %187, %188, %189, %190 in 1 : vector<8x8xbf16>, vector<8x8xbf16>, vector<8x8xbf16>, vector<8x8xbf16> -> vector<8x32xbf16>
    %cst_86 = arith.constant dense<0.000000e+00> : vector<8x8xf32>
    %192 = tpu.matmul %186, %191, %cst_86 {dimension_numbers = #tpu.dot_dimension_numbers<[1], [1], [0], [0], [0, 0, 1, 0], [], []>} : vector<8x32xbf16>, vector<8x32xbf16>, vector<8x8xf32> -> vector<8x8xf32>
    %cst_87 = arith.constant 0.176776692 : f32
    %193 = vector.broadcast %cst_87 : f32 to vector<8x8xf32>
    %194 = arith.mulf %192, %193 : vector<8x8xf32>
    %cst_88 = arith.constant dense<0xFF800000> : vector<8xf32>
    %195 = vector.multi_reduction <maximumf>, %194, %cst_88 [1] : vector<8x8xf32> to vector<8xf32>
    %196 = vector.shape_cast %195 : vector<8xf32> to vector<8x1xf32>
    %197 = vector.broadcast %196 : vector<8x1xf32> to vector<8x8xf32>
    %198 = arith.subf %194, %197 : vector<8x8xf32>
    %199 = math.exp %198 : vector<8x8xf32>
    %cst_89 = arith.constant dense<0.000000e+00> : vector<8xf32>
    %200 = vector.multi_reduction <add>, %199, %cst_89 [1] : vector<8x8xf32> to vector<8xf32>
    %201 = vector.shape_cast %200 : vector<8xf32> to vector<8x1xf32>
    %202 = tpu.reciprocal %201 {approx = true} : vector<8x1xf32> -> vector<8x1xf32>
    %203 = vector.broadcast %202 : vector<8x1xf32> to vector<8x8xf32>
    %204 = arith.mulf %199, %203 : vector<8x8xf32>
    %205 = arith.truncf %204 : vector<8x8xf32> to vector<8x8xbf16>
    %206 = vector.extract_strided_slice %127 {offsets = [0, 8], sizes = [8, 8], strides = [1, 1]} : vector<16x32xbf16> to vector<8x8xbf16>
    %cst_90 = arith.constant dense<0.000000e+00> : vector<8x8xf32>
    %207 = tpu.matmul %205, %206, %cst_90 {dimension_numbers = #tpu.dot_dimension_numbers<[1], [0], [0], [1], [0, 0, 1, 1], [], []>} : vector<8x8xbf16>, vector<8x8xbf16>, vector<8x8xf32> -> vector<8x8xf32>
    %208 = vector.extract_strided_slice %150 {offsets = [2, 0], sizes = [2, 32], strides = [1, 1]} : vector<8x32xf32> to vector<2x32xf32>
    %cst_91 = arith.constant dense<0.000000e+00> : vector<8x32xf32>
    %209 = tpu.matmul %153, %208, %cst_91 {dimension_numbers = #tpu.dot_dimension_numbers<[1], [0], [0], [1], [0, 0, 1, 1], [], []>} : vector<8x2xf32>, vector<2x32xf32>, vector<8x32xf32> -> vector<8x32xf32>
    %210 = vector.extract_strided_slice %130 {offsets = [0, 16], sizes = [8, 8], strides = [1, 1]} : vector<16x32xbf16> to vector<8x8xbf16>
    %211 = vector.extract_strided_slice %133 {offsets = [0, 16], sizes = [8, 8], strides = [1, 1]} : vector<16x32xbf16> to vector<8x8xbf16>
    %212 = vector.extract_strided_slice %136 {offsets = [0, 16], sizes = [8, 8], strides = [1, 1]} : vector<16x32xbf16> to vector<8x8xbf16>
    %213 = vector.extract_strided_slice %139 {offsets = [0, 16], sizes = [8, 8], strides = [1, 1]} : vector<16x32xbf16> to vector<8x8xbf16>
    %214 = tpu.concatenate %210, %211, %212, %213 in 1 : vector<8x8xbf16>, vector<8x8xbf16>, vector<8x8xbf16>, vector<8x8xbf16> -> vector<8x32xbf16>
    %215 = vector.extract_strided_slice %142 {offsets = [0, 16], sizes = [8, 8], strides = [1, 1]} : vector<16x32xbf16> to vector<8x8xbf16>
    %216 = vector.extract_strided_slice %145 {offsets = [0, 16], sizes = [8, 8], strides = [1, 1]} : vector<16x32xbf16> to vector<8x8xbf16>
    %217 = vector.extract_strided_slice %147 {offsets = [0, 16], sizes = [8, 8], strides = [1, 1]} : vector<16x32xbf16> to vector<8x8xbf16>
    %218 = vector.extract_strided_slice %149 {offsets = [0, 16], sizes = [8, 8], strides = [1, 1]} : vector<16x32xbf16> to vector<8x8xbf16>
    %219 = tpu.concatenate %215, %216, %217, %218 in 1 : vector<8x8xbf16>, vector<8x8xbf16>, vector<8x8xbf16>, vector<8x8xbf16> -> vector<8x32xbf16>
    %cst_92 = arith.constant dense<0.000000e+00> : vector<8x8xf32>
    %220 = tpu.matmul %214, %219, %cst_92 {dimension_numbers = #tpu.dot_dimension_numbers<[1], [1], [0], [0], [0, 0, 1, 0], [], []>} : vector<8x32xbf16>, vector<8x32xbf16>, vector<8x8xf32> -> vector<8x8xf32>
    %cst_93 = arith.constant 0.176776692 : f32
    %221 = vector.broadcast %cst_93 : f32 to vector<8x8xf32>
    %222 = arith.mulf %220, %221 : vector<8x8xf32>
    %cst_94 = arith.constant dense<0xFF800000> : vector<8xf32>
    %223 = vector.multi_reduction <maximumf>, %222, %cst_94 [1] : vector<8x8xf32> to vector<8xf32>
    %224 = vector.shape_cast %223 : vector<8xf32> to vector<8x1xf32>
    %225 = vector.broadcast %224 : vector<8x1xf32> to vector<8x8xf32>
    %226 = arith.subf %222, %225 : vector<8x8xf32>
    %227 = math.exp %226 : vector<8x8xf32>
    %cst_95 = arith.constant dense<0.000000e+00> : vector<8xf32>
    %228 = vector.multi_reduction <add>, %227, %cst_95 [1] : vector<8x8xf32> to vector<8xf32>
    %229 = vector.shape_cast %228 : vector<8xf32> to vector<8x1xf32>
    %230 = tpu.reciprocal %229 {approx = true} : vector<8x1xf32> -> vector<8x1xf32>
    %231 = vector.broadcast %230 : vector<8x1xf32> to vector<8x8xf32>
    %232 = arith.mulf %227, %231 : vector<8x8xf32>
    %233 = arith.truncf %232 : vector<8x8xf32> to vector<8x8xbf16>
    %234 = vector.extract_strided_slice %127 {offsets = [0, 16], sizes = [8, 8], strides = [1, 1]} : vector<16x32xbf16> to vector<8x8xbf16>
    %cst_96 = arith.constant dense<0.000000e+00> : vector<8x8xf32>
    %235 = tpu.matmul %233, %234, %cst_96 {dimension_numbers = #tpu.dot_dimension_numbers<[1], [0], [0], [1], [0, 0, 1, 1], [], []>} : vector<8x8xbf16>, vector<8x8xbf16>, vector<8x8xf32> -> vector<8x8xf32>
    %236 = vector.extract_strided_slice %150 {offsets = [4, 0], sizes = [2, 32], strides = [1, 1]} : vector<8x32xf32> to vector<2x32xf32>
    %cst_97 = arith.constant dense<0.000000e+00> : vector<8x32xf32>
    %237 = tpu.matmul %153, %236, %cst_97 {dimension_numbers = #tpu.dot_dimension_numbers<[1], [0], [0], [1], [0, 0, 1, 1], [], []>} : vector<8x2xf32>, vector<2x32xf32>, vector<8x32xf32> -> vector<8x32xf32>
    %238 = vector.extract_strided_slice %130 {offsets = [0, 24], sizes = [8, 8], strides = [1, 1]} : vector<16x32xbf16> to vector<8x8xbf16>
    %239 = vector.extract_strided_slice %133 {offsets = [0, 24], sizes = [8, 8], strides = [1, 1]} : vector<16x32xbf16> to vector<8x8xbf16>
    %240 = vector.extract_strided_slice %136 {offsets = [0, 24], sizes = [8, 8], strides = [1, 1]} : vector<16x32xbf16> to vector<8x8xbf16>
    %241 = vector.extract_strided_slice %139 {offsets = [0, 24], sizes = [8, 8], strides = [1, 1]} : vector<16x32xbf16> to vector<8x8xbf16>
    %242 = tpu.concatenate %238, %239, %240, %241 in 1 : vector<8x8xbf16>, vector<8x8xbf16>, vector<8x8xbf16>, vector<8x8xbf16> -> vector<8x32xbf16>
    %243 = vector.extract_strided_slice %142 {offsets = [0, 24], sizes = [8, 8], strides = [1, 1]} : vector<16x32xbf16> to vector<8x8xbf16>
    %244 = vector.extract_strided_slice %145 {offsets = [0, 24], sizes = [8, 8], strides = [1, 1]} : vector<16x32xbf16> to vector<8x8xbf16>
    %245 = vector.extract_strided_slice %147 {offsets = [0, 24], sizes = [8, 8], strides = [1, 1]} : vector<16x32xbf16> to vector<8x8xbf16>
    %246 = vector.extract_strided_slice %149 {offsets = [0, 24], sizes = [8, 8], strides = [1, 1]} : vector<16x32xbf16> to vector<8x8xbf16>
    %247 = tpu.concatenate %243, %244, %245, %246 in 1 : vector<8x8xbf16>, vector<8x8xbf16>, vector<8x8xbf16>, vector<8x8xbf16> -> vector<8x32xbf16>
    %cst_98 = arith.constant dense<0.000000e+00> : vector<8x8xf32>
    %248 = tpu.matmul %242, %247, %cst_98 {dimension_numbers = #tpu.dot_dimension_numbers<[1], [1], [0], [0], [0, 0, 1, 0], [], []>} : vector<8x32xbf16>, vector<8x32xbf16>, vector<8x8xf32> -> vector<8x8xf32>
    %cst_99 = arith.constant 0.176776692 : f32
    %249 = vector.broadcast %cst_99 : f32 to vector<8x8xf32>
    %250 = arith.mulf %248, %249 : vector<8x8xf32>
    %cst_100 = arith.constant dense<0xFF800000> : vector<8xf32>
    %251 = vector.multi_reduction <maximumf>, %250, %cst_100 [1] : vector<8x8xf32> to vector<8xf32>
    %252 = vector.shape_cast %251 : vector<8xf32> to vector<8x1xf32>
    %253 = vector.broadcast %252 : vector<8x1xf32> to vector<8x8xf32>
    %254 = arith.subf %250, %253 : vector<8x8xf32>
    %255 = math.exp %254 : vector<8x8xf32>
    %cst_101 = arith.constant dense<0.000000e+00> : vector<8xf32>
    %256 = vector.multi_reduction <add>, %255, %cst_101 [1] : vector<8x8xf32> to vector<8xf32>
    %257 = vector.shape_cast %256 : vector<8xf32> to vector<8x1xf32>
    %258 = tpu.reciprocal %257 {approx = true} : vector<8x1xf32> -> vector<8x1xf32>
    %259 = vector.broadcast %258 : vector<8x1xf32> to vector<8x8xf32>
    %260 = arith.mulf %255, %259 : vector<8x8xf32>
    %261 = arith.truncf %260 : vector<8x8xf32> to vector<8x8xbf16>
    %262 = vector.extract_strided_slice %127 {offsets = [0, 24], sizes = [8, 8], strides = [1, 1]} : vector<16x32xbf16> to vector<8x8xbf16>
    %cst_102 = arith.constant dense<0.000000e+00> : vector<8x8xf32>
    %263 = tpu.matmul %261, %262, %cst_102 {dimension_numbers = #tpu.dot_dimension_numbers<[1], [0], [0], [1], [0, 0, 1, 1], [], []>} : vector<8x8xbf16>, vector<8x8xbf16>, vector<8x8xf32> -> vector<8x8xf32>
    %264 = vector.extract_strided_slice %150 {offsets = [6, 0], sizes = [2, 32], strides = [1, 1]} : vector<8x32xf32> to vector<2x32xf32>
    %cst_103 = arith.constant dense<0.000000e+00> : vector<8x32xf32>
    %265 = tpu.matmul %153, %264, %cst_103 {dimension_numbers = #tpu.dot_dimension_numbers<[1], [0], [0], [1], [0, 0, 1, 1], [], []>} : vector<8x2xf32>, vector<2x32xf32>, vector<8x32xf32> -> vector<8x32xf32>
    %266 = tpu.concatenate %176, %204, %232, %260 in 1 : vector<8x8xf32>, vector<8x8xf32>, vector<8x8xf32>, vector<8x8xf32> -> vector<8x32xf32>
    %267 = tpu.concatenate %179, %207, %235, %263 in 1 : vector<8x8xf32>, vector<8x8xf32>, vector<8x8xf32>, vector<8x8xf32> -> vector<8x32xf32>
    %268 = tpu.concatenate %181, %209, %237, %265 in 0 : vector<8x32xf32>, vector<8x32xf32>, vector<8x32xf32>, vector<8x32xf32> -> vector<32x32xf32>
    %269 = arith.truncf %267 : vector<8x32xf32> to vector<8x32xbf16>
    %c0_104 = arith.constant 0 : index
    %c0_105 = arith.constant 0 : index
    %270 = vector.load %arg23[%c0_104, %c0_105] : memref<32x32xbf16, #tpu.memory_space<vmem>>, vector<32x32xbf16>
    %cst_106 = arith.constant dense<0.000000e+00> : vector<8x32xf32>
    %271 = tpu.matmul %269, %270, %cst_106 {dimension_numbers = #tpu.dot_dimension_numbers<[1], [0], [0], [1], [0, 0, 1, 1], [], []>} : vector<8x32xbf16>, vector<32x32xbf16>, vector<8x32xf32> -> vector<8x32xf32>
    %272 = arith.truncf %266 : vector<8x32xf32> to vector<8x32xbf16>
    %273 = arith.truncf %268 : vector<32x32xf32> to vector<32x32xbf16>
    %cst_107 = arith.constant dense<0.000000e+00> : vector<8x32xf32>
    %274 = tpu.matmul %272, %273, %cst_107 {dimension_numbers = #tpu.dot_dimension_numbers<[1], [0], [0], [1], [0, 0, 1, 1], [], []>} : vector<8x32xbf16>, vector<32x32xbf16>, vector<8x32xf32> -> vector<8x32xf32>
    %275 = arith.addf %271, %274 : vector<8x32xf32>
    %276 = vector.extract_strided_slice %7 {offsets = [8, 0], sizes = [8, 2], strides = [1, 1]} : vector<16x2xf32> to vector<8x2xf32>
    %277 = vector.extract_strided_slice %130 {offsets = [8, 0], sizes = [8, 8], strides = [1, 1]} : vector<16x32xbf16> to vector<8x8xbf16>
    %278 = vector.extract_strided_slice %133 {offsets = [8, 0], sizes = [8, 8], strides = [1, 1]} : vector<16x32xbf16> to vector<8x8xbf16>
    %279 = vector.extract_strided_slice %136 {offsets = [8, 0], sizes = [8, 8], strides = [1, 1]} : vector<16x32xbf16> to vector<8x8xbf16>
    %280 = vector.extract_strided_slice %139 {offsets = [8, 0], sizes = [8, 8], strides = [1, 1]} : vector<16x32xbf16> to vector<8x8xbf16>
    %281 = tpu.concatenate %277, %278, %279, %280 in 1 : vector<8x8xbf16>, vector<8x8xbf16>, vector<8x8xbf16>, vector<8x8xbf16> -> vector<8x32xbf16>
    %282 = vector.extract_strided_slice %142 {offsets = [8, 0], sizes = [8, 8], strides = [1, 1]} : vector<16x32xbf16> to vector<8x8xbf16>
    %283 = vector.extract_strided_slice %145 {offsets = [8, 0], sizes = [8, 8], strides = [1, 1]} : vector<16x32xbf16> to vector<8x8xbf16>
    %284 = vector.extract_strided_slice %147 {offsets = [8, 0], sizes = [8, 8], strides = [1, 1]} : vector<16x32xbf16> to vector<8x8xbf16>
    %285 = vector.extract_strided_slice %149 {offsets = [8, 0], sizes = [8, 8], strides = [1, 1]} : vector<16x32xbf16> to vector<8x8xbf16>
    %286 = tpu.concatenate %282, %283, %284, %285 in 1 : vector<8x8xbf16>, vector<8x8xbf16>, vector<8x8xbf16>, vector<8x8xbf16> -> vector<8x32xbf16>
    %cst_108 = arith.constant dense<0.000000e+00> : vector<8x8xf32>
    %287 = tpu.matmul %281, %286, %cst_108 {dimension_numbers = #tpu.dot_dimension_numbers<[1], [1], [0], [0], [0, 0, 1, 0], [], []>} : vector<8x32xbf16>, vector<8x32xbf16>, vector<8x8xf32> -> vector<8x8xf32>
    %cst_109 = arith.constant 0.176776692 : f32
    %288 = vector.broadcast %cst_109 : f32 to vector<8x8xf32>
    %289 = arith.mulf %287, %288 : vector<8x8xf32>
    %cst_110 = arith.constant dense<0xFF800000> : vector<8xf32>
    %290 = vector.multi_reduction <maximumf>, %289, %cst_110 [1] : vector<8x8xf32> to vector<8xf32>
    %291 = vector.shape_cast %290 : vector<8xf32> to vector<8x1xf32>
    %292 = vector.broadcast %291 : vector<8x1xf32> to vector<8x8xf32>
    %293 = arith.subf %289, %292 : vector<8x8xf32>
    %294 = math.exp %293 : vector<8x8xf32>
    %cst_111 = arith.constant dense<0.000000e+00> : vector<8xf32>
    %295 = vector.multi_reduction <add>, %294, %cst_111 [1] : vector<8x8xf32> to vector<8xf32>
    %296 = vector.shape_cast %295 : vector<8xf32> to vector<8x1xf32>
    %297 = tpu.reciprocal %296 {approx = true} : vector<8x1xf32> -> vector<8x1xf32>
    %298 = vector.broadcast %297 : vector<8x1xf32> to vector<8x8xf32>
    %299 = arith.mulf %294, %298 : vector<8x8xf32>
    %300 = arith.truncf %299 : vector<8x8xf32> to vector<8x8xbf16>
    %301 = vector.extract_strided_slice %127 {offsets = [8, 0], sizes = [8, 8], strides = [1, 1]} : vector<16x32xbf16> to vector<8x8xbf16>
    %cst_112 = arith.constant dense<0.000000e+00> : vector<8x8xf32>
    %302 = tpu.matmul %300, %301, %cst_112 {dimension_numbers = #tpu.dot_dimension_numbers<[1], [0], [0], [1], [0, 0, 1, 1], [], []>} : vector<8x8xbf16>, vector<8x8xbf16>, vector<8x8xf32> -> vector<8x8xf32>
    %303 = vector.extract_strided_slice %150 {offsets = [0, 0], sizes = [2, 32], strides = [1, 1]} : vector<8x32xf32> to vector<2x32xf32>
    %cst_113 = arith.constant dense<0.000000e+00> : vector<8x32xf32>
    %304 = tpu.matmul %276, %303, %cst_113 {dimension_numbers = #tpu.dot_dimension_numbers<[1], [0], [0], [1], [0, 0, 1, 1], [], []>} : vector<8x2xf32>, vector<2x32xf32>, vector<8x32xf32> -> vector<8x32xf32>
    %305 = vector.extract_strided_slice %130 {offsets = [8, 8], sizes = [8, 8], strides = [1, 1]} : vector<16x32xbf16> to vector<8x8xbf16>
    %306 = vector.extract_strided_slice %133 {offsets = [8, 8], sizes = [8, 8], strides = [1, 1]} : vector<16x32xbf16> to vector<8x8xbf16>
    %307 = vector.extract_strided_slice %136 {offsets = [8, 8], sizes = [8, 8], strides = [1, 1]} : vector<16x32xbf16> to vector<8x8xbf16>
    %308 = vector.extract_strided_slice %139 {offsets = [8, 8], sizes = [8, 8], strides = [1, 1]} : vector<16x32xbf16> to vector<8x8xbf16>
    %309 = tpu.concatenate %305, %306, %307, %308 in 1 : vector<8x8xbf16>, vector<8x8xbf16>, vector<8x8xbf16>, vector<8x8xbf16> -> vector<8x32xbf16>
    %310 = vector.extract_strided_slice %142 {offsets = [8, 8], sizes = [8, 8], strides = [1, 1]} : vector<16x32xbf16> to vector<8x8xbf16>
    %311 = vector.extract_strided_slice %145 {offsets = [8, 8], sizes = [8, 8], strides = [1, 1]} : vector<16x32xbf16> to vector<8x8xbf16>
    %312 = vector.extract_strided_slice %147 {offsets = [8, 8], sizes = [8, 8], strides = [1, 1]} : vector<16x32xbf16> to vector<8x8xbf16>
    %313 = vector.extract_strided_slice %149 {offsets = [8, 8], sizes = [8, 8], strides = [1, 1]} : vector<16x32xbf16> to vector<8x8xbf16>
    %314 = tpu.concatenate %310, %311, %312, %313 in 1 : vector<8x8xbf16>, vector<8x8xbf16>, vector<8x8xbf16>, vector<8x8xbf16> -> vector<8x32xbf16>
    %cst_114 = arith.constant dense<0.000000e+00> : vector<8x8xf32>
    %315 = tpu.matmul %309, %314, %cst_114 {dimension_numbers = #tpu.dot_dimension_numbers<[1], [1], [0], [0], [0, 0, 1, 0], [], []>} : vector<8x32xbf16>, vector<8x32xbf16>, vector<8x8xf32> -> vector<8x8xf32>
    %cst_115 = arith.constant 0.176776692 : f32
    %316 = vector.broadcast %cst_115 : f32 to vector<8x8xf32>
    %317 = arith.mulf %315, %316 : vector<8x8xf32>
    %cst_116 = arith.constant dense<0xFF800000> : vector<8xf32>
    %318 = vector.multi_reduction <maximumf>, %317, %cst_116 [1] : vector<8x8xf32> to vector<8xf32>
    %319 = vector.shape_cast %318 : vector<8xf32> to vector<8x1xf32>
    %320 = vector.broadcast %319 : vector<8x1xf32> to vector<8x8xf32>
    %321 = arith.subf %317, %320 : vector<8x8xf32>
    %322 = math.exp %321 : vector<8x8xf32>
    %cst_117 = arith.constant dense<0.000000e+00> : vector<8xf32>
    %323 = vector.multi_reduction <add>, %322, %cst_117 [1] : vector<8x8xf32> to vector<8xf32>
    %324 = vector.shape_cast %323 : vector<8xf32> to vector<8x1xf32>
    %325 = tpu.reciprocal %324 {approx = true} : vector<8x1xf32> -> vector<8x1xf32>
    %326 = vector.broadcast %325 : vector<8x1xf32> to vector<8x8xf32>
    %327 = arith.mulf %322, %326 : vector<8x8xf32>
    %328 = arith.truncf %327 : vector<8x8xf32> to vector<8x8xbf16>
    %329 = vector.extract_strided_slice %127 {offsets = [8, 8], sizes = [8, 8], strides = [1, 1]} : vector<16x32xbf16> to vector<8x8xbf16>
    %cst_118 = arith.constant dense<0.000000e+00> : vector<8x8xf32>
    %330 = tpu.matmul %328, %329, %cst_118 {dimension_numbers = #tpu.dot_dimension_numbers<[1], [0], [0], [1], [0, 0, 1, 1], [], []>} : vector<8x8xbf16>, vector<8x8xbf16>, vector<8x8xf32> -> vector<8x8xf32>
    %331 = vector.extract_strided_slice %150 {offsets = [2, 0], sizes = [2, 32], strides = [1, 1]} : vector<8x32xf32> to vector<2x32xf32>
    %cst_119 = arith.constant dense<0.000000e+00> : vector<8x32xf32>
    %332 = tpu.matmul %276, %331, %cst_119 {dimension_numbers = #tpu.dot_dimension_numbers<[1], [0], [0], [1], [0, 0, 1, 1], [], []>} : vector<8x2xf32>, vector<2x32xf32>, vector<8x32xf32> -> vector<8x32xf32>
    %333 = vector.extract_strided_slice %130 {offsets = [8, 16], sizes = [8, 8], strides = [1, 1]} : vector<16x32xbf16> to vector<8x8xbf16>
    %334 = vector.extract_strided_slice %133 {offsets = [8, 16], sizes = [8, 8], strides = [1, 1]} : vector<16x32xbf16> to vector<8x8xbf16>
    %335 = vector.extract_strided_slice %136 {offsets = [8, 16], sizes = [8, 8], strides = [1, 1]} : vector<16x32xbf16> to vector<8x8xbf16>
    %336 = vector.extract_strided_slice %139 {offsets = [8, 16], sizes = [8, 8], strides = [1, 1]} : vector<16x32xbf16> to vector<8x8xbf16>
    %337 = tpu.concatenate %333, %334, %335, %336 in 1 : vector<8x8xbf16>, vector<8x8xbf16>, vector<8x8xbf16>, vector<8x8xbf16> -> vector<8x32xbf16>
    %338 = vector.extract_strided_slice %142 {offsets = [8, 16], sizes = [8, 8], strides = [1, 1]} : vector<16x32xbf16> to vector<8x8xbf16>
    %339 = vector.extract_strided_slice %145 {offsets = [8, 16], sizes = [8, 8], strides = [1, 1]} : vector<16x32xbf16> to vector<8x8xbf16>
    %340 = vector.extract_strided_slice %147 {offsets = [8, 16], sizes = [8, 8], strides = [1, 1]} : vector<16x32xbf16> to vector<8x8xbf16>
    %341 = vector.extract_strided_slice %149 {offsets = [8, 16], sizes = [8, 8], strides = [1, 1]} : vector<16x32xbf16> to vector<8x8xbf16>
    %342 = tpu.concatenate %338, %339, %340, %341 in 1 : vector<8x8xbf16>, vector<8x8xbf16>, vector<8x8xbf16>, vector<8x8xbf16> -> vector<8x32xbf16>
    %cst_120 = arith.constant dense<0.000000e+00> : vector<8x8xf32>
    %343 = tpu.matmul %337, %342, %cst_120 {dimension_numbers = #tpu.dot_dimension_numbers<[1], [1], [0], [0], [0, 0, 1, 0], [], []>} : vector<8x32xbf16>, vector<8x32xbf16>, vector<8x8xf32> -> vector<8x8xf32>
    %cst_121 = arith.constant 0.176776692 : f32
    %344 = vector.broadcast %cst_121 : f32 to vector<8x8xf32>
    %345 = arith.mulf %343, %344 : vector<8x8xf32>
    %cst_122 = arith.constant dense<0xFF800000> : vector<8xf32>
    %346 = vector.multi_reduction <maximumf>, %345, %cst_122 [1] : vector<8x8xf32> to vector<8xf32>
    %347 = vector.shape_cast %346 : vector<8xf32> to vector<8x1xf32>
    %348 = vector.broadcast %347 : vector<8x1xf32> to vector<8x8xf32>
    %349 = arith.subf %345, %348 : vector<8x8xf32>
    %350 = math.exp %349 : vector<8x8xf32>
    %cst_123 = arith.constant dense<0.000000e+00> : vector<8xf32>
    %351 = vector.multi_reduction <add>, %350, %cst_123 [1] : vector<8x8xf32> to vector<8xf32>
    %352 = vector.shape_cast %351 : vector<8xf32> to vector<8x1xf32>
    %353 = tpu.reciprocal %352 {approx = true} : vector<8x1xf32> -> vector<8x1xf32>
    %354 = vector.broadcast %353 : vector<8x1xf32> to vector<8x8xf32>
    %355 = arith.mulf %350, %354 : vector<8x8xf32>
    %356 = arith.truncf %355 : vector<8x8xf32> to vector<8x8xbf16>
    %357 = vector.extract_strided_slice %127 {offsets = [8, 16], sizes = [8, 8], strides = [1, 1]} : vector<16x32xbf16> to vector<8x8xbf16>
    %cst_124 = arith.constant dense<0.000000e+00> : vector<8x8xf32>
    %358 = tpu.matmul %356, %357, %cst_124 {dimension_numbers = #tpu.dot_dimension_numbers<[1], [0], [0], [1], [0, 0, 1, 1], [], []>} : vector<8x8xbf16>, vector<8x8xbf16>, vector<8x8xf32> -> vector<8x8xf32>
    %359 = vector.extract_strided_slice %150 {offsets = [4, 0], sizes = [2, 32], strides = [1, 1]} : vector<8x32xf32> to vector<2x32xf32>
    %cst_125 = arith.constant dense<0.000000e+00> : vector<8x32xf32>
    %360 = tpu.matmul %276, %359, %cst_125 {dimension_numbers = #tpu.dot_dimension_numbers<[1], [0], [0], [1], [0, 0, 1, 1], [], []>} : vector<8x2xf32>, vector<2x32xf32>, vector<8x32xf32> -> vector<8x32xf32>
    %361 = vector.extract_strided_slice %130 {offsets = [8, 24], sizes = [8, 8], strides = [1, 1]} : vector<16x32xbf16> to vector<8x8xbf16>
    %362 = vector.extract_strided_slice %133 {offsets = [8, 24], sizes = [8, 8], strides = [1, 1]} : vector<16x32xbf16> to vector<8x8xbf16>
    %363 = vector.extract_strided_slice %136 {offsets = [8, 24], sizes = [8, 8], strides = [1, 1]} : vector<16x32xbf16> to vector<8x8xbf16>
    %364 = vector.extract_strided_slice %139 {offsets = [8, 24], sizes = [8, 8], strides = [1, 1]} : vector<16x32xbf16> to vector<8x8xbf16>
    %365 = tpu.concatenate %361, %362, %363, %364 in 1 : vector<8x8xbf16>, vector<8x8xbf16>, vector<8x8xbf16>, vector<8x8xbf16> -> vector<8x32xbf16>
    %366 = vector.extract_strided_slice %142 {offsets = [8, 24], sizes = [8, 8], strides = [1, 1]} : vector<16x32xbf16> to vector<8x8xbf16>
    %367 = vector.extract_strided_slice %145 {offsets = [8, 24], sizes = [8, 8], strides = [1, 1]} : vector<16x32xbf16> to vector<8x8xbf16>
    %368 = vector.extract_strided_slice %147 {offsets = [8, 24], sizes = [8, 8], strides = [1, 1]} : vector<16x32xbf16> to vector<8x8xbf16>
    %369 = vector.extract_strided_slice %149 {offsets = [8, 24], sizes = [8, 8], strides = [1, 1]} : vector<16x32xbf16> to vector<8x8xbf16>
    %370 = tpu.concatenate %366, %367, %368, %369 in 1 : vector<8x8xbf16>, vector<8x8xbf16>, vector<8x8xbf16>, vector<8x8xbf16> -> vector<8x32xbf16>
    %cst_126 = arith.constant dense<0.000000e+00> : vector<8x8xf32>
    %371 = tpu.matmul %365, %370, %cst_126 {dimension_numbers = #tpu.dot_dimension_numbers<[1], [1], [0], [0], [0, 0, 1, 0], [], []>} : vector<8x32xbf16>, vector<8x32xbf16>, vector<8x8xf32> -> vector<8x8xf32>
    %cst_127 = arith.constant 0.176776692 : f32
    %372 = vector.broadcast %cst_127 : f32 to vector<8x8xf32>
    %373 = arith.mulf %371, %372 : vector<8x8xf32>
    %cst_128 = arith.constant dense<0xFF800000> : vector<8xf32>
    %374 = vector.multi_reduction <maximumf>, %373, %cst_128 [1] : vector<8x8xf32> to vector<8xf32>
    %375 = vector.shape_cast %374 : vector<8xf32> to vector<8x1xf32>
    %376 = vector.broadcast %375 : vector<8x1xf32> to vector<8x8xf32>
    %377 = arith.subf %373, %376 : vector<8x8xf32>
    %378 = math.exp %377 : vector<8x8xf32>
    %cst_129 = arith.constant dense<0.000000e+00> : vector<8xf32>
    %379 = vector.multi_reduction <add>, %378, %cst_129 [1] : vector<8x8xf32> to vector<8xf32>
    %380 = vector.shape_cast %379 : vector<8xf32> to vector<8x1xf32>
    %381 = tpu.reciprocal %380 {approx = true} : vector<8x1xf32> -> vector<8x1xf32>
    %382 = vector.broadcast %381 : vector<8x1xf32> to vector<8x8xf32>
    %383 = arith.mulf %378, %382 : vector<8x8xf32>
    %384 = arith.truncf %383 : vector<8x8xf32> to vector<8x8xbf16>
    %385 = vector.extract_strided_slice %127 {offsets = [8, 24], sizes = [8, 8], strides = [1, 1]} : vector<16x32xbf16> to vector<8x8xbf16>
    %cst_130 = arith.constant dense<0.000000e+00> : vector<8x8xf32>
    %386 = tpu.matmul %384, %385, %cst_130 {dimension_numbers = #tpu.dot_dimension_numbers<[1], [0], [0], [1], [0, 0, 1, 1], [], []>} : vector<8x8xbf16>, vector<8x8xbf16>, vector<8x8xf32> -> vector<8x8xf32>
    %387 = vector.extract_strided_slice %150 {offsets = [6, 0], sizes = [2, 32], strides = [1, 1]} : vector<8x32xf32> to vector<2x32xf32>
    %cst_131 = arith.constant dense<0.000000e+00> : vector<8x32xf32>
    %388 = tpu.matmul %276, %387, %cst_131 {dimension_numbers = #tpu.dot_dimension_numbers<[1], [0], [0], [1], [0, 0, 1, 1], [], []>} : vector<8x2xf32>, vector<2x32xf32>, vector<8x32xf32> -> vector<8x32xf32>
    %389 = tpu.concatenate %299, %327, %355, %383 in 1 : vector<8x8xf32>, vector<8x8xf32>, vector<8x8xf32>, vector<8x8xf32> -> vector<8x32xf32>
    %390 = tpu.concatenate %302, %330, %358, %386 in 1 : vector<8x8xf32>, vector<8x8xf32>, vector<8x8xf32>, vector<8x8xf32> -> vector<8x32xf32>
    %391 = tpu.concatenate %304, %332, %360, %388 in 0 : vector<8x32xf32>, vector<8x32xf32>, vector<8x32xf32>, vector<8x32xf32> -> vector<32x32xf32>
    %392 = arith.truncf %390 : vector<8x32xf32> to vector<8x32xbf16>
    %c0_132 = arith.constant 0 : index
    %c0_133 = arith.constant 0 : index
    %393 = vector.load %arg23[%c0_132, %c0_133] : memref<32x32xbf16, #tpu.memory_space<vmem>>, vector<32x32xbf16>
    %cst_134 = arith.constant dense<0.000000e+00> : vector<8x32xf32>
    %394 = tpu.matmul %392, %393, %cst_134 {dimension_numbers = #tpu.dot_dimension_numbers<[1], [0], [0], [1], [0, 0, 1, 1], [], []>} : vector<8x32xbf16>, vector<32x32xbf16>, vector<8x32xf32> -> vector<8x32xf32>
    %395 = arith.truncf %389 : vector<8x32xf32> to vector<8x32xbf16>
    %396 = arith.truncf %391 : vector<32x32xf32> to vector<32x32xbf16>
    %cst_135 = arith.constant dense<0.000000e+00> : vector<8x32xf32>
    %397 = tpu.matmul %395, %396, %cst_135 {dimension_numbers = #tpu.dot_dimension_numbers<[1], [0], [0], [1], [0, 0, 1, 1], [], []>} : vector<8x32xbf16>, vector<32x32xbf16>, vector<8x32xf32> -> vector<8x32xf32>
    %398 = arith.addf %394, %397 : vector<8x32xf32>
    %399 = tpu.concatenate %275, %398 in 0 : vector<8x32xf32>, vector<8x32xf32> -> vector<16x32xf32>
    %400 = tpu.concatenate %266, %389 in 0 : vector<8x32xf32>, vector<8x32xf32> -> vector<16x32xf32>
    %401 = arith.subf %399, %152 : vector<16x32xf32>
    %c0_136 = arith.constant 0 : index
    %c0_137 = arith.constant 0 : index
    %402 = vector.load %arg24[%c0_136, %c0_137] : memref<1x32xf32, #tpu.memory_space<vmem>>, vector<1x32xf32>
    %403 = vector.broadcast %402 : vector<1x32xf32> to vector<16x32xf32>
    %404 = arith.addf %401, %403 : vector<16x32xf32>
    %c0_138 = arith.constant 0 : index
    %c0_139 = arith.constant 0 : index
    %405 = vector.load %arg27[%c0_138, %c0_139] : memref<1x32xf32, #tpu.memory_space<vmem>>, vector<1x32xf32>
    %406 = vector.broadcast %405 : vector<1x32xf32> to vector<16x32xf32>
    %407 = arith.addf %404, %406 : vector<16x32xf32>
    %408 = vector.shape_cast %407 : vector<16x32xf32> to vector<2x8x32xf32>
    %c0_140 = arith.constant 0 : index
    %c0_141 = arith.constant 0 : index
    %c0_142 = arith.constant 0 : index
    %409 = vector.load %arg28[%c0_140, %c0_141, %c0_142] : memref<2x8x32xf32, #tpu.memory_space<vmem>>, vector<2x8x32xf32>
    tpu.vector_store %arg28[%c0_140, %c0_141, %c0_142], %408 {strides = array<i32>} : memref<2x8x32xf32, #tpu.memory_space<vmem>>, vector<2x8x32xf32>,
    %410 = vector.shape_cast %400 : vector<16x32xf32> to vector<2x8x32xf32>
    %c0_143 = arith.constant 0 : index
    %c0_144 = arith.constant 0 : index
    %c0_145 = arith.constant 0 : index
    %411 = vector.load %arg29[%c0_143, %c0_144, %c0_145] : memref<2x8x32xf32, #tpu.memory_space<vmem>>, vector<2x8x32xf32>
    tpu.vector_store %arg29[%c0_143, %c0_144, %c0_145], %410 {strides = array<i32>} : memref<2x8x32xf32, #tpu.memory_space<vmem>>, vector<2x8x32xf32>,
    return
  }
  func.func @transform_0(%arg0: i32) -> (i32, i32, i32) {
    %c0_i32 = arith.constant 0 : i32
    %c0_i32_0 = arith.constant 0 : i32
    %c0_i32_1 = arith.constant 0 : i32
    return %arg0, %c0_i32, %c0_i32_0 : i32, i32, i32
  }
  func.func @transform_1(%arg0: i32) -> (i32, i32, i32) {
    %c0_i32 = arith.constant 0 : i32
    %c0_i32_0 = arith.constant 0 : i32
    %c0_i32_1 = arith.constant 0 : i32
    return %arg0, %c0_i32, %c0_i32_0 : i32, i32, i32
  }
  func.func @transform_2(%arg0: i32) -> (i32, i32, i32) {
    %c0_i32 = arith.constant 0 : i32
    %c0_i32_0 = arith.constant 0 : i32
    %c0_i32_1 = arith.constant 0 : i32
    return %arg0, %c0_i32, %c0_i32_0 : i32, i32, i32
  }
  func.func @transform_3(%arg0: i32) -> (i32, i32, i32) {
    %c0_i32 = arith.constant 0 : i32
    %c0_i32_0 = arith.constant 0 : i32
    %c0_i32_1 = arith.constant 0 : i32
    return %arg0, %c0_i32, %c0_i32_0 : i32, i32, i32
  }
  func.func @transform_4(%arg0: i32) -> (i32, i32) {
    %c0_i32 = arith.constant 0 : i32
    %c0_i32_0 = arith.constant 0 : i32
    %c0_i32_1 = arith.constant 0 : i32
    return %c0_i32, %c0_i32_0 : i32, i32
  }
  func.func @transform_5(%arg0: i32) -> (i32, i32) {
    %c0_i32 = arith.constant 0 : i32
    %c0_i32_0 = arith.constant 0 : i32
    %c0_i32_1 = arith.constant 0 : i32
    return %c0_i32, %c0_i32_0 : i32, i32
  }
  func.func @transform_6(%arg0: i32) -> (i32, i32) {
    %c0_i32 = arith.constant 0 : i32
    %c0_i32_0 = arith.constant 0 : i32
    %c0_i32_1 = arith.constant 0 : i32
    return %c0_i32, %c0_i32_0 : i32, i32
  }
  func.func @transform_7(%arg0: i32) -> (i32, i32) {
    %c0_i32 = arith.constant 0 : i32
    %c0_i32_0 = arith.constant 0 : i32
    %c0_i32_1 = arith.constant 0 : i32
    return %c0_i32, %c0_i32_0 : i32, i32
  }
  func.func @transform_8(%arg0: i32) -> (i32, i32) {
    %c0_i32 = arith.constant 0 : i32
    %c0_i32_0 = arith.constant 0 : i32
    %c0_i32_1 = arith.constant 0 : i32
    return %c0_i32, %c0_i32_0 : i32, i32
  }
  func.func @transform_9(%arg0: i32) -> (i32, i32) {
    %c0_i32 = arith.constant 0 : i32
    %c0_i32_0 = arith.constant 0 : i32
    %c0_i32_1 = arith.constant 0 : i32
    return %c0_i32, %c0_i32_0 : i32, i32
  }
  func.func @transform_10(%arg0: i32) -> (i32, i32) {
    %c0_i32 = arith.constant 0 : i32
    %c0_i32_0 = arith.constant 0 : i32
    %c0_i32_1 = arith.constant 0 : i32
    return %c0_i32, %c0_i32_0 : i32, i32
  }
  func.func @transform_11(%arg0: i32) -> (i32, i32) {
    %c0_i32 = arith.constant 0 : i32
    %c0_i32_0 = arith.constant 0 : i32
    %c0_i32_1 = arith.constant 0 : i32
    return %c0_i32, %c0_i32_0 : i32, i32
  }
  func.func @transform_12(%arg0: i32) -> (i32, i32) {
    %c0_i32 = arith.constant 0 : i32
    %c0_i32_0 = arith.constant 0 : i32
    %c0_i32_1 = arith.constant 0 : i32
    return %c0_i32, %c0_i32_0 : i32, i32
  }
  func.func @transform_13(%arg0: i32) -> (i32, i32) {
    %c0_i32 = arith.constant 0 : i32
    %c0_i32_0 = arith.constant 0 : i32
    %c0_i32_1 = arith.constant 0 : i32
    return %c0_i32, %c0_i32_0 : i32, i32
  }
  func.func @transform_14(%arg0: i32) -> (i32, i32) {
    %c0_i32 = arith.constant 0 : i32
    %c0_i32_0 = arith.constant 0 : i32
    %c0_i32_1 = arith.constant 0 : i32
    return %c0_i32, %c0_i32_0 : i32, i32
  }
  func.func @transform_15(%arg0: i32) -> (i32, i32) {
    %c0_i32 = arith.constant 0 : i32
    %c0_i32_0 = arith.constant 0 : i32
    %c0_i32_1 = arith.constant 0 : i32
    return %c0_i32, %c0_i32_0 : i32, i32
  }
  func.func @transform_16(%arg0: i32) -> (i32, i32) {
    %c0_i32 = arith.constant 0 : i32
    %c0_i32_0 = arith.constant 0 : i32
    %c0_i32_1 = arith.constant 0 : i32
    return %c0_i32, %c0_i32_0 : i32, i32
  }
  func.func @transform_17(%arg0: i32) -> (i32, i32) {
    %c0_i32 = arith.constant 0 : i32
    %c0_i32_0 = arith.constant 0 : i32
    %c0_i32_1 = arith.constant 0 : i32
    return %c0_i32, %c0_i32_0 : i32, i32
  }
  func.func @transform_18(%arg0: i32) -> (i32, i32) {
    %c0_i32 = arith.constant 0 : i32
    %c0_i32_0 = arith.constant 0 : i32
    %c0_i32_1 = arith.constant 0 : i32
    return %c0_i32, %c0_i32_0 : i32, i32
  }
  func.func @transform_19(%arg0: i32) -> (i32, i32) {
    %c0_i32 = arith.constant 0 : i32
    %c0_i32_0 = arith.constant 0 : i32
    %c0_i32_1 = arith.constant 0 : i32
    return %c0_i32, %c0_i32_0 : i32, i32
  }
  func.func @transform_20(%arg0: i32) -> (i32, i32) {
    %c0_i32 = arith.constant 0 : i32
    %c0_i32_0 = arith.constant 0 : i32
    %c0_i32_1 = arith.constant 0 : i32
    return %c0_i32, %c0_i32_0 : i32, i32
  }
  func.func @transform_21(%arg0: i32) -> (i32, i32) {
    %c0_i32 = arith.constant 0 : i32
    %c0_i32_0 = arith.constant 0 : i32
    %c0_i32_1 = arith.constant 0 : i32
    return %c0_i32, %c0_i32_0 : i32, i32
  }
  func.func @transform_22(%arg0: i32) -> (i32, i32) {
    %c0_i32 = arith.constant 0 : i32
    %c0_i32_0 = arith.constant 0 : i32
    %c0_i32_1 = arith.constant 0 : i32
    return %c0_i32, %c0_i32_0 : i32, i32
  }
  func.func @transform_23(%arg0: i32) -> (i32, i32) {
    %c0_i32 = arith.constant 0 : i32
    %c0_i32_0 = arith.constant 0 : i32
    %c0_i32_1 = arith.constant 0 : i32
    return %c0_i32, %c0_i32_0 : i32, i32
  }
  func.func @transform_24(%arg0: i32) -> (i32, i32) {
    %c0_i32 = arith.constant 0 : i32
    %c0_i32_0 = arith.constant 0 : i32
    %c0_i32_1 = arith.constant 0 : i32
    return %c0_i32, %c0_i32_0 : i32, i32
  }
  func.func @transform_25(%arg0: i32) -> (i32, i32) {
    %c0_i32 = arith.constant 0 : i32
    %c0_i32_0 = arith.constant 0 : i32
    %c0_i32_1 = arith.constant 0 : i32
    return %c0_i32, %c0_i32_0 : i32, i32
  }
  func.func @transform_26(%arg0: i32) -> (i32, i32) {
    %c0_i32 = arith.constant 0 : i32
    %c0_i32_0 = arith.constant 0 : i32
    %c0_i32_1 = arith.constant 0 : i32
    return %c0_i32, %c0_i32_0 : i32, i32
  }
  func.func @transform_27(%arg0: i32) -> (i32, i32, i32) {
    %c0_i32 = arith.constant 0 : i32
    %c0_i32_0 = arith.constant 0 : i32
    %c0_i32_1 = arith.constant 0 : i32
    return %arg0, %c0_i32, %c0_i32_0 : i32, i32, i32
  }
  func.func @transform_28(%arg0: i32) -> (i32, i32, i32) {
    %c0_i32 = arith.constant 0 : i32
    %c0_i32_0 = arith.constant 0 : i32
    %c0_i32_1 = arith.constant 0 : i32
    return %arg0, %c0_i32, %c0_i32_0 : i32, i32, i32
  }
}

</mosaic_0001>

<bundles_post_ra>
// kernel: tpu_custom_call.1
= control target key start
LH: loop header
LB: loop body
LE: loop exit
PB: predicated region body
PF: predicated region fallthrough
CT: control target
= control target key end

     0   :  { %s7235_s0 = inlined_call_operand.vmem [shape: f32[2,8,32], index: 0, kind: input, shape index: {}]   ;;  %s7236_s1 = inlined_call_operand.vmem [shape: f32[2,8,2], index: 1, kind: input, shape index: {}]   ;;  %s7237_s2 = inlined_call_operand.vmem [shape: f32[2,8,32], index: 2, kind: input, shape index: {}]   ;;  %s7238_s3 = inlined_call_operand.vmem [shape: f32[2,8,2], index: 3, kind: input, shape index: {}]   ;;  %s7239_s4 = inlined_call_operand.hbm [shape: f32[2,32], index: 4, kind: input, shape index: {}]   ;;  %s7240_s5 = inlined_call_operand.hbm [shape: f32[1,32], index: 5, kind: input, shape index: {}]   ;;  %s7241_s6 = inlined_call_operand.hbm [shape: f32[2,32], index: 6, kind: input, shape index: {}]   ;;  %s7242_s7 = inlined_call_operand.hbm [shape: f32[1,32], index: 7, kind: input, shape index: {}]   ;;  %s7243_s8 = inlined_call_operand.hbm [shape: f32[1,32], index: 8, kind: input, shape index: {}]   ;;  %s7244_s9 = inlined_call_operand.hbm [shape: f32[1,32], index: 9, kind: input, shape index: {}]   ;;  %s7245_s10 = inlined_call_operand.hbm [shape: bf16[32,32], index: 10, kind: input, shape index: {}]   ;;  %s7246_s11 = inlined_call_operand.hbm [shape: f32[1,32], index: 11, kind: input, shape index: {}]   ;;  %s7247_s12 = inlined_call_operand.hbm [shape: bf16[32,32], index: 12, kind: input, shape index: {}]   ;;  %s7248_s13 = inlined_call_operand.hbm [shape: f32[1,32], index: 13, kind: input, shape index: {}]   ;;  %s7249_s14 = inlined_call_operand.hbm [shape: f32[1,32], index: 14, kind: input, shape index: {}]   ;;  %s7250_s15 = inlined_call_operand.hbm [shape: f32[1,32], index: 15, kind: input, shape index: {}]   ;;  %s7251_s16 = inlined_call_operand.vmem [shape: bf16[32,32], index: 16, kind: input, shape index: {}]   ;;  %s7252_s17 = inlined_call_operand.hbm [shape: f32[1,32], index: 17, kind: input, shape index: {}]   ;;  %s7253_s18 = inlined_call_operand.hbm [shape: f32[1,32], index: 18, kind: input, shape index: {}]   ;;  %s7254_s19 = inlined_call_operand.hbm [shape: f32[1,32], index: 19, kind: input, shape index: {}]   ;;  %s7255_s20 = inlined_call_operand.hbm [shape: bf16[32,32], index: 20, kind: input, shape index: {}]   ;;  %s7256_s21 = inlined_call_operand.hbm [shape: f32[1,32], index: 21, kind: input, shape index: {}]   ;;  %s7257_s22 = inlined_call_operand.hbm [shape: bf16[32,32], index: 22, kind: input, shape index: {}]   ;;  %s7258_s23 = inlined_call_operand.hbm [shape: f32[1,32], index: 23, kind: input, shape index: {}]   ;;  %s7259_s24 = inlined_call_operand.vmem [shape: f32[8,32], index: 24, kind: input, shape index: {}]   ;;  %s7260_s25 = inlined_call_operand.vmem [shape: f32[2,32], index: 25, kind: input, shape index: {}]   ;;  %s7261_s26 = inlined_call_operand.vmem [shape: f32[1,32], index: 26, kind: input, shape index: {}]   ;;  %s7262_s27 = inlined_call_operand.hbm [shape: f32[2,8,32], index: 27, kind: output, shape index: {0}]   ;;  %s7263_s28 = inlined_call_operand.hbm [shape: f32[2,8,32], index: 28, kind: output, shape index: {1}]  }
   0x1   :  { %7314 = sst [smem:[#allocation59_spill]] %s7235_s0 }
   0x2   :  { %7315 = sst [smem:[#allocation60_spill]] %s7236_s1 }
   0x3   :  { %7316 = sst [smem:[#allocation61_spill]] %s7237_s2 }
   0x4   :  { %7317 = sst [smem:[#allocation62_spill]] %s7238_s3 }
   0x5   :  { %7318 = sst [smem:[#allocation63_spill]] %s7239_s4 }
   0x6   :  { %7319 = sst [smem:[#allocation64_spill]] %s7240_s5 }
   0x7   :  { %7320 = sst [smem:[#allocation65_spill]] %s7241_s6 }
   0x8   :  { %7321 = sst [smem:[#allocation66_spill]] %s7242_s7 }
   0x9   :  { %7322 = sst [smem:[#allocation67_spill]] %s7243_s8 }
   0xa   :  { %7323 = sst [smem:[#allocation68_spill]] %s7244_s9 }
   0xb   :  { %7324 = sst [smem:[#allocation69_spill]] %s7245_s10 }
   0xc   :  { %7325 = sst [smem:[#allocation70_spill]] %s7246_s11 }
   0xd   :  { %7326 = sst [smem:[#allocation71_spill]] %s7247_s12 }
   0xe   :  { %7327 = sst [smem:[#allocation72_spill]] %s7261_s26 }
   0xf   :  { %7328 = sst [smem:[#allocation73_spill]] %s7262_s27 }
  0x10   :  { %7329 = sst [smem:[#allocation74_spill]] %s7263_s28 }
  0x11   :  { %34 = vsyncpa [#allocation3], 0 }
  0x12   :  { %35 = vsyncpa [#allocation6], 0 }
  0x13   :  { %36 = vsyncpa [#allocation9], 0 }
  0x14   :  { %37 = vsyncpa [#allocation12], 0 }
  0x15   :  { %38 = vsyncpa [#allocation15], 0 }
  0x16   :  { %39 = vsyncpa [#allocation18], 0 }
  0x17   :  { %40 = vsyncpa [#allocation21], 0 }
  0x18   :  { %41 = vsyncpa [#allocation24], 0 }
  0x19   :  { %42 = vsyncpa [#allocation27], 0 }
  0x1a   :  { %43 = vsyncpa [#allocation30], 0 }
  0x1b   :  { %44 = vsyncpa [#allocation4], 0  ;;  %s7330_s9 = sld [smem:[#allocation64_spill]] }
  0x21   :  { %s70_s30 = sshll.u32 %s7330_s9, 4  ;;  %s71_s30 = int_to_ptr.hbm [resolvable:$true] %s70_s30 }
  0x22   :  { %45 = vsyncpa [#allocation34], 0  ;;  %s5132_s3 = smov [#allocation5]   ;;  %s7331_s11 = sld [smem:[#allocation66_spill]] }
  0x23   :  { %s72_s6 = sshll.u32 %s5132_s3, 4  ;;  %s5133_s2 = smov [#allocation8]   ;;  %s73_s6 = int_to_ptr.vmem [resolvable:$true] %s72_s6 }
  0x24   :  { %75 = dma.hbm_to_vmem [thread:$0]  %s71_s30, 16, %s73_s6, [#allocation6]  }
  0x25   :  { %s94_s7 = sshll.u32 %s5133_s2, 4  ;;  %s7332_s4 = sld [smem:[#allocation68_spill]]  ;;  %s95_s7 = int_to_ptr.vmem [resolvable:$true] %s94_s7 }
  0x26   :  { %s7333_s9 = sld [smem:[#allocation70_spill]]  ;;  %s5134_s28 = smov [#allocation11]  }
  0x27   :  { %s116_s26 = sshll.u32 %s5134_s28, 4  ;;  %s5135_s30 = smov [#allocation14]   ;;  %s117_s26 = int_to_ptr.vmem [resolvable:$true] %s116_s26 }
  0x28   :  { %s92_s29 = sshll.u32 %s7331_s11, 4  ;;  %s140_s6 = sshll.u32 %s5135_s30, 4  ;;  %s93_s29 = int_to_ptr.hbm [resolvable:$true] %s92_s29  ;;  %s141_s6 = int_to_ptr.vmem [resolvable:$true] %s140_s6 }
  0x29   :  { %97 = dma.hbm_to_vmem [thread:$0]  %s93_s29, 16, %s95_s7, [#allocation9]  }
  0x2a   :  { %s162_s11 = sshll.u32 %s7248_s13, 4  ;;  %s184_s7 = sshll.u32 %s7250_s15, 4  ;;  %s163_s11 = int_to_ptr.hbm [resolvable:$true] %s162_s11  ;;  %s185_s7 = int_to_ptr.hbm [resolvable:$true] %s184_s7 }
  0x2b   :  { %s114_s27 = sshll.u32 %s7332_s4, 4  ;;  %s5136_s12 = smov [#allocation17]   ;;  %s115_s27 = int_to_ptr.hbm [resolvable:$true] %s114_s27 }
  0x2c   :  { %s138_s3 = sshll.u32 %s7333_s9, 4  ;;  %s164_s1 = sshll.u32 %s5136_s12, 4  ;;  %s139_s3 = int_to_ptr.hbm [resolvable:$true] %s138_s3  ;;  %s165_s1 = int_to_ptr.vmem [resolvable:$true] %s164_s1 }
  0x2d   :  { %119 = dma.hbm_to_vmem [thread:$0]  %s115_s27, 16, %s117_s26, [#allocation12]  }
  0x2e   :  { %143 = dma.hbm_to_vmem [thread:$0]  %s139_s3, 16, %s141_s6, [#allocation15]  }
  0x2f   :  { %167 = dma.hbm_to_vmem [thread:$0]  %s163_s11, 16, %s165_s1, [#allocation18]  }
  0x30   :  { %s5137_s28 = smov [#allocation20]   ;;  %s208_s8 = sshll.u32 %s7253_s18, 4  ;;  %s209_s8 = int_to_ptr.hbm [resolvable:$true] %s208_s8 }
  0x31   :  { %s186_s26 = sshll.u32 %s5137_s28, 4  ;;  %s5138_s13 = smov [#allocation23]   ;;  %s187_s26 = int_to_ptr.vmem [resolvable:$true] %s186_s26 }
  0x32   :  { %189 = dma.hbm_to_vmem [thread:$0]  %s185_s7, 16, %s187_s26, [#allocation21]  }
  0x33   :  { %s210_s5 = sshll.u32 %s5138_s13, 4  ;;  %s229_s15 = sshll.u32 %s7255_s20, 4  ;;  %s211_s5 = int_to_ptr.vmem [resolvable:$true] %s210_s5  ;;  %s230_s15 = int_to_ptr.hbm [resolvable:$true] %s229_s15 }
  0x34   :  { %213 = dma.hbm_to_vmem [thread:$0]  %s209_s8, 16, %s211_s5, [#allocation24]  }
  0x35   :  { %s5139_s30 = smov [#allocation26]   ;;  %s253_s11 = sshll.u32 %s7257_s22, 4  ;;  %s254_s11 = int_to_ptr.hbm [resolvable:$true] %s253_s11 }
  0x36   :  { %s231_s6 = sshll.u32 %s5139_s30, 4  ;;  %s5140_s18 = smov 64   ;;  %s232_s6 = int_to_ptr.vmem [resolvable:$true] %s231_s6 }
  0x37   :  { %s5141_s2 = smov 4   ;;  %s7334_s12 = sld [smem:[#allocation63_spill]] }
  0x38   :  { %237 = dma.hbm_to_vmem [thread:$0]  %s230_s15, 256, %s232_s6, [#allocation27], %s5140_s18, %s5140_s18, %s5141_s2  }
  0x39   :  { %s5142_s1 = smov [#allocation29]   ;;  %s5143_s22 = smov [#allocation2]  }
  0x3a   :  { %s255_s28 = sshll.u32 %s5142_s1, 4  ;;  %s61_s26 = sshll.u32 %s5143_s22, 4  ;;  %s256_s28 = int_to_ptr.vmem [resolvable:$true] %s255_s28  ;;  %s62_s26 = int_to_ptr.vmem [resolvable:$true] %s61_s26 }
  0x3b   :  { %261 = dma.hbm_to_vmem [thread:$0]  %s254_s11, 256, %s256_s28, [#allocation30], %s5140_s18, %s5140_s18, %s5141_s2  }
  0x3c   :  { %s7335_s8 = sld [smem:[#allocation65_spill]]  ;;  %s5144_s30 = smov [#allocation7]  }
  0x3d   :  { %s59_s20 = sshll.u32 %s7334_s12, 4  ;;  %s7336_s3 = sld [smem:[#allocation67_spill]]  ;;  %s60_s20 = int_to_ptr.hbm [resolvable:$true] %s59_s20 }
  0x3e   :  { %64 = dma.hbm_to_vmem [thread:$0]  %s60_s20, 32, %s62_s26, [#allocation3]  }
  0x3f   :  { %s83_s6 = sshll.u32 %s5144_s30, 4  ;;  %s5145_s10 = smov [#allocation10]   ;;  %s84_s6 = int_to_ptr.vmem [resolvable:$true] %s83_s6 }
  0x40   :  { %s105_s0 = sshll.u32 %s5145_s10, 4  ;;  %s7337_s7 = sld [smem:[#allocation69_spill]]  ;;  %s106_s0 = int_to_ptr.vmem [resolvable:$true] %s105_s0 }
  0x41   :  { %s7338_s28 = sld [smem:[#allocation71_spill]]  ;;  %s5146_s26 = smov [#allocation13]  }
  0x42   :  { %s81_s13 = sshll.u32 %s7335_s8, 4  ;;  %s126_s27 = sshll.u32 %s5146_s26, 4  ;;  %s82_s13 = int_to_ptr.hbm [resolvable:$true] %s81_s13  ;;  %s127_s27 = int_to_ptr.vmem [resolvable:$true] %s126_s27 }
  0x43   :  { %s103_s15 = sshll.u32 %s7336_s3, 4  ;;  %s5147_s4 = smov [#allocation16]   ;;  %s104_s15 = int_to_ptr.hbm [resolvable:$true] %s103_s15 }
  0x44   :  { %86 = dma.hbm_to_vmem [thread:$0]  %s82_s13, 32, %s84_s6, [#allocation6]  }
  0x45   :  { %108 = dma.hbm_to_vmem [thread:$0]  %s104_s15, 16, %s106_s0, [#allocation9]  }
  0x46   :  { %s124_s12 = sshll.u32 %s7337_s7, 4  ;;  %s150_s8 = sshll.u32 %s5147_s4, 4  ;;  %s125_s12 = int_to_ptr.hbm [resolvable:$true] %s124_s12  ;;  %s151_s8 = int_to_ptr.vmem [resolvable:$true] %s150_s8 }
  0x47   :  { %s148_s22 = sshll.u32 %s7338_s28, 4  ;;  %s173_s9 = sshll.u32 %s7249_s14, 4  ;;  %s149_s22 = int_to_ptr.hbm [resolvable:$true] %s148_s22  ;;  %s174_s9 = int_to_ptr.hbm [resolvable:$true] %s173_s9 }
  0x48   :  { %132 = dma.hbm_to_vmem [thread:$0]  %s125_s12, 256, %s127_s27, [#allocation12], %s5140_s18, %s5140_s18, %s5141_s2  }
  0x49   :  { %156 = dma.hbm_to_vmem [thread:$0]  %s149_s22, 256, %s151_s8, [#allocation15], %s5140_s18, %s5140_s18, %s5141_s2  }
  0x4a   :  { %s197_s30 = sshll.u32 %s7252_s17, 4  ;;  %s5148_s6 = smov [#allocation19]   ;;  %s198_s30 = int_to_ptr.hbm [resolvable:$true] %s197_s30 }
  0x4b   :  { %s175_s10 = sshll.u32 %s5148_s6, 4  ;;  %s5149_s0 = smov [#allocation22]   ;;  %s176_s10 = int_to_ptr.vmem [resolvable:$true] %s175_s10 }
  0x4c   :  { %178 = dma.hbm_to_vmem [thread:$0]  %s174_s9, 16, %s176_s10, [#allocation18]  }
  0x4d   :  { %s199_s11 = sshll.u32 %s5149_s0, 4  ;;  %s219_s14 = sshll.u32 %s7254_s19, 4  ;;  %s200_s11 = int_to_ptr.vmem [resolvable:$true] %s199_s11  ;;  %s220_s14 = int_to_ptr.hbm [resolvable:$true] %s219_s14 }
  0x4e   :  { %202 = dma.hbm_to_vmem [thread:$0]  %s198_s30, 16, %s200_s11, [#allocation21]  }
  0x4f   :  { %s243_s2 = sshll.u32 %s7256_s21, 4  ;;  %s5150_s1 = smov [#allocation25]   ;;  %s244_s2 = int_to_ptr.hbm [resolvable:$true] %s243_s2 }
  0x50   :  { %s221_s17 = sshll.u32 %s5150_s1, 4  ;;  %s5151_s20 = smov [#allocation28]   ;;  %s222_s17 = int_to_ptr.vmem [resolvable:$true] %s221_s17 }
  0x51   :  { %224 = dma.hbm_to_vmem [thread:$0]  %s220_s14, 16, %s222_s17, [#allocation24]  }
  0x52   :  { %s245_s28 = sshll.u32 %s5151_s20, 4  ;;  %s267_s27 = sshll.u32 %s7258_s23, 4  ;;  %s246_s28 = int_to_ptr.vmem [resolvable:$true] %s245_s28  ;;  %s268_s27 = int_to_ptr.hbm [resolvable:$true] %s267_s27 }
  0x53   :  { %248 = dma.hbm_to_vmem [thread:$0]  %s244_s2, 16, %s246_s28, [#allocation27]  }
  0x54   :  { %s5152_s19 = smov [#allocation31]  }
  0x55   :  { %s269_s4 = sshll.u32 %s5152_s19, 4  ;;  %s270_s4 = int_to_ptr.vmem [resolvable:$true] %s269_s4 }
  0x56   :  { %272 = dma.hbm_to_vmem [thread:$0]  %s268_s27, 16, %s270_s4, [#allocation30]  }
  0x57   :  { %5108 = dma.done.wait [#allocation3], 32  }
  0x58   :  { %5109 = vsyncadd [#allocation3], 4294967264 }
  0x59   :  { %5110 = dma.done.wait [#allocation6], 48  }
  0x5a   :  { %5111 = vsyncadd [#allocation6], 4294967248 }
  0x5b   :  { %5112 = dma.done.wait [#allocation9], 32  }
  0x5c   :  { %5113 = vsyncadd [#allocation9], 4294967264 }
  0x5d   :  { %5114 = dma.done.wait [#allocation12], 272  }
  0x5e   :  { %5115 = vsyncadd [#allocation12], 4294967024 }
  0x5f   :  { %5116 = dma.done.wait [#allocation15], 272  }
  0x60   :  { %5117 = vsyncadd [#allocation15], 4294967024 }
  0x61   :  { %5118 = dma.done.wait [#allocation18], 32  }
  0x62   :  { %5119 = vsyncadd [#allocation18], 4294967264 }
  0x63   :  { %5120 = dma.done.wait [#allocation21], 32  }
  0x64   :  { %5121 = vsyncadd [#allocation21], 4294967264 }
  0x65   :  { %5122 = dma.done.wait [#allocation24], 32  }
  0x66   :  { %5123 = vsyncadd [#allocation24], 4294967264 }
  0x67   :  { %5124 = dma.done.wait [#allocation27], 272  }
  0x68   :  { %5125 = vsyncadd [#allocation27], 4294967024 }
  0x69   :  { %5126 = dma.done.wait [#allocation30], 272  }
  0x6a   :  { %5127 = vsyncadd [#allocation30], 4294967024  ;;  %vm7306_vm0 = vcmask 261120   ;;  %s7339_s8 = sld [smem:[#allocation61_spill]]  ;;  %vm376_vm1 = vcmask 1041408   ;;  %vm7307_vm2 = vcmask 15360  }
  0x6b   :  { %s7340_s9 = sld [smem:[#allocation59_spill]]  ;;  %v403_v6 = vld [vmem:[#allocation7] sm:$0x3]  ;;  %v364_v8 = vld [vmem:[#allocation2] sm:$0x3]  ;;  %v5153_v12 = vmov 32.0  }
  0x6c   :  { %s7341_s11 = sld [smem:[#allocation62_spill]]  ;;  %4359 = vmatpush.msk.msra.mxu3 %vm376_vm1, %v403_v6  ;;  %4350 = vmatpush.msk.msra.mxu0 %vm376_vm1, %v364_v8  ;;  %4555 = vrcp.f32 %v5153_v12  ;;  %v7276_v53 = vmov 683565275   ;;  %v7273_v55 = vmov 2475754826   ;;  %s5162_s26 = smov 16  }
  0x6d   :  { %s7342_s14 = sld [smem:[#allocation60_spill]]  ;;  %4353 = vmatpush.msk.msra.mxu1 %vm376_vm1, %v403_v6  ;;  %4356 = vmatpush.msk.msra.mxu2 %vm376_vm1, %v364_v8  ;;  %v7271_v57 = vmov 2131351028   ;;  %v7282_v59 = vmov 2102212464   ;;  %s5163_s27 = smov 24  }
  0x6e   :  { %v7280_v61 = vmov 920167782   ;;  %s5164_s19 = smov 120   ;;  %s5165_s4 = smov 112  }
  0x6f   :  { %s7444_s29 = sld [smem:[#allocation72_spill]]  ;;  %s5167_s2 = smov [#allocation33]  }
  0x70   :  { %v360_v0 = vld [vmem:[%s7339_s8] sm:$0xff]  ;;  %v361_v4 = vld [vmem:[%s7339_s8 + $0x8] sm:$0xff]  ;;  %s7449_s12 = sld [smem:[#allocation74_spill]]  ;;  %s4321_s1 = sshll.u32 %s5167_s2, 4  ;;  %s4322_s1 = int_to_ptr.vmem [resolvable:$true] %s4321_s1 }
  0x71   :  { %v356_v1 = vld [vmem:[%s7340_s9] sm:$0xff]  ;;  %v624_v2 = vsel %vm7306_vm0, %v360_v0, 0.0  ;;  %v357_v5 = vld [vmem:[%s7340_s9 + $0x8] sm:$0xff]  ;;  %v627_v10 = vsel %vm7306_vm0, %v361_v4, 0.0  ;;  %s5168_s17 = smov 128   ;;  %s5169_s20 = smov [#allocation32]  }
  0x72   :  { %v489_v3 = vsel %vm7306_vm0, %v356_v1, 0.0  ;;  %625 = vadd.xlane.f32.xlu0 %v624_v2  ;;  %v362_v7 = vld [vmem:[%s7341_s11] sm:$0xff]  ;;  %v492_v11 = vsel %vm7306_vm0, %v357_v5, 0.0  ;;  %v4556_v13 = vpop.eup %4555  ;;  %v363_v16 = vld [vmem:[%s7341_s11 + $0x8] sm:$0xff]  ;;  %s4308_s28 = sshll.u32 %s5169_s20, 4  ;;  %s4309_s28 = int_to_ptr.vmem [resolvable:$true] %s4308_s28 }
  0x73   :  { %490 = vadd.xlane.f32.xlu1 %v489_v3  ;;  %v358_v9 = vld [vmem:[%s7342_s14] sm:$0xff]  ;;  %4360 = vmatmul.msk.f32.vlgmr.msra.gmra.mxu3 %vm7307_vm2, %v362_v7  ;;  %v496_v14 = vmul.f32 32.0, %v4556_v13  ;;  %v359_v15 = vld [vmem:[%s7342_s14 + $0x8] sm:$0xff]  ;;  %vm500_vm3 = vweird.f32 %v4556_v13  ;;  %v7278_v3 = vmov 1326507024  }
  0x74   :  { %4351 = vmatmul.msk.f32.vlgmr.msra.gmra.mxu0 %vm7307_vm2, %v358_v9  ;;  %4354 = vmatmul.msk.f32.vlgmr.msra.gmra.mxu1 %vm7307_vm2, %v358_v9 }
  0x75   :  { %4357 = vmatmul.msk.f32.vlgmr.msra.gmra.mxu2 %vm7307_vm2, %v362_v7  ;;  %v497_v17 = vsub.f32 1.0, %v496_v14 }
  0x76   :  { %s4323_s18 = sshll.u32 %s7449_s12, 4  ;;  %s4324_s18 = int_to_ptr.hbm [resolvable:$true] %s4323_s18 }
  0x77   :  { %v498_v18 = vmul.f32 %v4556_v13, %v497_v17 }
  0x79   :  { %v499_v19 = vadd.f32 %v4556_v13, %v498_v18 }
  0x7a   :  { %628 = vadd.xlane.f32.xlu0 %v627_v10 }
  0x7b   :  { %493 = vadd.xlane.f32.xlu1 %v492_v11  ;;  %4361 = vmatmul.msk.f32.gmra.mxu3 %vm7307_vm2, %v363_v16  ;;  %v5424_v20 = vsel %vm500_vm3, %v4556_v13, %v499_v19 }
  0x7c   :  { %4352 = vmatmul.msk.f32.gmra.mxu0 %vm7307_vm2, %v359_v15  ;;  %4355 = vmatmul.msk.f32.gmra.mxu1 %vm7307_vm2, %v359_v15 }
  0x7d   :  { %4358 = vmatmul.msk.f32.gmra.mxu2 %vm7307_vm2, %v363_v16 }
  0xe5   :  { %v626_v21 = vpop.xlane.xlu0 %625 }
  0xe6   :  { %v491_v22 = vpop.xlane.xlu1 %490  ;;  %v630_v23 = vmul.f32 %v626_v21, %v5424_v20 }
  0xe7   :  { %v502_v24 = vmul.f32 %v5424_v20, %v491_v22 }
  0xe8   :  { %v5428_v25 = vsub.f32 %v360_v0, %v630_v23 }
  0xe9   :  { %v5430_v26 = vsub.f32 %v356_v1, %v502_v24 }
  0xea   :  { %v634_v27 = vmul.f32 %v5428_v25, %v5428_v25 }
  0xeb   :  { %v506_v28 = vmul.f32 %v5430_v26, %v5430_v26 }
  0xec   :  { %v636_v29 = vsel %vm7306_vm0, %v634_v27, 0.0 }
  0xed   :  { %v508_v30 = vsel %vm7306_vm0, %v506_v28, 0.0  ;;  %637 = vadd.xlane.f32.xlu2 %v636_v29  ;;  %v629_v31 = vpop.xlane.xlu0 %628 }
  0xee   :  { %509 = vadd.xlane.f32.xlu0 %v508_v30  ;;  %v494_v32 = vpop.xlane.xlu1 %493  ;;  %v631_v33 = vmul.f32 %v629_v31, %v5424_v20 }
  0xef   :  { %v503_v34 = vmul.f32 %v5424_v20, %v494_v32 }
  0xf0   :  { %v5440_v35 = vsub.f32 %v361_v4, %v631_v33 }
  0xf1   :  { %v5442_v36 = vsub.f32 %v357_v5, %v503_v34 }
  0xf2   :  { %v635_v37 = vmul.f32 %v5440_v35, %v5440_v35 }
  0xf3   :  { %v507_v38 = vmul.f32 %v5442_v36, %v5442_v36 }
  0xf4   :  { %v639_v39 = vsel %vm7306_vm0, %v635_v37, 0.0 }
  0xf5   :  { %v511_v40 = vsel %vm7306_vm0, %v507_v38, 0.0  ;;  %640 = vadd.xlane.f32.xlu2 %v639_v39 }
  0xf6   :  { %512 = vadd.xlane.f32.xlu1 %v511_v40  ;;  %v5450_v41 = vpop.f32.mrf.mxu3 }
  0xf7   :  { %v2649_v42 = vand.u32 2139095040, %v5450_v41  ;;  %v2646_v44 = vand.u32 2147483647, %v5450_v41  ;;  %vm2648_vm3 = vcmp.lt.s32.totalorder %v5450_v41, 0 }
  0xf9   :  { %v2650_v43 = vshrl.u32 %v2649_v42, 23  ;;  %v2653_v47 = vand.u32 8388607, %v2646_v44 }
  0xfb   :  { %v4434_v45 = vadd.s32 4294967169, %v2650_v43  ;;  %v2654_v50 = vor.u32 8388608, %v2653_v47 }
  0xfd   :  { %v2656_v46 = vadd.s32 1, %v4434_v45  ;;  %v5469_v5 = vshll.u32 %v2654_v50, 8 }
  0xff   :  { %vm2657_vm4 = vcmp.gt.s32.totalorder %v2656_v46, 0  ;;  %v2695_v17 = vand.u32 65535, %v5469_v5  ;;  %v2696_v18 = vshrl.u32 %v5469_v5, 16 }
 0x100   :  { %v2658_v48 = vsel %vm2657_vm4, %v2656_v46, 0  ;;  %vm5512_vm4 = vcmp.le.f32.partialorder %v2646_v44, 0.7853982 }
 0x101   :  { %v2660_v49 = vand.u32 31, %v2658_v48  ;;  %v5456_v51 = vshrl.u32 %v2658_v48, 5  ;;  %v7284_v48 = vmov 0  }
 0x103   :  { %v2661_v52 = vsub.s32 32, %v2660_v49  ;;  %v2663_v54 = vshll.u32 %v7276_v53, %v2660_v49  ;;  %v2666_v56 = vshll.u32 %v7273_v55, %v2660_v49  ;;  %v2669_v58 = vshll.u32 %v7271_v57, %v2660_v49 }
 0x104   :  { %v2672_v60 = vshll.u32 %v7282_v59, %v2660_v49  ;;  %v2675_v62 = vshll.u32 %v7280_v61, %v2660_v49  ;;  %vm2678_vm5 = vcmp.lt.s32.totalorder %v5456_v51, 1  ;;  %vm2681_vm6 = vcmp.lt.s32.totalorder %v5456_v51, 4 }
 0x105   :  { %v2664_v63 = vshrl.u32 %v7273_v55, %v2661_v52  ;;  %v2667_v0 = vshrl.u32 %v7271_v57, %v2661_v52  ;;  %v2670_v1 = vshrl.u32 %v7282_v59, %v2661_v52  ;;  %v2673_v2 = vshrl.u32 %v7280_v61, %v2661_v52 }
 0x106   :  { %v2676_v4 = vshrl.u32 %v7278_v3, %v2661_v52  ;;  %vm2680_vm7 = vcmp.lt.s32.totalorder %v5456_v51, 3  ;;  %vm2679_vm8 = vcmp.lt.s32.totalorder %v5456_v51, 2  ;;  %v2662_v28 = vshrl.u32 %v7276_v53, %v2661_v52 }
 0x107   :  { %v2665_v6 = vor.u32 %v2664_v63, %v2663_v54  ;;  %v2668_v7 = vor.u32 %v2667_v0, %v2666_v56  ;;  %v2671_v8 = vor.u32 %v2670_v1, %v2669_v58  ;;  %v2674_v9 = vor.u32 %v2673_v2, %v2672_v60 }
 0x108   :  { %v2677_v10 = vor.u32 %v2676_v4, %v2675_v62 }
 0x109   :  { %v2686_v11 = vsel %vm2678_vm5, %v2665_v6, %v2668_v7  ;;  %v2690_v12 = vsel %vm2678_vm5, %v2668_v7, %v2671_v8  ;;  %v2687_v13 = vsel %vm2681_vm6, %v2674_v9, 920167782  ;;  %v2682_v45 = vsel %vm2678_vm5, %v2662_v28, %v2665_v6 }
 0x10a   :  { %v2691_v14 = vsel %vm2681_vm6, %v2677_v10, 1326507024  ;;  %v2688_v15 = vsel %vm2680_vm7, %v2671_v8, %v2687_v13  ;;  %v2683_v47 = vsel %vm2681_vm6, %v2671_v8, 2102212464 }
 0x10b   :  { %v2692_v16 = vsel %vm2680_vm7, %v2674_v9, %v2691_v14  ;;  %v2689_v19 = vsel %vm2679_vm8, %v2686_v11, %v2688_v15  ;;  %v2684_v63 = vsel %vm2680_vm7, %v2668_v7, %v2683_v47 }
 0x10c   :  { %v2693_v21 = vsel %vm2679_vm8, %v2690_v12, %v2692_v16  ;;  %v2719_v24 = vand.u32 65535, %v2689_v19  ;;  %v2720_v27 = vshrl.u32 %v2689_v19, 16  ;;  %v2685_v10 = vsel %vm2679_vm8, %v2682_v45, %v2684_v63  ;;  %v4496_v63 = vld [vmem:[#allocation16 + $0x8] sm:$0xff] }
 0x10d   :  { %v2697_v22 = vand.u32 65535, %v2693_v21  ;;  %v2698_v23 = vshrl.u32 %v2693_v21, 16  ;;  %v2739_v14 = vmul.u32 %v5469_v5, %v2685_v10  ;;  %614 = vmatpush.bf16.msrb.mxu1 %v4496_v63  ;;  %v428_v10 = vpop.f32.mrf.mxu1 }
 0x10e   :  { %v2721_v32 = vmul.u32 %v2719_v24, %v2695_v17  ;;  %v2722_v33 = vmul.u32 %v2720_v27, %v2695_v17  ;;  %v2723_v34 = vmul.u32 %v2719_v24, %v2696_v18  ;;  %v2724_v40 = vmul.u32 %v2720_v27, %v2696_v18 }
 0x10f   :  { %v2699_v29 = vmul.u32 %v2697_v22, %v2695_v17  ;;  %v2700_v30 = vmul.u32 %v2698_v23, %v2695_v17  ;;  %v2701_v31 = vmul.u32 %v2697_v22, %v2696_v18  ;;  %v2702_v37 = vmul.u32 %v2698_v23, %v2696_v18 }
 0x110   :  { %v2725_v42 = vshll.u32 %v2722_v33, 16  ;;  %v2727_v43 = vshll.u32 %v2723_v34, 16  ;;  %v2726_v60 = vshrl.u32 %v2722_v33, 16  ;;  %v2728_v4 = vshrl.u32 %v2723_v34, 16 }
 0x111   :  { %v2703_v38 = vshll.u32 %v2700_v30, 16  ;;  %v2705_v39 = vshll.u32 %v2701_v31, 16  ;;  %v2704_v52 = vshrl.u32 %v2700_v30, 16  ;;  %v2706_v0 = vshrl.u32 %v2701_v31, 16 }
 0x112   :  { %vm2729_vm10 = vc.u32 %v2721_v32, %v2725_v42  ;;  %v2731_v50 = vadd.s32 %v2725_v42, %v2721_v32 }
 0x113   :  { %vm2707_vm9 = vc.u32 %v2699_v29, %v2703_v38  ;;  %v2709_v46 = vadd.s32 %v2703_v38, %v2699_v29  ;;  %v2730_v56 = vsel %vm2729_vm10, 1, %v7284_v48 }
 0x114   :  { %v2708_v49 = vsel %vm2707_vm9, 1, %v7284_v48  ;;  %v2732_v62 = vadd.s32 %v2730_v56, %v2724_v40  ;;  %vm2733_vm12 = vc.u32 %v2731_v50, %v2727_v43  ;;  %v2735_v9 = vadd.s32 %v2731_v50, %v2727_v43 }
 0x115   :  { %v2710_v54 = vadd.s32 %v2708_v49, %v2702_v37  ;;  %vm2711_vm11 = vc.u32 %v2709_v46, %v2705_v39  ;;  %v2734_v2 = vsel %vm2733_vm12, 1, %v7284_v48 }
 0x116   :  { %v2712_v58 = vsel %vm2711_vm11, 1, %v7284_v48  ;;  %v2736_v6 = vadd.s32 %v2734_v2, %v2732_v62  ;;  %v4494_v62 = vld [vmem:[#allocation13 + $0x8] sm:$0xff]  ;;  %v4541_v2 = vld [vmem:[#allocation5] ss:$0 sm:$0xff] }
 0x117   :  { %v2714_v1 = vadd.s32 %v2712_v58, %v2710_v54  ;;  %580 = vmatpush.bf16.msrb.mxu0 %v4494_v62 }
 0x118   :  { %v2737_v11 = vadd.s32 %v2736_v6, %v2726_v60  ;;  %v5539_v6 = vld [vmem:[#allocation8] ss:$0 sm:$0xff] }
 0x119   :  { %v2715_v8 = vadd.s32 %v2714_v1, %v2704_v52  ;;  %v4500_v1 = vld [vmem:[#allocation26 + $0x8] sm:$0xff]  ;;  %7345 = vst [vmem:[#allocation47_spill] sm:$0xff] %v5539_v6 }
 0x11a   :  { %v2738_v13 = vadd.s32 %v2737_v11, %v2728_v4  ;;  %v397_v4 = vpop.f32.mrf.mxu0  ;;  %758 = vmatpush.bf16.msrb.mxu3 %v4500_v1  ;;  %v4493_v11 = vld [vmem:[#allocation13] sm:$0xff] }
 0x11b   :  { %v2716_v12 = vadd.s32 %v2715_v8, %v2706_v0  ;;  %v4498_v0 = vld [vmem:[%s7251_s16 + $0x8] sm:$0xff]  ;;  %581 = vmatpush.bf16.msrb.mxu0 %v4493_v11 }
 0x11c   :  { %v2742_v15 = vadd.s32 1, %v2738_v13  ;;  %708 = vmatpush.bf16.msrb.mxu2 %v4498_v0 }
 0x11d   :  { %vm2741_vm13 = vc.u32 %v2716_v12, %v2735_v9  ;;  %v2740_v29 = vadd.s32 %v2735_v9, %v2716_v12  ;;  %v4495_v12 = vld [vmem:[#allocation16] sm:$0xff] }
 0x11e   :  { %v2743_v16 = vsel %vm2741_vm13, %v2742_v15, %v2738_v13  ;;  %v4497_v13 = vld [vmem:[%s7251_s16] sm:$0xff]  ;;  %615 = vmatpush.bf16.msrb.mxu1 %v4495_v12  ;;  %s5161_s16 = smov 8  }
 0x11f   :  { %v2744_v7 = vadd.s32 %v2743_v16, %v2739_v14  ;;  %v4499_v16 = vld [vmem:[#allocation26] sm:$0xff] }
 0x120   :  { %709 = vmatpush.bf16.msrb.mxu2 %v4497_v13  ;;  %759 = vmatpush.bf16.msrb.mxu3 %v4499_v16 }
 0x121   :  { %v2745_v17 = vadd.s32 536870912, %v2744_v7 }
 0x123   :  { %v5506_v18 = vshrl.u32 %v2745_v17, 30  ;;  %v5549_v17 = vadd.f32 %v4541_v2, %v397_v4 }
 0x125   :  { %v2747_v19 = vshll.u32 %v5506_v18, 30  ;;  %7346 = vst [vmem:[#allocation48_spill] sm:$0xff] %v5549_v17 }
 0x127   :  { %v2748_v21 = vsub.s32 %v2744_v7, %v2747_v19  ;;  %v5552_v19 = vadd.f32 %v5539_v6, %v428_v10 }
 0x129   :  { %v2750_v22 = vsub.s32 0, %v2748_v21  ;;  %vm2749_vm14 = vcmp.lt.s32.totalorder %v2748_v21, 0  ;;  %7347 = vst [vmem:[#allocation49_spill] sm:$0xff] %v5552_v19 }
 0x12b   :  { %v2751_v23 = vsel %vm2749_vm14, %v2750_v22, %v2748_v21 }
 0x12c   :  { %v2752_v51 = vclz %v2751_v23 }
 0x12e   :  { %v4435_v24 = vadd.s32 4294967294, %v2752_v51 }
 0x130   :  { %vm4436_vm15 = vcmp.lt.s32.totalorder %v4435_v24, 0 }
 0x131   :  { %v2755_v27 = vsel %vm4436_vm15, 0, %v4435_v24 }
 0x132   :  { %v2760_v28 = vsub.s32 4294967266, %v2755_v27  ;;  %v2756_v5 = vsub.s32 32, %v2755_v27  ;;  %v2757_v31 = vshll.u32 %v2748_v21, %v2755_v27 }
 0x134   :  { %v2761_v30 = vadd.s32 127, %v2760_v28  ;;  %v2758_v32 = vshrl.u32 %v2740_v29, %v2756_v5  ;;  %v771_v28 = vand.u32 2139095040, %v5549_v17  ;;  %v2770_v29 = vsub.s32 4, %v5506_v18 }
 0x136   :  { %v2762_v33 = vshll.u32 %v2761_v30, 23  ;;  %v2759_v34 = vor.u32 %v2758_v32, %v2757_v31  ;;  %v1397_v32 = vand.u32 2139095040, %v5552_v19 }
 0x138   :  { %v2763_v37 = vor.u32 4788187, %v2762_v33  ;;  %v2766_v39 = vcvt.s32.f32 %v2759_v34 }
 0x13a   :  { %v2764_v38 = vand.u32 2147483647, %v2763_v37 }
 0x13c   :  { %v2767_v40 = vmul.f32 %v2766_v39, %v2764_v38  ;;  %v2771_v39 = vsel %vm2648_vm3, %v2770_v29, %v5506_v18 }
 0x13e   :  { %v2768_v42 = vxor.u32 2147483648, %v2767_v40 }
 0x140   :  { %v2769_v45 = vsel %vm2648_vm3, %v2768_v42, %v2767_v40 }
 0x141   :  { %v5521_v46 = vsel %vm5512_vm4, %v5450_v41, %v2769_v45  ;;  %v1398_v45 = vshrl.u32 %v1397_v32, 23 }
 0x142   :  { %v5526_v52 = vmul.f32 %v5521_v46, %v5521_v46 }
 0x143   :  { %v4410_v63 = vadd.s32 4294967169, %v1398_v45  ;;  %v4548_v45 = vld [vmem:[#allocation25] ss:$0 sm:$0xff] }
 0x144   :  { %v2782_v56 = vmul.f32 -0.00019511016, %v5526_v52  ;;  %v2775_v37 = vmul.f32 -0.001358992, %v5526_v52 }
 0x146   :  { %v2783_v60 = vadd.f32 0.008332121, %v2782_v56 }
 0x148   :  { %v2784_v9 = vmul.f32 %v2783_v60, %v5526_v52 }
 0x14a   :  { %v2785_v22 = vadd.f32 -0.16666654, %v2784_v9 }
 0x14c   :  { %v2786_v31 = vmul.f32 %v2785_v22, %v5526_v52 }
 0x14e   :  { %v2787_v42 = vadd.f32 1.0, %v2786_v31 }
 0x150   :  { %v5579_v18 = vmul.f32 %v2787_v42, %v5521_v46 }
 0x152   :  { %v2793_v13 = vxor.u32 2147483648, %v5579_v18 }
 0x160   :  { %v638_v47 = vpop.xlane.xlu2 %637 }
 0x161   :  { %v510_v49 = vpop.xlane.xlu0 %509  ;;  %v642_v50 = vmul.f32 %v638_v47, %v5424_v20  ;;  %v2776_v47 = vadd.f32 0.041655596, %v2775_v37 }
 0x162   :  { %v514_v44 = vmul.f32 %v510_v49, %v5424_v20  ;;  %v2773_v49 = vsel %vm5512_vm4, 0, %v2771_v39 }
 0x163   :  { %v5529_v54 = vadd.f32 1e-05, %v642_v50  ;;  %v2777_v56 = vmul.f32 %v2776_v47, %v5526_v52  ;;  %v2790_v1 = vand.u32 3, %v2773_v49 }
 0x164   :  { %v5532_v58 = vadd.f32 1e-05, %v514_v44 }
 0x165   :  { %4557 = vrsqrt.f32 %v5529_v54  ;;  %vm652_vm6 = vweird.f32 %v5529_v54  ;;  %v2778_v43 = vadd.f32 -0.4999988, %v2777_v56  ;;  %vm2792_vm11 = vcmp.eq.s32.totalorder %v2790_v1, 0 }
 0x166   :  { %4559 = vrsqrt.f32 %v5532_v58  ;;  %vm524_vm9 = vweird.f32 %v5532_v58  ;;  %vm2791_vm14 = vcmp.lt.s32.totalorder %v2790_v1, 2  ;;  %vm2795_vm15 = vcmp.eq.s32.totalorder %v2790_v1, 2 }
 0x168   :  { %v641_v14 = vpop.xlane.xlu2 %640 }
 0x169   :  { %v513_v15 = vpop.xlane.xlu1 %512  ;;  %v643_v51 = vmul.f32 %v641_v14, %v5424_v20 }
 0x16a   :  { %v515_v24 = vmul.f32 %v513_v15, %v5424_v20  ;;  %v772_v20 = vshrl.u32 %v771_v28, 23  ;;  %v5595_v15 = vadd.s32 1, %v4410_v63 }
 0x16b   :  { %v5541_v8 = vpop.eup %4557  ;;  %v645_v33 = vadd.f32 1e-05, %v643_v51  ;;  %v4545_v51 = vld [vmem:[#allocation19] ss:$0 sm:$0xff] }
 0x16c   :  { %v5547_v7 = vpop.eup %4559  ;;  %v647_v21 = vmul.f32 %v5541_v8, %v5529_v54  ;;  %v5566_v34 = vadd.f32 1e-05, %v515_v24  ;;  %v4398_v50 = vadd.s32 4294967169, %v772_v20  ;;  %vm653_vm5 = vweird.f32 %v5541_v8 }
 0x16d   :  { %v519_v23 = vmul.f32 %v5547_v7, %v5532_v58  ;;  %4561 = vrsqrt.f32 %v645_v33  ;;  %vm5582_vm7 = vmor %vm652_vm6, %vm653_vm5  ;;  %vm525_vm8 = vweird.f32 %v5547_v7  ;;  %v2779_v54 = vmul.f32 %v2778_v43, %v5526_v52 }
 0x16e   :  { %v648_v27 = vmul.f32 %v5541_v8, %v647_v21  ;;  %4563 = vrsqrt.f32 %v5566_v34  ;;  %v778_v4 = vadd.s32 1, %v4398_v50  ;;  %vm5597_vm10 = vmor %vm524_vm9, %vm525_vm8  ;;  %vm662_vm4 = vweird.f32 %v645_v33  ;;  %v4544_v50 = vld [vmem:[#allocation11] ss:$0 sm:$0xff] }
 0x16f   :  { %v520_v30 = vmul.f32 %v5547_v7, %v519_v23  ;;  %v5601_v22 = vadd.f32 1.0, %v2779_v54  ;;  %vm2789_vm5 = vweird.f32 %v5450_v41  ;;  %vm1405_vm9 = vcmp.gt.s32.totalorder %v5595_v15, 0 }
 0x170   :  { %v649_v5 = vmul.f32 0.5, %v648_v27  ;;  %vm779_vm12 = vcmp.gt.s32.totalorder %v778_v4, 0  ;;  %v4547_v27 = vld [vmem:[#allocation23] ss:$0 sm:$0xff] }
 0x171   :  { %v521_v38 = vmul.f32 0.5, %v520_v30  ;;  %v2794_v28 = vsel %vm2792_vm11, %v5601_v22, %v2793_v13  ;;  %v2796_v29 = vxor.u32 2147483648, %v5601_v22  ;;  %v3100_v30 = vadd.s32 3, %v2773_v49 }
 0x172   :  { %v650_v40 = vsub.f32 1.5, %v649_v5  ;;  %v780_v37 = vsel %vm779_vm12, %v778_v4, 0 }
 0x173   :  { %v522_v44 = vsub.f32 1.5, %v521_v38  ;;  %v4562_v62 = vpop.eup %4561  ;;  %v2797_v32 = vsel %vm2795_vm15, %v2796_v29, %v5579_v18  ;;  %v3101_v56 = vand.u32 3, %v3100_v30  ;;  %v782_v1 = vand.u32 31, %v780_v37 }
 0x174   :  { %v651_v60 = vmul.f32 %v5541_v8, %v650_v40  ;;  %v4564_v0 = vpop.eup %4563  ;;  %v657_v2 = vmul.f32 %v4562_v62, %v645_v33  ;;  %vm663_vm13 = vweird.f32 %v4562_v62  ;;  %v4546_v40 = vld [vmem:[#allocation20] ss:$0 sm:$0xff] }
 0x175   :  { %v523_v10 = vmul.f32 %v5547_v7, %v522_v44  ;;  %v529_v11 = vmul.f32 %v4564_v0, %v5566_v34  ;;  %vm535_vm3 = vweird.f32 %v4564_v0  ;;  %vm664_vm6 = vmor %vm662_vm4, %vm663_vm13  ;;  %vm3106_vm11 = vcmp.eq.s32.totalorder %v3101_v56, 2 }
 0x176   :  { %v655_v46 = vsel %vm5582_vm7, %v5541_v8, %v651_v60  ;;  %v658_v12 = vmul.f32 %v4562_v62, %v657_v2  ;;  %vm534_vm7 = vweird.f32 %v5566_v34  ;;  %v5625_v60 = vpop.f32.mrf.mxu2  ;;  %v783_v16 = vsub.s32 32, %v782_v1 }
 0x177   :  { %v530_v14 = vmul.f32 %v4564_v0, %v529_v11  ;;  %v666_v8 = vmul.f32 %v655_v46, %v5428_v25  ;;  %v527_v52 = vsel %vm5597_vm10, %v5547_v7, %v523_v10  ;;  %v4543_v7 = vld [vmem:[#allocation10] ss:$0 sm:$0xff]  ;;  %vm536_vm8 = vmor %vm534_vm7, %vm535_vm3  ;;  %7353 = vst [vmem:[#allocation51_spill] sm:$0xff] %v5625_v60  ;;  %vm3103_vm10 = vcmp.eq.s32.totalorder %v3101_v56, 0 }
 0x178   :  { %v659_v21 = vmul.f32 0.5, %v658_v12  ;;  %v538_v25 = vmul.f32 %v527_v52, %v5430_v26  ;;  %v2798_v26 = vsel %vm2791_vm14, %v2794_v28, %v2797_v32  ;;  %vm3102_vm12 = vcmp.lt.s32.totalorder %v3101_v56, 2 }
 0x179   :  { %v531_v23 = vmul.f32 0.5, %v530_v14  ;;  %v671_v38 = vmul.f32 %v4545_v51, %v666_v8  ;;  %v721_v42 = vmul.f32 %v4547_v27, %v666_v8  ;;  %v2799_v47 = vsel %vm2789_vm5, nan, %v2798_v26 }
 0x17a   :  { %v660_v58 = vsub.f32 1.5, %v659_v21  ;;  %v543_v49 = vmul.f32 %v4543_v7, %v538_v25  ;;  %v5623_v44 = vpack.c.bf16 %v2799_v47, %v2799_v47  ;;  %v1406_v21 = vsel %vm1405_vm9, %v5595_v15, 0 }
 0x17b   :  { %v532_v24 = vsub.f32 1.5, %v531_v23  ;;  %v676_v2 = vadd.f32 %v4546_v40, %v671_v38  ;;  %v726_v4 = vadd.f32 %v4548_v45, %v721_v42  ;;  %v3105_v52 = vsel %vm3103_vm10, %v5601_v22, %v2793_v13 }
 0x17c   :  { %v661_v5 = vmul.f32 %v4562_v62, %v660_v58  ;;  %7352 = vst [vmem:[#allocation50_spill] sm:$0xff] %v5623_v44  ;;  %v548_v10 = vadd.f32 %v4544_v50, %v543_v49  ;;  %v3108_v23 = vsel %vm3106_vm11, %v2796_v29, %v5579_v18  ;;  %v7270_v58 = vand.u32 2147483647, %v5549_v17 }
 0x17d   :  { %v533_v31 = vmul.f32 %v4564_v0, %v532_v24  ;;  %v5648_v15 = vand.u32 31, %v1406_v21  ;;  %v785_v24 = vshll.u32 %v7276_v53, %v782_v1  ;;  %v795_v28 = vshrl.u32 %v7280_v61, %v783_v16 }
 0x17e   :  { %v665_v20 = vsel %vm664_vm6, %v4562_v62, %v661_v5  ;;  %v3109_v25 = vsel %vm3102_vm12, %v3105_v52, %v3108_v23  ;;  %v786_v5 = vshrl.u32 %v7273_v55, %v783_v16  ;;  %v798_v13 = vshrl.u32 %v7278_v3, %v783_v16 }
 0x17f   :  { %v667_v33 = vmul.f32 %v665_v20, %v5440_v35  ;;  %v537_v39 = vsel %vm536_vm8, %v4564_v0, %v533_v31  ;;  %v3327_v0 = vunpack.c.l.b16 %v5623_v44  ;;  %v788_v22 = vshll.u32 %v7273_v55, %v782_v1 }
 0x180   :  { %v539_v34 = vmul.f32 %v537_v39, %v5442_v36  ;;  %v2023_v36 = vand.u32 2139095040, %v5625_v60  ;;  %v789_v29 = vshrl.u32 %v7271_v57, %v783_v16  ;;  %v791_v30 = vshll.u32 %v7271_v57, %v782_v1 }
 0x181   :  { %v672_v62 = vmul.f32 %v4545_v51, %v667_v33  ;;  %v722_v63 = vmul.f32 %v4547_v27, %v667_v33  ;;  %v5630_v46 = vpack.c.b16 %v3327_v0, %v3327_v0  ;;  %v5646_v51 = vshrl.u32 %v780_v37, 5 }
 0x182   :  { %v544_v35 = vmul.f32 %v4543_v7, %v539_v34  ;;  %v2024_v8 = vshrl.u32 %v2023_v36, 23  ;;  %v794_v27 = vshll.u32 %v7282_v59, %v782_v1  ;;  %v797_v7 = vshll.u32 %v7280_v61, %v782_v1 }
 0x183   :  { %v677_v43 = vadd.f32 %v4546_v40, %v672_v62  ;;  %v727_v9 = vadd.f32 %v4548_v45, %v722_v63  ;;  %7354 = vst [vmem:[#allocation52_spill] sm:$0xff] %v5630_v46  ;;  %3437 = vrot.lane.b32.xlu0 %v5630_v46, %s5161_s16  ;;  %v792_v31 = vshrl.u32 %v7282_v59, %v783_v16  ;;  %v775_v32 = vand.u32 8388607, %v7270_v58 }
 0x184   :  { %v549_v11 = vadd.f32 %v4544_v50, %v544_v35  ;;  %v4422_v18 = vadd.s32 4294967169, %v2024_v8  ;;  %v3110_v37 = vsel %vm2789_vm5, nan, %v3109_v25  ;;  %v796_v20 = vor.u32 %v795_v28, %v794_v27 }
 0x185   :  { %v678_v12 = vpack.c.bf16 %v677_v43, %v676_v2  ;;  %v728_v54 = vpack.c.bf16 %v727_v9, %v726_v4  ;;  %v5667_v38 = vsub.s32 32, %v5648_v15  ;;  %v799_v26 = vor.u32 %v798_v13, %v797_v7 }
 0x186   :  { %v550_v14 = vpack.c.bf16 %v549_v11, %v548_v10  ;;  %vm803_vm13 = vcmp.lt.s32.totalorder %v5646_v51, 4  ;;  %v2030_v33 = vadd.s32 1, %v4422_v18  ;;  %v787_v39 = vor.u32 %v786_v5, %v785_v24 }
 0x187   :  { %4388 = vmatmul.msk.bf16.vlgmr.msrb.gmra.mxu2 %vm7306_vm0, %v678_v12  ;;  %4397 = vmatmul.msk.bf16.vlgmr.msrb.gmra.mxu3 %vm7306_vm0, %v728_v54  ;;  %v790_v40 = vor.u32 %v789_v29, %v788_v22  ;;  %v793_v42 = vor.u32 %v792_v31, %v791_v30  ;;  %v5670_v45 = vpack.c.bf16 %v3110_v37, %v3110_v37  ;;  %v776_v47 = vor.u32 8388608, %v775_v32 }
 0x188   :  { %4370 = vmatmul.msk.bf16.vlgmr.msrb.gmra.mxu0 %vm7306_vm0, %v550_v14  ;;  %4379 = vmatmul.msk.bf16.vlgmr.msrb.gmra.mxu1 %vm7306_vm0, %v550_v14  ;;  %v784_v41 = vshrl.u32 %v7276_v53, %v783_v16  ;;  %vm800_vm14 = vcmp.lt.s32.totalorder %v5646_v51, 1  ;;  %vm802_vm15 = vcmp.lt.s32.totalorder %v5646_v51, 3  ;;  %v809_v34 = vsel %vm803_vm13, %v796_v20, 920167782 }
 0x189   :  { %7355 = vst [vmem:[#allocation53_spill] sm:$0xff] %v5670_v45  ;;  %v1423_v49 = vshll.u32 %v7280_v61, %v5648_v15  ;;  %v1424_v50 = vshrl.u32 %v7278_v3, %v5667_v38  ;;  %v813_v56 = vsel %vm803_vm13, %v799_v26, 1326507024  ;;  %v7269_v62 = vand.u32 2147483647, %v5552_v19 }
 0x18a   :  { %v5684_v63 = vshrl.u32 %v1406_v21, 5  ;;  %vm2031_vm3 = vcmp.gt.s32.totalorder %v2030_v33, 0  ;;  %vm801_vm4 = vcmp.lt.s32.totalorder %v5646_v51, 2  ;;  %v808_v1 = vsel %vm800_vm14, %v787_v39, %v790_v40 }
 0x18b   :  { %3329 = vrot.lane.b32.xlu0 %v5630_v46, %s5162_s26  ;;  %v812_v35 = vsel %vm800_vm14, %v790_v40, %v793_v42  ;;  %v3332_v0 = vunpack.c.l.b16 %v5670_v45  ;;  %v1414_v2 = vshll.u32 %v7273_v55, %v5648_v15  ;;  %v1415_v43 = vshrl.u32 %v7271_v57, %v5667_v38 }
 0x18c   :  { %v1417_v4 = vshll.u32 %v7271_v57, %v5648_v15  ;;  %v1418_v9 = vshrl.u32 %v7282_v59, %v5667_v38  ;;  %v810_v36 = vsel %vm802_vm15, %v793_v42, %v809_v34  ;;  %v814_v10 = vsel %vm802_vm15, %v796_v20, %v813_v56 }
 0x18d   :  { %v1425_v11 = vor.u32 %v1424_v50, %v1423_v49  ;;  %v2032_v12 = vsel %vm2031_vm3, %v2030_v33, 0  ;;  %v1401_v54 = vand.u32 8388607, %v7269_v62  ;;  %v1420_v14 = vshll.u32 %v7282_v59, %v5648_v15 }
 0x18e   :  { %v1421_v16 = vshrl.u32 %v7280_v61, %v5667_v38  ;;  %vm1429_vm5 = vcmp.lt.s32.totalorder %v5684_v63, 4  ;;  %v804_v21 = vsel %vm800_vm14, %v784_v41, %v787_v39  ;;  %v805_v8 = vsel %vm803_vm13, %v793_v42, 2102212464 }
 0x18f   :  { %v5715_v52 = vshll.u32 %v776_v47, 8  ;;  %v5717_v23 = vpack.c.b16 %v3332_v0, %v3332_v0  ;;  %v815_v24 = vsel %vm801_vm4, %v812_v35, %v814_v10  ;;  %v5721_v27 = vor.u32 %v1415_v43, %v1414_v2 }
 0x190   :  { %v5723_v28 = vor.u32 %v1418_v9, %v1417_v4  ;;  %v2034_v25 = vand.u32 31, %v2032_v12  ;;  %v811_v5 = vsel %vm801_vm4, %v808_v1, %v810_v36  ;;  %vm1426_vm6 = vcmp.lt.s32.totalorder %v5684_v63, 1  ;;  %v5782_v36 = vpop.f32.mrf.mxu2 }
 0x191   :  { %7356 = vst [vmem:[#allocation54_spill] sm:$0xff] %v5715_v52  ;;  %vm1428_vm7 = vcmp.lt.s32.totalorder %v5684_v63, 3  ;;  %v1439_v7 = vsel %vm1429_vm5, %v1425_v11, 1326507024  ;;  %3334 = vrot.lane.b32.xlu2 %v5717_v23, %s5163_s27  ;;  %3439 = vrot.lane.b32.xlu1 %v5717_v23, %s5162_s26  ;;  %v806_v13 = vsel %vm802_vm15, %v790_v40, %v805_v8  ;;  %v841_v18 = vand.u32 65535, %v811_v5 }
 0x192   :  { %7357 = vst [vmem:[#allocation55_spill] sm:$0xff] %v5717_v23  ;;  %v1402_v22 = vor.u32 8388608, %v1401_v54  ;;  %v1422_v29 = vor.u32 %v1421_v16, %v1420_v14  ;;  %v817_v30 = vand.u32 65535, %v5715_v52  ;;  %v818_v31 = vshrl.u32 %v5715_v52, 16 }
 0x193   :  { %v819_v32 = vand.u32 65535, %v815_v24  ;;  %v820_v37 = vshrl.u32 %v815_v24, 16  ;;  %vm1427_vm8 = vcmp.lt.s32.totalorder %v5684_v63, 2  ;;  %v1438_v20 = vsel %vm1426_vm6, %v5721_v27, %v5723_v28  ;;  %7359 = vst [vmem:[#allocation57_spill] sm:$0xff] %v5782_v36 }
 0x194   :  { %v1440_v26 = vsel %vm1428_vm7, %v1422_v29, %v1439_v7  ;;  %v5746_v33 = vsub.s32 32, %v2034_v25  ;;  %v1411_v39 = vshll.u32 %v7276_v53, %v5648_v15  ;;  %v1412_v40 = vshrl.u32 %v7273_v55, %v5667_v38 }
 0x195   :  { %v5754_v42 = vsel %vm801_vm4, %v804_v21, %v806_v13  ;;  %v842_v47 = vshrl.u32 %v811_v5, 16  ;;  %v5756_v41 = vmul.u32 %v841_v18, %v817_v30  ;;  %v5758_v34 = vshll.u32 %v1402_v22, 8 }
 0x196   :  { %v821_v49 = vmul.u32 %v819_v32, %v817_v30  ;;  %v5760_v50 = vmul.u32 %v820_v37, %v817_v30  ;;  %v5762_v56 = vmul.u32 %v841_v18, %v818_v31  ;;  %v5766_v15 = vsel %vm1427_vm8, %v1438_v20, %v1440_v26 }
 0x197   :  { %7358 = vst [vmem:[#allocation56_spill] sm:$0xff] %v5758_v34  ;;  %v5768_v1 = vmul.u32 %v819_v32, %v818_v31  ;;  %v5770_v35 = vmul.u32 %v820_v37, %v818_v31  ;;  %v2049_v51 = vshll.u32 %v7280_v61, %v2034_v25  ;;  %v2050_v0 = vshrl.u32 %v7278_v3, %v5746_v33 }
 0x198   :  { %v5775_v2 = vor.u32 %v1412_v40, %v1411_v39  ;;  %v1435_v43 = vsel %vm1429_vm5, %v1422_v29, 920167782  ;;  %v7268_v4 = vand.u32 2147483647, %v5625_v60  ;;  %v5780_v9 = vshrl.u32 %v2032_v12, 5 }
 0x199   :  { %v5785_v10 = vand.u32 65535, %v5758_v34  ;;  %v1446_v11 = vshrl.u32 %v5766_v15, 16  ;;  %v2046_v54 = vshll.u32 %v7282_v59, %v2034_v25  ;;  %v2047_v14 = vshrl.u32 %v7280_v61, %v5746_v33 }
 0x19a   :  { %v2040_v16 = vshll.u32 %v7273_v55, %v2034_v25  ;;  %v2041_v21 = vshrl.u32 %v7271_v57, %v5746_v33  ;;  %v2043_v12 = vshll.u32 %v7271_v57, %v2034_v25  ;;  %v2044_v8 = vshrl.u32 %v7282_v59, %v5746_v33 }
 0x19b   :  { %v825_v24 = vshll.u32 %v5760_v50, 16  ;;  %v5798_v5 = vmul.u32 %v842_v47, %v817_v30  ;;  %v2051_v7 = vor.u32 %v2050_v0, %v2049_v51  ;;  %v2177_v13 = vand.u32 2139095040, %v5782_v36 }
 0x19c   :  { %v2027_v18 = vand.u32 8388607, %v7268_v4  ;;  %v2037_v22 = vshll.u32 %v7276_v53, %v2034_v25  ;;  %v2038_v29 = vshrl.u32 %v7273_v55, %v5746_v33  ;;  %vm2055_vm9 = vcmp.lt.s32.totalorder %v5780_v9, 4 }
 0x19d   :  { %v5807_v32 = vmul.u32 %v842_v47, %v818_v31  ;;  %v1434_v30 = vsel %vm1426_vm6, %v5775_v2, %v5721_v27  ;;  %v1436_v37 = vsel %vm1428_vm7, %v5723_v28, %v1435_v43  ;;  %v2048_v20 = vor.u32 %v2047_v14, %v2046_v54 }
 0x19e   :  { %v1445_v26 = vand.u32 65535, %v5766_v15  ;;  %v5820_v25 = vmul.u32 %v1446_v11, %v5785_v10  ;;  %v5822_v39 = vor.u32 %v2041_v21, %v2040_v16  ;;  %v5824_v31 = vor.u32 %v2044_v8, %v2043_v12 }
 0x19f   :  { %vm2052_vm10 = vcmp.lt.s32.totalorder %v5780_v9, 1  ;;  %vm2054_vm11 = vcmp.lt.s32.totalorder %v5780_v9, 3  ;;  %v2065_v40 = vsel %vm2055_vm9, %v2051_v7, 1326507024  ;;  %v2178_v47 = vshrl.u32 %v2177_v13, 23 }
 0x1a0   :  { %v827_v51 = vshll.u32 %v5768_v1, 16  ;;  %vm829_vm12 = vc.u32 %v821_v49, %v825_v24  ;;  %v2028_v0 = vor.u32 8388608, %v2027_v18  ;;  %v5831_v43 = vor.u32 %v2038_v29, %v2037_v22 }
 0x1a1   :  { %v831_v54 = vadd.s32 %v825_v24, %v821_v49  ;;  %v1437_v14 = vsel %vm1427_vm8, %v1434_v30, %v1436_v37  ;;  %v2061_v16 = vsel %vm2055_vm9, %v2048_v20, 920167782  ;;  %v847_v21 = vshll.u32 %v5798_v5, 16 }
 0x1a2   :  { %vm2053_vm13 = vcmp.lt.s32.totalorder %v5780_v9, 2  ;;  %v2064_v12 = vsel %vm2052_vm10, %v5822_v39, %v5824_v31  ;;  %v2066_v8 = vsel %vm2054_vm11, %v2048_v20, %v2065_v40  ;;  %v4425_v7 = vadd.s32 4294967169, %v2178_v47 }
 0x1a3   :  { %v830_v49 = vsel %vm829_vm12, 1, %v7284_v48  ;;  %v1410_v24 = vshrl.u32 %v7276_v53, %v5667_v38  ;;  %v1447_v13 = vmul.u32 %v1445_v26, %v5785_v10  ;;  %v1451_v18 = vshll.u32 %v5820_v25, 16 }
 0x1a4   :  { %v2060_v22 = vsel %vm2052_vm10, %v5831_v43, %v5822_v39  ;;  %v2062_v29 = vsel %vm2054_vm11, %v5824_v31, %v2061_v16  ;;  %v5857_v30 = vshll.u32 %v2028_v0, 8  ;;  %v2184_v37 = vadd.s32 1, %v4425_v7 }
 0x1a5   :  { %v1444_v20 = vshrl.u32 %v5758_v34, 16  ;;  %v1467_v40 = vand.u32 65535, %v1437_v14  ;;  %v1468_v38 = vshrl.u32 %v1437_v14, 16  ;;  %v2067_v47 = vsel %vm2053_vm13, %v2064_v12, %v2066_v8 }
 0x1a6   :  { %7360 = vst [vmem:[#allocation58_spill] sm:$0xff] %v5857_v30  ;;  %vm2185_vm14 = vcmp.gt.s32.totalorder %v2184_v37, 0  ;;  %v7275_v4 = vshll.u32 %v5762_v56, 16  ;;  %vm851_vm15 = vc.u32 %v5756_v41, %v847_v21  ;;  %v5865_v62 = vadd.s32 %v847_v21, %v5756_v41 }
 0x1a7   :  { %v832_v16 = vadd.s32 %v830_v49, %v5770_v35  ;;  %v5871_v0 = vsel %vm1426_vm6, %v1410_v24, %v5775_v2  ;;  %v2063_v14 = vsel %vm2053_vm13, %v2060_v22, %v2062_v29  ;;  %v2186_v7 = vsel %vm2185_vm14, %v2184_v37, 0 }
 0x1a8   :  { %vm1455_vm3 = vc.u32 %v1447_v13, %v1451_v18  ;;  %v2069_v12 = vand.u32 65535, %v5857_v30  ;;  %v2072_v8 = vshrl.u32 %v2067_v47, 16  ;;  %vm833_vm4 = vc.u32 %v831_v54, %v827_v51 }
 0x1a9   :  { %v5879_v41 = vsel %vm1429_vm5, %v5723_v28, 2102212464  ;;  %v5881_v35 = vmul.u32 %v1445_v26, %v1444_v20  ;;  %v1469_v21 = vmul.u32 %v1467_v40, %v5785_v10  ;;  %v852_v2 = vsel %vm851_vm15, 1, %v7284_v48 }
 0x1aa   :  { %v5886_v49 = vmul.u32 %v1468_v38, %v5785_v10  ;;  %v2094_v24 = vshrl.u32 %v2063_v14, 16  ;;  %v2188_v22 = vand.u32 31, %v2186_v7  ;;  %vm855_vm6 = vc.u32 %v5865_v62, %v7275_v4 }
 0x1ab   :  { %v1450_v51 = vmul.u32 %v1446_v11, %v1444_v20  ;;  %v1456_v28 = vsel %vm1455_vm3, 1, %v7284_v48  ;;  %v5894_v26 = vmul.u32 %v1467_v40, %v1444_v20  ;;  %v834_v54 = vsel %vm833_vm4, 1, %v7284_v48 }
 0x1ac   :  { %v2070_v29 = vshrl.u32 %v5857_v30, 16  ;;  %v2071_v37 = vand.u32 65535, %v2067_v47  ;;  %v5898_v10 = vmul.u32 %v2072_v8, %v2069_v12  ;;  %v854_v58 = vadd.s32 %v852_v2, %v5807_v32 }
 0x1ad   :  { %v1453_v57 = vshll.u32 %v5881_v35, 16  ;;  %v5902_v55 = vmul.u32 %v1468_v38, %v1444_v20  ;;  %v2093_v4 = vand.u32 65535, %v2063_v14  ;;  %v856_v15 = vsel %vm855_vm6, 1, %v7284_v48 }
 0x1ae   :  { %v5905_v11 = vmul.u32 %v2094_v24, %v2069_v12  ;;  %v5907_v40 = vsub.s32 32, %v2188_v22  ;;  %v1457_v47 = vadd.s32 %v1451_v18, %v1447_v13  ;;  %v5911_v61 = vadd.s32 %v1456_v28, %v1450_v51 }
 0x1af   :  { %v5913_v59 = vadd.s32 %v834_v54, %v832_v16  ;;  %v2073_v20 = vmul.u32 %v2071_v37, %v2069_v12  ;;  %v5916_v38 = vmul.u32 %v2071_v37, %v2070_v29  ;;  %v2077_v14 = vshll.u32 %v5898_v10, 16 }
 0x1b0   :  { %v5919_v2 = vadd.s32 %v856_v15, %v854_v58  ;;  %v2076_v48 = vmul.u32 %v2072_v8, %v2070_v29  ;;  %v2095_v45 = vmul.u32 %v2093_v4, %v2069_v12  ;;  %v5921_v44 = vmul.u32 %v2093_v4, %v2070_v29 }
 0x1b1   :  { %v2098_v53 = vmul.u32 %v2094_v24, %v2070_v29  ;;  %v2099_v13 = vshll.u32 %v5905_v11, 16  ;;  %v7361_v16 = vmov 2102212464   ;;  %v7362_v28 = vmov 920167782  }
 0x1b2   :  { %v2200_v51 = vshll.u32 %v7361_v16, %v2188_v22  ;;  %v2201_v54 = vshrl.u32 %v7362_v28, %v5907_v40  ;;  %v5928_v37 = vshrl.u32 %v2186_v7, 5  ;;  %v2203_v3 = vshll.u32 %v7362_v28, %v2188_v22 }
 0x1b3   :  { %v7363_v58 = vmov 1326507024   ;;  %v1473_v4 = vshll.u32 %v5886_v49, 16  ;;  %v2079_v12 = vshll.u32 %v5916_v38, 16  ;;  %vm2081_vm5 = vc.u32 %v2073_v20, %v2077_v14 }
 0x1b4   :  { %v2204_v8 = vshrl.u32 %v7363_v58, %v5907_v40  ;;  %v7364_v24 = vmov 683565275   ;;  %v7365_v15 = vmov 2475754826   ;;  %v7366_v7 = vmov 2131351028  }
 0x1b5   :  { %v2191_v29 = vshll.u32 %v7364_v24, %v2188_v22  ;;  %v2194_v32 = vshll.u32 %v7365_v15, %v2188_v22  ;;  %v2192_v18 = vshrl.u32 %v7365_v15, %v5907_v40  ;;  %v2195_v46 = vshrl.u32 %v7366_v7, %v5907_v40 }
 0x1b6   :  { %v2197_v23 = vshll.u32 %v7366_v7, %v2188_v22  ;;  %v2198_v60 = vshrl.u32 %v7361_v16, %v5907_v40  ;;  %vm2103_vm12 = vc.u32 %v2095_v45, %v2099_v13  ;;  %v7367_v19 = vand.u32 2147483647, %v5782_v36 }
 0x1b7   :  { %v2202_v58 = vor.u32 %v2201_v54, %v2200_v51  ;;  %v1475_v28 = vshll.u32 %v5894_v26, 16  ;;  %v2205_v6 = vor.u32 %v2204_v8, %v2203_v3  ;;  %vm2209_vm14 = vcmp.lt.s32.totalorder %v5928_v37, 4 }
 0x1b8   :  { %v2181_v17 = vand.u32 8388607, %v7367_v19  ;;  %vm1477_vm15 = vc.u32 %v1469_v21, %v1473_v4  ;;  %v5948_v15 = vadd.s32 %v1473_v4, %v1469_v21  ;;  %v7368_v30 = vmov 0  }
 0x1b9   :  { %v2082_v34 = vsel %vm2081_vm5, 1, %v7368_v30  ;;  %v2083_v52 = vadd.s32 %v2077_v14, %v2073_v20  ;;  %v2101_v22 = vshll.u32 %v5921_v44, 16  ;;  %v5952_v7 = vadd.s32 %v2099_v13, %v2095_v45 }
 0x1ba   :  { %v2104_v16 = vsel %vm2103_vm12, 1, %v7368_v30  ;;  %v5955_v36 = vor.u32 %v2192_v18, %v2191_v29  ;;  %v5957_v19 = vor.u32 %v2195_v46, %v2194_v32  ;;  %v5959_v51 = vor.u32 %v2198_v60, %v2197_v23 }
 0x1bb   :  { %vm2206_vm3 = vcmp.lt.s32.totalorder %v5928_v37, 1  ;;  %vm2208_vm4 = vcmp.lt.s32.totalorder %v5928_v37, 3  ;;  %v2215_v3 = vsel %vm2209_vm14, %v2202_v58, 920167782  ;;  %v1478_v21 = vsel %vm1477_vm15, 1, %v7368_v30 }
 0x1bc   :  { %v2182_v20 = vor.u32 8388608, %v2181_v17  ;;  %v2219_v45 = vsel %vm2209_vm14, %v2205_v6, 1326507024  ;;  %vm1459_vm6 = vc.u32 %v1457_v47, %v1453_v57  ;;  %vm1481_vm5 = vc.u32 %v5948_v15, %v1475_v28 }
 0x1bd   :  { %v2084_v60 = vadd.s32 %v2082_v34, %v2076_v48  ;;  %vm2085_vm12 = vc.u32 %v2083_v52, %v2079_v12  ;;  %v2106_v46 = vadd.s32 %v2104_v16, %v2098_v53  ;;  %vm2107_vm0 = vc.u32 %v5952_v7, %v2101_v22 }
 0x1be   :  { %vm2207_vm2 = vcmp.lt.s32.totalorder %v5928_v37, 2  ;;  %v2214_v17 = vsel %vm2206_vm3, %v5955_v36, %v5957_v19  ;;  %v2216_v57 = vsel %vm2208_vm4, %v5959_v51, %v2215_v3  ;;  %v1480_v6 = vadd.s32 %v1478_v21, %v5902_v55 }
 0x1bf   :  { %v2218_v53 = vsel %vm2206_vm3, %v5957_v19, %v5959_v51  ;;  %v2220_v48 = vsel %vm2208_vm4, %v2202_v58, %v2219_v45  ;;  %v1460_v52 = vsel %vm1459_vm6, 1, %v7368_v30  ;;  %v1482_v23 = vsel %vm1481_vm5, 1, %v7368_v30 }
 0x1c0   :  { %v2086_v34 = vsel %vm2085_vm12, 1, %v7368_v30  ;;  %v2108_v47 = vsel %vm2107_vm0, 1, %v7368_v30  ;;  %v5993_v32 = vshll.u32 %v2182_v20, 8  ;;  %v7369_v55 = vshrl.u32 %v5760_v50, 16 }
 0x1c1   :  { %v2078_v13 = vshrl.u32 %v5898_v10, 16  ;;  %v6001_v18 = vsel %vm2207_vm2, %v2214_v17, %v2216_v57  ;;  %v850_v16 = vshrl.u32 %v5762_v56, 16  ;;  %v1474_v54 = vshrl.u32 %v5886_v49, 16 }
 0x1c2   :  { %v837_v14 = vadd.s32 %v5913_v59, %v7369_v55  ;;  %v6007_v58 = vsel %vm2207_vm2, %v2218_v53, %v2220_v48  ;;  %v1452_v8 = vshrl.u32 %v5820_v25, 16  ;;  %v1462_v50 = vadd.s32 %v1460_v52, %v5911_v61 }
 0x1c3   :  { %v1484_v4 = vadd.s32 %v1482_v23, %v1480_v6  ;;  %v2088_v59 = vadd.s32 %v2086_v34, %v2084_v60  ;;  %v2100_v10 = vshrl.u32 %v5905_v11, 16  ;;  %v2110_v12 = vadd.s32 %v2108_v47, %v2106_v46 }
 0x1c4   :  { %v7370_v29 = vshrl.u32 %v5798_v5, 16  ;;  %v1432_v49 = vsel %vm1428_vm7, %v5721_v27, %v5879_v41  ;;  %v2223_v21 = vand.u32 65535, %v5993_v32  ;;  %v2248_v25 = vshrl.u32 %v6001_v18, 16 }
 0x1c5   :  { %v7371_v61 = vshrl.u32 %v5768_v1, 16  ;;  %v2036_v11 = vshrl.u32 %v7364_v24, %v5746_v33  ;;  %v2226_v5 = vshrl.u32 %v6007_v58, 16  ;;  %v1485_v45 = vadd.s32 %v1484_v4, %v1474_v54 }
 0x1c6   :  { %v859_v3 = vadd.s32 %v5919_v2, %v7370_v29  ;;  %v1476_v2 = vshrl.u32 %v5894_v26, 16  ;;  %v2057_v27 = vsel %vm2055_vm9, %v5824_v31, 2102212464  ;;  %v2080_v41 = vshrl.u32 %v5916_v38, 16  ;;  %v7375_v29 = vld [vmem:[#allocation58_spill] sm:$0xff] }
 0x1c7   :  { %v6023_v20 = vadd.s32 %v837_v14, %v7371_v61  ;;  %v1454_v60 = vshrl.u32 %v5881_v35, 16  ;;  %v1463_v46 = vadd.s32 %v1462_v50, %v1452_v8  ;;  %v2089_v1 = vadd.s32 %v2088_v59, %v2078_v13 }
 0x1c8   :  { %v2102_v17 = vshrl.u32 %v5921_v44, 16  ;;  %v2111_v57 = vadd.s32 %v2110_v12, %v2100_v10  ;;  %v860_v6 = vadd.s32 %v859_v3, %v850_v16  ;;  %v2224_v33 = vshrl.u32 %v5993_v32, 16  ;;  %v7373_v44 = vld [vmem:[#allocation54_spill] sm:$0xff] }
 0x1c9   :  { %v2247_v53 = vand.u32 65535, %v6001_v18  ;;  %v6037_v48 = vmul.u32 %v2248_v25, %v2223_v21  ;;  %v7372_v52 = vshll.u32 %v5762_v56, 16  ;;  %v1433_v35 = vsel %vm1427_vm8, %v5871_v0, %v1432_v49 }
 0x1ca   :  { %v2225_v38 = vand.u32 65535, %v6007_v58  ;;  %v6048_v23 = vmul.u32 %v2226_v5, %v2223_v21  ;;  %v1486_v34 = vadd.s32 %v1485_v45, %v1476_v2  ;;  %v2056_v47 = vsel %vm2052_vm10, %v2036_v11, %v5831_v43 }
 0x1cb   :  { %v6042_v31 = vadd.s32 %v5865_v62, %v7372_v52  ;;  %v2058_v56 = vsel %vm2054_vm11, %v5822_v39, %v2057_v27  ;;  %v6056_v55 = vadd.s32 %v1463_v46, %v1454_v60  ;;  %v6061_v62 = vadd.s32 %v5948_v15, %v1475_v28 }
 0x1cc   :  { %v6063_v63 = vadd.s32 %v2089_v1, %v2080_v41  ;;  %v6068_v0 = vadd.s32 %v5952_v7, %v2101_v22  ;;  %v2112_v14 = vadd.s32 %v2111_v57, %v2102_v17  ;;  %v864_v43 = vadd.s32 1, %v860_v6  ;;  %v7374_v7 = vld [vmem:[#allocation56_spill] sm:$0xff] }
 0x1cd   :  { %v2249_v13 = vmul.u32 %v2247_v53, %v2223_v21  ;;  %v6070_v18 = vmul.u32 %v2247_v53, %v2224_v33  ;;  %v2253_v39 = vshll.u32 %v6037_v48, 16  ;;  %vm863_vm0 = vc.u32 %v6023_v20, %v6042_v31 }
 0x1ce   :  { %v2227_v26 = vmul.u32 %v2225_v38, %v2223_v21  ;;  %v2229_v28 = vmul.u32 %v2225_v38, %v2224_v33  ;;  %v2231_v15 = vshll.u32 %v6048_v23, 16  ;;  %v1490_v16 = vadd.s32 1, %v1486_v34  ;;  %v431_v38 = vpop.f32.mrf.mxu1 }
 0x1cf   :  { %v861_v54 = vmul.u32 %v7373_v44, %v5754_v42  ;;  %vm1489_vm7 = vc.u32 %v6056_v55, %v6061_v62  ;;  %v1487_v22 = vmul.u32 %v7374_v7, %v1433_v35  ;;  %v2059_v58 = vsel %vm2053_vm13, %v2056_v47, %v2058_v56 }
 0x1d0   :  { %v2116_v8 = vadd.s32 1, %v2112_v14  ;;  %v865_v50 = vsel %vm863_vm0, %v864_v43, %v860_v6  ;;  %vm2115_vm8 = vc.u32 %v6063_v63, %v6068_v0  ;;  %v2255_v4 = vshll.u32 %v6070_v18, 16 }
 0x1d1   :  { %vm2257_vm9 = vc.u32 %v2249_v13, %v2253_v39  ;;  %v2259_v59 = vadd.s32 %v2253_v39, %v2249_v13  ;;  %v2233_v10 = vshll.u32 %v2229_v28, 16  ;;  %vm2235_vm10 = vc.u32 %v2227_v26, %v2231_v15  ;;  %v7376_v39 = vld [vmem:[#allocation47_spill] sm:$0xff] }
 0x1d2   :  { %v2237_v42 = vadd.s32 %v2231_v15, %v2227_v26  ;;  %v1491_v12 = vsel %vm1489_vm7, %v1490_v16, %v1486_v34  ;;  %v2113_v3 = vmul.u32 %v7375_v29, %v2059_v58  ;;  %v2252_v49 = vmul.u32 %v2248_v25, %v2224_v33 }
 0x1d3   :  { %v866_v21 = vadd.s32 %v865_v50, %v861_v54  ;;  %v2117_v61 = vsel %vm2115_vm8, %v2116_v8, %v2112_v14  ;;  %v2230_v9 = vmul.u32 %v2226_v5, %v2224_v33  ;;  %v2258_v11 = vsel %vm2257_vm9, 1, %v7368_v30 }
 0x1d4   :  { %v2236_v2 = vsel %vm2235_vm10, 1, %v7368_v30  ;;  %vm2261_vm11 = vc.u32 %v2259_v59, %v2255_v4  ;;  %v1492_v45 = vadd.s32 %v1491_v12, %v1487_v22  ;;  %vm2239_vm13 = vc.u32 %v2237_v42, %v2233_v10 }
 0x1d5   :  { %v2118_v27 = vadd.s32 %v2117_v61, %v2113_v3  ;;  %v2260_v41 = vadd.s32 %v2258_v11, %v2252_v49  ;;  %v867_v60 = vadd.s32 536870912, %v866_v21  ;;  %v2238_v46 = vadd.s32 %v2236_v2, %v2230_v9 }
 0x1d6   :  { %v2262_v1 = vsel %vm2261_vm11, 1, %v7368_v30  ;;  %v2240_v17 = vsel %vm2239_vm13, 1, %v7368_v30  ;;  %v1493_v57 = vadd.s32 536870912, %v1492_v45  ;;  %v2254_v6 = vshrl.u32 %v6037_v48, 16 }
 0x1d7   :  { %v2119_v25 = vadd.s32 536870912, %v2118_v27  ;;  %v2264_v5 = vadd.s32 %v2262_v1, %v2260_v41  ;;  %v6092_v33 = vshrl.u32 %v867_v60, 30  ;;  %v2232_v53 = vshrl.u32 %v6048_v23, 16 }
 0x1d8   :  { %v2242_v52 = vadd.s32 %v2240_v17, %v2238_v46  ;;  %v6095_v35 = vshrl.u32 %v1493_v57, 30  ;;  %v2256_v47 = vshrl.u32 %v6070_v18, 16  ;;  %v2190_v43 = vshrl.u32 %v7364_v24, %v5907_v40 }
 0x1d9   :  { %v6097_v34 = vshrl.u32 %v2119_v25, 30  ;;  %v2265_v56 = vadd.s32 %v2264_v5, %v2254_v6  ;;  %v869_v14 = vshll.u32 %v6092_v33, 30  ;;  %v2234_v48 = vshrl.u32 %v2229_v28, 16 }
 0x1da   :  { %v2243_v13 = vadd.s32 %v2242_v52, %v2232_v53  ;;  %v6104_v26 = vadd.f32 %v7376_v39, %v431_v38  ;;  %v2211_v23 = vsel %vm2209_vm14, %v5959_v51, 2102212464  ;;  %v1495_v15 = vshll.u32 %v6095_v35, 30 }
 0x1db   :  { %v2121_v16 = vshll.u32 %v6097_v34, 30  ;;  %v2266_v18 = vadd.s32 %v2265_v56, %v2256_v47  ;;  %v6111_v44 = vsub.s32 %v866_v21, %v869_v14  ;;  %v2210_v40 = vsel %vm2206_vm3, %v2190_v43, %v5955_v36 }
 0x1dc   :  { %v2212_v28 = vsel %vm2208_vm4, %v5957_v19, %v2211_v23  ;;  %v6119_v54 = vadd.s32 %v2243_v13, %v2234_v48  ;;  %v6121_v7 = vadd.s32 %v2259_v59, %v2255_v4  ;;  %v1551_v51 = vand.u32 2139095040, %v6104_v26 }
 0x1dd   :  { %v6124_v22 = vsub.s32 %v1492_v45, %v1495_v15  ;;  %v2213_v58 = vsel %vm2207_vm2, %v2210_v40, %v2212_v28  ;;  %v2270_v8 = vadd.s32 1, %v2266_v18  ;;  %v872_v50 = vsub.s32 0, %v6111_v44 }
 0x1de   :  { %v6129_v10 = vsub.s32 %v2118_v27, %v2121_v16  ;;  %vm2269_vm14 = vc.u32 %v6119_v54, %v6121_v7  ;;  %vm871_vm15 = vcmp.lt.s32.totalorder %v6111_v44, 0  ;;  %v1552_v36 = vshrl.u32 %v1551_v51, 23 }
 0x1df   :  { %v1498_v19 = vsub.s32 0, %v6124_v22  ;;  %v2267_v4 = vmul.u32 %v5993_v32, %v2213_v58  ;;  %vm1497_vm3 = vcmp.lt.s32.totalorder %v6124_v22, 0  ;;  %v2271_v59 = vsel %vm2269_vm14, %v2270_v8, %v2266_v18 }
 0x1e0   :  { %v873_v37 = vsel %vm871_vm15, %v872_v50, %v6111_v44  ;;  %v2124_v42 = vsub.s32 0, %v6129_v10  ;;  %vm2123_vm2 = vcmp.lt.s32.totalorder %v6129_v10, 0  ;;  %v4413_v12 = vadd.s32 4294967169, %v1552_v36 }
 0x1e1   :  { %v1499_v29 = vsel %vm1497_vm3, %v1498_v19, %v6124_v22  ;;  %v2272_v3 = vadd.s32 %v2271_v59, %v2267_v4  ;;  %v874_v49 = vclz %v873_v37  ;;  %v1548_v52 = vand.u32 2147483647, %v6104_v26 }
 0x1e2   :  { %v2125_v21 = vsel %vm2123_vm2, %v2124_v42, %v6129_v10  ;;  %v1500_v61 = vclz %v1499_v29  ;;  %v1558_v9 = vadd.s32 1, %v4413_v12  ;;  %v862_v47 = vadd.s32 %v6042_v31, %v6023_v20 }
 0x1e3   :  { %v2273_v11 = vadd.s32 536870912, %v2272_v3  ;;  %v4399_v32 = vadd.s32 4294967294, %v874_v49  ;;  %v2126_v2 = vclz %v2125_v21  ;;  %v2114_v43 = vadd.s32 %v6068_v0, %v6063_v63 }
 0x1e4   :  { %v4411_v45 = vadd.s32 4294967294, %v1500_v61  ;;  %vm1559_vm4 = vcmp.gt.s32.totalorder %v1558_v9, 0  ;;  %v1488_v39 = vadd.s32 %v6061_v62, %v6056_v55  ;;  %v1555_v16 = vand.u32 8388607, %v1548_v52 }
 0x1e5   :  { %v6142_v27 = vshrl.u32 %v2273_v11, 30  ;;  %vm4400_vm6 = vcmp.lt.s32.totalorder %v4399_v32, 0  ;;  %v4423_v41 = vadd.s32 4294967294, %v2126_v2  ;;  %v1560_v60 = vsel %vm1559_vm4, %v1558_v9, 0 }
 0x1e6   :  { %vm4412_vm5 = vcmp.lt.s32.totalorder %v4411_v45, 0  ;;  %v877_v46 = vsel %vm4400_vm6, 0, %v4399_v32  ;;  %v1562_v17 = vand.u32 31, %v1560_v60  ;;  %v7377_v18 = vmov 920167782  }
 0x1e7   :  { %v2275_v1 = vshll.u32 %v6142_v27, 30  ;;  %vm4424_vm12 = vcmp.lt.s32.totalorder %v4423_v41, 0  ;;  %v1503_v57 = vsel %vm4412_vm5, 0, %v4411_v45  ;;  %v882_v25 = vsub.s32 4294967266, %v877_v46 }
 0x1e8   :  { %v6145_v6 = vsel %vm4424_vm12, 0, %v4423_v41  ;;  %v1508_v53 = vsub.s32 4294967266, %v1503_v57  ;;  %v6150_v38 = vsub.s32 32, %v1562_v17  ;;  %v878_v56 = vsub.s32 32, %v877_v46 }
 0x1e9   :  { %v6147_v5 = vsub.s32 %v2272_v3, %v2275_v1  ;;  %v883_v14 = vadd.s32 127, %v882_v25  ;;  %v2134_v48 = vsub.s32 4294967266, %v6145_v6  ;;  %v1504_v23 = vsub.s32 32, %v1503_v57 }
 0x1ea   :  { %v1509_v15 = vadd.s32 127, %v1508_v53  ;;  %v1577_v40 = vshll.u32 %v7377_v18, %v1562_v17  ;;  %v7378_v20 = vmov 1326507024   ;;  %v6166_v63 = vshrl.u32 %v1560_v60, 5 }
 0x1eb   :  { %v2278_v13 = vsub.s32 0, %v6147_v5  ;;  %v1578_v31 = vshrl.u32 %v7378_v20, %v6150_v38  ;;  %vm2277_vm0 = vcmp.lt.s32.totalorder %v6147_v5, 0  ;;  %v879_v0 = vshll.u32 %v6111_v44, %v877_v46 }
 0x1ec   :  { %v880_v28 = vshrl.u32 %v862_v47, %v878_v56  ;;  %v884_v51 = vshll.u32 %v883_v14, 23  ;;  %v7379_v58 = vmov 2475754826   ;;  %v7380_v62 = vmov 2131351028  }
 0x1ed   :  { %v1568_v55 = vshll.u32 %v7379_v58, %v1562_v17  ;;  %v1569_v8 = vshrl.u32 %v7380_v62, %v6150_v38  ;;  %v1571_v50 = vshll.u32 %v7380_v62, %v1562_v17  ;;  %v7381_v36 = vmov 2102212464  }
 0x1ee   :  { %v1572_v19 = vshrl.u32 %v7381_v36, %v6150_v38  ;;  %v2279_v4 = vsel %vm2277_vm0, %v2278_v13, %v6147_v5  ;;  %v1505_v59 = vshll.u32 %v6124_v22, %v1503_v57  ;;  %v1506_v37 = vshrl.u32 %v1488_v39, %v1504_v23  ;;  %v6206_v39 = vpop.f32.mrf.mxu3 }
 0x1ef   :  { %v1510_v42 = vshll.u32 %v1509_v15, 23  ;;  %v2130_v44 = vsub.s32 32, %v6145_v6  ;;  %v2131_v12 = vshll.u32 %v6129_v10, %v6145_v6  ;;  %v1574_v29 = vshll.u32 %v7381_v36, %v1562_v17 }
 0x1f0   :  { %v1579_v3 = vor.u32 %v1578_v31, %v1577_v40  ;;  %v1575_v49 = vshrl.u32 %v7377_v18, %v6150_v38  ;;  %vm1583_vm7 = vcmp.lt.s32.totalorder %v6166_v63, 4  ;;  %v881_v21 = vor.u32 %v880_v28, %v879_v0 }
 0x1f1   :  { %v885_v61 = vor.u32 4788187, %v884_v51  ;;  %v2135_v9 = vadd.s32 127, %v2134_v48  ;;  %v1556_v11 = vor.u32 8388608, %v1555_v16  ;;  %v1565_v22 = vshll.u32 %v7364_v24, %v1562_v17 }
 0x1f2   :  { %v2280_v32 = vclz %v2279_v4  ;;  %v6185_v2 = vor.u32 %v1569_v8, %v1568_v55  ;;  %v6187_v45 = vor.u32 %v1572_v19, %v1571_v50  ;;  %v1507_v10 = vor.u32 %v1506_v37, %v1505_v59  ;;  %v7382_v4 = vld [vmem:[#allocation48_spill] sm:$0xff] }
 0x1f3   :  { %v1511_v41 = vor.u32 4788187, %v1510_v42  ;;  %v1566_v60 = vshrl.u32 %v7379_v58, %v6150_v38  ;;  %vm1580_vm8 = vcmp.lt.s32.totalorder %v6166_v63, 1  ;;  %vm1582_vm9 = vcmp.lt.s32.totalorder %v6166_v63, 3 }
 0x1f4   :  { %v1593_v46 = vsel %vm1583_vm7, %v1579_v3, 1326507024  ;;  %v2132_v1 = vshrl.u32 %v2114_v43, %v2130_v44  ;;  %v1576_v57 = vor.u32 %v1575_v49, %v1574_v29  ;;  %v886_v17 = vand.u32 2147483647, %v885_v61  ;;  %v7383_v44 = vld [vmem:[#allocation49_spill] sm:$0xff] }
 0x1f5   :  { %v888_v25 = vcvt.s32.f32 %v881_v21  ;;  %v2136_v6 = vshll.u32 %v2135_v9, 23  ;;  %vm1581_vm10 = vcmp.lt.s32.totalorder %v6166_v63, 2  ;;  %v4426_v53 = vadd.s32 4294967294, %v2280_v32 }
 0x1f6   :  { %v1592_v47 = vsel %vm1580_vm8, %v6185_v2, %v6187_v45  ;;  %v1594_v56 = vsel %vm1582_vm9, %v1576_v57, %v1593_v46  ;;  %v1512_v14 = vand.u32 2147483647, %v1511_v41  ;;  %v1514_v48 = vcvt.s32.f32 %v1507_v10 }
 0x1f7   :  { %v6202_v13 = vor.u32 %v1566_v60, %v1565_v22  ;;  %v6204_v43 = vshll.u32 %v1556_v11, 8  ;;  %v2133_v23 = vor.u32 %v2132_v1, %v2131_v12  ;;  %v889_v15 = vmul.f32 %v888_v25, %v886_v17  ;;  %v4552_v22 = vld [vmem:[#allocation28] ss:$0 sm:$0xff] }
 0x1f8   :  { %v2137_v16 = vor.u32 4788187, %v2136_v6  ;;  %v1589_v40 = vsel %vm1583_vm7, %v1576_v57, 920167782  ;;  %v1595_v31 = vsel %vm1581_vm10, %v1592_v47, %v1594_v56  ;;  %vm4427_vm11 = vcmp.lt.s32.totalorder %v4426_v53, 0 }
 0x1f9   :  { %v1515_v0 = vmul.f32 %v1514_v48, %v1512_v14  ;;  %v1588_v28 = vsel %vm1580_vm8, %v6202_v13, %v6185_v2  ;;  %v1597_v51 = vand.u32 65535, %v6204_v43  ;;  %v1590_v55 = vsel %vm1582_vm9, %v6187_v45, %v1589_v40  ;;  %v7390_v14 = vld [vmem:[#allocation51_spill] sm:$0xff] }
 0x1fa   :  { %v1600_v8 = vshrl.u32 %v1595_v31, 16  ;;  %v2283_v50 = vsel %vm4427_vm11, 0, %v4426_v53  ;;  %v890_v19 = vxor.u32 2147483648, %v889_v15  ;;  %vm770_vm13 = vcmp.lt.s32.totalorder %v7382_v4, 0 }
 0x1fb   :  { %v2138_v59 = vand.u32 2147483647, %v2137_v16  ;;  %v2140_v37 = vcvt.s32.f32 %v2133_v23  ;;  %v1516_v42 = vxor.u32 2147483648, %v1515_v0  ;;  %vm1396_vm14 = vcmp.lt.s32.totalorder %v7383_v44, 0 }
 0x1fc   :  { %v1591_v12 = vsel %vm1581_vm10, %v1588_v28, %v1590_v55  ;;  %v2288_v29 = vsub.s32 4294967266, %v2283_v50  ;;  %v1599_v3 = vand.u32 65535, %v1595_v31  ;;  %v6224_v49 = vmul.u32 %v1600_v8, %v1597_v51 }
 0x1fd   :  { %v7384_v21 = vand.u32 2147483647, %v7382_v4  ;;  %v891_v9 = vsel %vm770_vm13, %v890_v19, %v889_v15  ;;  %v2141_v11 = vmul.f32 %v2140_v37, %v2138_v59  ;;  %v1622_v10 = vshrl.u32 %v1591_v12, 16 }
 0x1fe   :  { %v7387_v41 = vand.u32 2147483647, %v7383_v44  ;;  %v1517_v46 = vsel %vm1396_vm14, %v1516_v42, %v1515_v0  ;;  %v2268_v1 = vadd.s32 %v6121_v7, %v6119_v54  ;;  %v2284_v57 = vsub.s32 32, %v2283_v50 }
 0x1ff   :  { %vm6228_vm15 = vcmp.le.f32.partialorder %v7384_v21, 0.7853982  ;;  %v2289_v17 = vadd.s32 127, %v2288_v29  ;;  %v1598_v6 = vshrl.u32 %v6204_v43, 16  ;;  %v1601_v53 = vmul.u32 %v1599_v3, %v1597_v51 }
 0x200   :  { %vm6236_vm3 = vcmp.le.f32.partialorder %v7387_v41, 0.7853982  ;;  %v6247_v25 = vsel %vm6228_vm15, %v7382_v4, %v891_v9  ;;  %v1605_v47 = vshll.u32 %v6224_v49, 16  ;;  %vm2022_vm2 = vcmp.lt.s32.totalorder %v7390_v14, 0 }
 0x201   :  { %v2142_v48 = vxor.u32 2147483648, %v2141_v11  ;;  %v6255_v54 = vsel %vm6236_vm3, %v7383_v44, %v1517_v46  ;;  %v1621_v7 = vand.u32 65535, %v1591_v12  ;;  %v6257_v23 = vmul.u32 %v1622_v10, %v1597_v51 }
 0x202   :  { %v6261_v15 = vmul.f32 %v6247_v25, %v6247_v25  ;;  %vm3376_vm4 = vcmask 1043456   ;;  %v2285_v16 = vshll.u32 %v6147_v5, %v2283_v50  ;;  %v2286_v40 = vshrl.u32 %v2268_v1, %v2284_v57 }
 0x203   :  { %v2290_v31 = vshll.u32 %v2289_v17, 23  ;;  %v1603_v28 = vmul.u32 %v1599_v3, %v1598_v6  ;;  %vm1609_vm6 = vc.u32 %v1601_v53, %v1605_v47  ;;  %v6268_v55 = vmul.f32 %v6255_v54, %v6255_v54 }
 0x204   :  { %v7391_v19 = vand.u32 2147483647, %v7390_v14  ;;  %v2143_v5 = vsel %vm2022_vm2, %v2142_v48, %v2141_v11  ;;  %v1604_v50 = vmul.u32 %v1600_v8, %v1598_v6  ;;  %v1623_v42 = vmul.u32 %v1621_v7, %v1597_v51 }
 0x205   :  { %v1627_v12 = vshll.u32 %v6257_v23, 16  ;;  %v1610_v29 = vsel %vm1609_vm6, 1, %v7368_v30  ;;  %v2287_v3 = vor.u32 %v2286_v40, %v2285_v16  ;;  %v2291_v21 = vor.u32 4788187, %v2290_v31 }
 0x206   :  { %vm6272_vm5 = vcmp.le.f32.partialorder %v7391_v19, 0.7853982  ;;  %v904_v9 = vmul.f32 -0.00019511016, %v6261_v15  ;;  %v1625_v41 = vmul.u32 %v1621_v7, %v1598_v6  ;;  %v1530_v46 = vmul.f32 -0.00019511016, %v6268_v55 }
 0x207   :  { %v6287_v11 = vsel %vm6272_vm5, %v7390_v14, %v2143_v5  ;;  %v1564_v51 = vshrl.u32 %v7364_v24, %v6150_v38  ;;  %v1585_v8 = vsel %vm1583_vm7, %v6187_v45, 2102212464  ;;  %v1612_v1 = vadd.s32 %v1610_v29, %v1604_v50 }
 0x208   :  { %v1626_v57 = vmul.u32 %v1622_v10, %v1598_v6  ;;  %v897_v17 = vmul.f32 -0.001358992, %v6261_v15  ;;  %vm1631_vm12 = vc.u32 %v1623_v42, %v1627_v12  ;;  %v1523_v48 = vmul.f32 -0.001358992, %v6268_v55 }
 0x209   :  { %v1531_v7 = vadd.f32 0.008332121, %v1530_v46  ;;  %v1606_v16 = vshrl.u32 %v6224_v49, 16  ;;  %v1629_v40 = vshll.u32 %v1625_v41, 16  ;;  %v1584_v38 = vsel %vm1580_vm8, %v1564_v51, %v6202_v13 }
 0x20a   :  { %v761_v32 = vpop.f32.mrf.mxu3  ;;  %v1586_v45 = vsel %vm1582_vm9, %v6185_v2, %v1585_v8  ;;  %v1632_v6 = vsel %vm1631_vm12, 1, %v7368_v30  ;;  %v898_v31 = vadd.f32 0.041655596, %v897_v17  ;;  %v1524_v29 = vadd.f32 0.041655596, %v1523_v48 }
 0x20b   :  { %v762_v56 = vadd.f32 %v4552_v22, %v761_v32  ;;  %v1607_v22 = vshll.u32 %v1603_v28, 16  ;;  %v1611_v32 = vadd.s32 %v1605_v47, %v1601_v53  ;;  %v2292_v53 = vand.u32 2147483647, %v2291_v21 }
 0x20c   :  { %v2294_v47 = vcvt.s32.f32 %v2287_v3  ;;  %v1634_v5 = vadd.s32 %v1632_v6, %v1626_v57  ;;  %v1608_v3 = vshrl.u32 %v1603_v28, 16  ;;  %v1532_v21 = vmul.f32 %v1531_v7, %v6268_v55 }
 0x20d   :  { %v6264_v0 = vpack.c.bf16 %v762_v56, %v762_v56  ;;  %v905_v56 = vadd.f32 0.008332121, %v904_v9  ;;  %vm1613_vm0 = vc.u32 %v1611_v32, %v1607_v22  ;;  %v1628_v9 = vshrl.u32 %v6257_v23, 16 }
 0x20e   :  { %v1614_v10 = vsel %vm1613_vm0, 1, %v7368_v30  ;;  %v2295_v50 = vmul.f32 %v2294_v47, %v2292_v53  ;;  %v6311_v22 = vmul.f32 %v6287_v11, %v6287_v11  ;;  %v899_v46 = vmul.f32 %v898_v31, %v6261_v15  ;;  %v7394_v53 = vld [vmem:[#allocation57_spill] sm:$0xff] }
 0x20f   :  { %v3378_v37 = vsel %vm3376_vm4, %v6264_v0, 0  ;;  %v1616_v19 = vadd.s32 %v1614_v10, %v1612_v1  ;;  %v906_v49 = vmul.f32 %v905_v56, %v6261_v15  ;;  %v1525_v1 = vmul.f32 %v1524_v29, %v6268_v55 }
 0x210   :  { %3387 = vmatpush.bf16.msra.mxu2 %v3378_v37  ;;  %v1633_v37 = vadd.s32 %v1627_v12, %v1623_v42  ;;  %v1587_v42 = vsel %vm1581_vm10, %v1584_v38, %v1586_v45  ;;  %v1630_v12 = vshrl.u32 %v1625_v41, 16  ;;  %v2296_v23 = vxor.u32 2147483648, %v2295_v50 }
 0x211   :  { %v1617_v13 = vadd.s32 %v1616_v19, %v1606_v16  ;;  %v907_v28 = vadd.f32 -0.16666654, %v906_v49  ;;  %v1533_v57 = vadd.f32 -0.16666654, %v1532_v21  ;;  %vm2176_vm8 = vcmp.lt.s32.totalorder %v7394_v53, 0 }
 0x212   :  { %vm1635_vm7 = vc.u32 %v1633_v37, %v1629_v40  ;;  %v6318_v8 = vadd.s32 %v1633_v37, %v1629_v40  ;;  %v2156_v47 = vmul.f32 -0.00019511016, %v6311_v22  ;;  %v7395_v63 = vand.u32 2147483647, %v7394_v53 }
 0x213   :  { %v1636_v2 = vsel %vm1635_vm7, 1, %v7368_v30  ;;  %v6316_v51 = vadd.s32 %v1617_v13, %v1608_v3  ;;  %v892_v56 = vsub.s32 4, %v6092_v33  ;;  %v1641_v7 = vmul.u32 %v6204_v43, %v1587_v42 }
 0x214   :  { %v1638_v32 = vadd.s32 %v1636_v2, %v1634_v5  ;;  %vm6325_vm9 = vcmp.le.f32.partialorder %v7395_v63, 0.7853982  ;;  %v900_v16 = vadd.f32 -0.4999988, %v899_v46  ;;  %v908_v40 = vmul.f32 %v907_v28, %v6261_v15 }
 0x215   :  { %vm1643_vm10 = vc.u32 %v6316_v51, %v6318_v8  ;;  %v2297_v38 = vsel %vm2176_vm8, %v2296_v23, %v2295_v50  ;;  %v1526_v45 = vadd.f32 -0.4999988, %v1525_v1  ;;  %v1534_v10 = vmul.f32 %v1533_v57, %v6268_v55 }
 0x216   :  { %v1639_v17 = vadd.s32 %v1638_v32, %v1628_v9  ;;  %v1518_v31 = vsub.s32 4, %v6095_v35  ;;  %v2157_v19 = vadd.f32 0.008332121, %v2156_v47  ;;  %v893_v43 = vsel %vm770_vm13, %v892_v56, %v6092_v33 }
 0x217   :  { %v6344_v5 = vsel %vm6325_vm9, %v7394_v53, %v2297_v38  ;;  %v901_v49 = vmul.f32 %v900_v16, %v6261_v15  ;;  %v909_v50 = vadd.f32 1.0, %v908_v40  ;;  %v1527_v3 = vmul.f32 %v1526_v45, %v6268_v55 }
 0x218   :  { %v1640_v48 = vadd.s32 %v1639_v17, %v1630_v12  ;;  %v1535_v21 = vadd.f32 1.0, %v1534_v10  ;;  %v2149_v13 = vmul.f32 -0.001358992, %v6311_v22  ;;  %v1519_v9 = vsel %vm1396_vm14, %v1518_v31, %v6095_v35  ;;  %v6359_v12 = vpop.f32.mrf.mxu0  ;;  %v4549_v10 = vld [vmem:[#allocation14] ss:$0 sm:$0xff] }
 0x219   :  { %v2158_v2 = vmul.f32 %v2157_v19, %v6311_v22  ;;  %v6355_v42 = vmul.f32 %v6344_v5, %v6344_v5  ;;  %v895_v15 = vsel %vm6228_vm15, 0, %v893_v43  ;;  %v6361_v55 = vadd.f32 1.0, %v901_v49  ;;  %v617_v49 = vpop.f32.mrf.mxu1 }
 0x21a   :  { %v1644_v6 = vadd.s32 1, %v1640_v48  ;;  %v6364_v32 = vmul.f32 %v909_v50, %v6247_v25  ;;  %v912_v46 = vand.u32 3, %v895_v15  ;;  %v6370_v35 = vsel %vm6236_vm3, 0, %v1519_v9 }
 0x21b   :  { %v6372_v23 = vadd.f32 1.0, %v1527_v3  ;;  %v6375_v1 = vmul.f32 %v1535_v21, %v6255_v54  ;;  %v2150_v61 = vadd.f32 0.041655596, %v2149_v13  ;;  %v1538_v57 = vand.u32 3, %v6370_v35 }
 0x21c   :  { %v1645_v37 = vsel %vm1643_vm10, %v1644_v6, %v1640_v48  ;;  %v2159_v47 = vadd.f32 -0.16666654, %v2158_v2  ;;  %v2310_v25 = vmul.f32 -0.00019511016, %v6355_v42  ;;  %vm914_vm11 = vcmp.eq.s32.totalorder %v912_v46, 0 }
 0x21d   :  { %v1646_v29 = vadd.s32 %v1645_v37, %v1641_v7  ;;  %v915_v63 = vxor.u32 2147483648, %v6364_v32  ;;  %v918_v60 = vxor.u32 2147483648, %v6361_v55  ;;  %vm917_vm13 = vcmp.eq.s32.totalorder %v912_v46, 2  ;;  %v6395_v37 = vld [vmem:[#allocation17] ss:$0 sm:$0xff] }
 0x21e   :  { %v1541_v48 = vxor.u32 2147483648, %v6375_v1  ;;  %v1544_v54 = vxor.u32 2147483648, %v6372_v23  ;;  %v2151_v7 = vmul.f32 %v2150_v61, %v6311_v22  ;;  %v1224_v16 = vadd.s32 3, %v895_v15 }
 0x21f   :  { %v1647_v33 = vadd.s32 536870912, %v1646_v29  ;;  %vm1540_vm14 = vcmp.eq.s32.totalorder %v1538_v57, 0  ;;  %vm1543_vm15 = vcmp.eq.s32.totalorder %v1538_v57, 2  ;;  %v2144_v40 = vsub.s32 4, %v6097_v34 }
 0x220   :  { %v2160_v38 = vmul.f32 %v2159_v47, %v6311_v22  ;;  %v2311_v45 = vadd.f32 0.008332121, %v2310_v25  ;;  %v583_v31 = vpop.f32.mrf.mxu0  ;;  %vm913_vm6 = vcmp.lt.s32.totalorder %v912_v46, 2  ;;  %v916_v19 = vsel %vm914_vm11, %v6361_v55, %v915_v63 }
 0x221   :  { %v6366_v28 = vshrl.u32 %v1647_v33, 30  ;;  %v919_v43 = vsel %vm917_vm13, %v918_v60, %v6364_v32  ;;  %vm1539_vm12 = vcmp.lt.s32.totalorder %v1538_v57, 2  ;;  %v1542_v50 = vsel %vm1540_vm14, %v6372_v23, %v1541_v48 }
 0x222   :  { %v2152_v3 = vadd.f32 -0.4999988, %v2151_v7  ;;  %v1225_v13 = vand.u32 3, %v1224_v16  ;;  %v2312_v33 = vmul.f32 %v2311_v45, %v6355_v42  ;;  %v6407_v2 = vadd.f32 %v4549_v10, %v583_v31 }
 0x223   :  { %v1649_v17 = vshll.u32 %v6366_v28, 30  ;;  %vm911_vm0 = vweird.f32 %v7382_v4  ;;  %v920_v15 = vsel %vm913_vm6, %v916_v19, %v919_v43  ;;  %v6411_v46 = vadd.f32 %v6395_v37, %v617_v49 }
 0x224   :  { %vm1537_vm7 = vweird.f32 %v7383_v44  ;;  %v2161_v47 = vadd.f32 1.0, %v2160_v38  ;;  %v2153_v25 = vmul.f32 %v2152_v3, %v6311_v22  ;;  %vm1227_vm10 = vcmp.eq.s32.totalorder %v1225_v13, 0 }
 0x225   :  { %v6382_v56 = vsub.s32 %v1646_v29, %v1649_v17  ;;  %v1545_v29 = vsel %vm1543_vm15, %v1544_v54, %v6375_v1  ;;  %v2145_v17 = vsel %vm2022_vm2, %v2144_v40, %v6097_v34  ;;  %vm1230_vm11 = vcmp.eq.s32.totalorder %v1225_v13, 2 }
 0x226   :  { %v1546_v61 = vsel %vm1539_vm12, %v1542_v50, %v1545_v29  ;;  %v1642_v7 = vadd.s32 %v6318_v8, %v6316_v51  ;;  %v2313_v16 = vadd.f32 -0.16666654, %v2312_v33  ;;  %v921_v45 = vsel %vm911_vm0, nan, %v920_v15 }
 0x227   :  { %vm1651_vm3 = vcmp.lt.s32.totalorder %v6382_v56, 0  ;;  %v1652_v6 = vsub.s32 0, %v6382_v56  ;;  %v1547_v10 = vsel %vm1537_vm7, nan, %v1546_v61  ;;  %v1076_v31 = vmul.f32 %v921_v45, %v6407_v2 }
 0x228   :  { %v1702_v34 = vmul.f32 %v1547_v10, %v6411_v46  ;;  %v2147_v38 = vsel %vm6272_vm5, 0, %v2145_v17  ;;  %v6430_v51 = vmul.f32 %v2161_v47, %v6287_v11  ;;  %v6432_v8 = vadd.f32 1.0, %v2153_v25  ;;  %v4551_v10 = vld [vmem:[#allocation22] ss:$0 sm:$0xff] }
 0x229   :  { %v1653_v21 = vsel %vm1651_vm3, %v1652_v6, %v6382_v56  ;;  %v2298_v43 = vsub.s32 4, %v6142_v27  ;;  %vm1226_vm2 = vcmp.lt.s32.totalorder %v1225_v13, 2  ;;  %v2164_v49 = vand.u32 3, %v2147_v38 }
 0x22a   :  { %v1654_v9 = vclz %v1653_v21  ;;  %v2314_v29 = vmul.f32 %v2313_v16, %v6355_v42  ;;  %v1229_v3 = vsel %vm1227_vm10, %v6361_v55, %v915_v63  ;;  %v1232_v59 = vsel %vm1230_vm11, %v918_v60, %v6364_v32 }
 0x22b   :  { %v6440_v21 = vpack.c.bf16 %v1076_v31, %v1076_v31  ;;  %v6442_v11 = vpack.c.bf16 %v1702_v34, %v1702_v34  ;;  %v2167_v15 = vxor.u32 2147483648, %v6430_v51  ;;  %v2170_v61 = vxor.u32 2147483648, %v6432_v8 }
 0x22c   :  { %v4414_v57 = vadd.s32 4294967294, %v1654_v9  ;;  %v2476_v9 = vadd.s32 3, %v2147_v38  ;;  %v2303_v17 = vmul.f32 -0.001358992, %v6355_v42  ;;  %vm1550_vm5 = vcmp.lt.s32.totalorder %v6104_v26, 0 }
 0x22d   :  { %v2299_v55 = vsel %vm2176_vm8, %v2298_v43, %v6142_v27  ;;  %vm2166_vm14 = vcmp.eq.s32.totalorder %v2164_v49, 0  ;;  %vm2169_vm15 = vcmp.eq.s32.totalorder %v2164_v49, 2  ;;  %v2315_v32 = vadd.f32 1.0, %v2314_v29 }
 0x22e   :  { %vm4415_vm13 = vcmp.lt.s32.totalorder %v4414_v57, 0  ;;  %v1233_v63 = vsel %vm1226_vm2, %v1229_v3, %v1232_v59  ;;  %v2477_v25 = vand.u32 3, %v2476_v9  ;;  %v3417_v16 = vunpack.c.l.b16 %v6440_v21 }
 0x22f   :  { %v1657_v6 = vsel %vm4415_vm13, 0, %v4414_v57  ;;  %v2304_v45 = vadd.f32 0.041655596, %v2303_v17  ;;  %vm2165_vm3 = vcmp.lt.s32.totalorder %v2164_v49, 2  ;;  %v2168_v31 = vsel %vm2166_vm14, %v6432_v8, %v2167_v15 }
 0x230   :  { %v1658_v40 = vsub.s32 32, %v1657_v6  ;;  %v1659_v22 = vshll.u32 %v6382_v56, %v1657_v6  ;;  %v1662_v19 = vsub.s32 4294967266, %v1657_v6  ;;  %v711_v6 = vpop.f32.mrf.mxu2  ;;  %v2171_v27 = vsel %vm2169_vm15, %v2170_v61, %v6430_v51 }
 0x231   :  { %v6458_v13 = vsel %vm6325_vm9, 0, %v2299_v55  ;;  %v6463_v38 = vpack.c.b16 %v3417_v16, %v3417_v16  ;;  %v1234_v43 = vsel %vm911_vm0, nan, %v1233_v63  ;;  %vm2163_vm8 = vweird.f32 %v7390_v14 }
 0x232   :  { %v1660_v50 = vshrl.u32 %v1642_v7, %v1658_v40  ;;  %v1663_v56 = vadd.s32 127, %v1662_v19  ;;  %v3302_v7 = vunpack.c.l.b16 %v6442_v11  ;;  %v1850_v40 = vadd.s32 3, %v6370_v35 }
 0x233   :  { %v6466_v19 = vmul.f32 %v2315_v32, %v6344_v5  ;;  %vm2479_vm6 = vcmp.eq.s32.totalorder %v2477_v25, 0  ;;  %v1672_v41 = vsub.s32 4, %v6366_v28  ;;  %3419 = vrot.lane.b32.xlu1 %v6463_v38, %s5164_s19  ;;  %v2305_v5 = vmul.f32 %v2304_v45, %v6355_v42 }
 0x234   :  { %v1661_v33 = vor.u32 %v1660_v50, %v1659_v22  ;;  %v1664_v57 = vshll.u32 %v1663_v56, 23  ;;  %v6461_v22 = vpack.c.b16 %v3302_v7, %v3302_v7  ;;  %v2172_v50 = vsel %vm2165_vm3, %v2168_v31, %v2171_v27 }
 0x235   :  { %v712_v35 = vadd.f32 %v4551_v10, %v711_v6  ;;  %vm6479_vm9 = vcmp.le.f32.partialorder %v1548_v52, 0.7853982  ;;  %v2631_v3 = vadd.s32 3, %v6458_v13  ;;  %v1851_v59 = vand.u32 3, %v1850_v40 }
 0x236   :  { %v1665_v60 = vor.u32 4788187, %v1664_v57  ;;  %v1668_v47 = vcvt.s32.f32 %v1661_v33  ;;  %3421 = vrot.lane.b32.xlu0 %v6461_v22, %s5161_s16  ;;  %vm2478_vm12 = vcmp.lt.s32.totalorder %v2477_v25, 2  ;;  %vm2482_vm0 = vcmp.eq.s32.totalorder %v2477_v25, 2 }
 0x237   :  { %v2306_v56 = vadd.f32 -0.4999988, %v2305_v5  ;;  %v2173_v9 = vsel %vm2163_vm8, nan, %v2172_v50  ;;  %v2481_v33 = vsel %vm2479_vm6, %v6432_v8, %v2167_v15  ;;  %v2632_v17 = vand.u32 3, %v2631_v3 }
 0x238   :  { %v1666_v34 = vand.u32 2147483647, %v1665_v60  ;;  %v1390_v52 = vmul.f32 %v1234_v43, %v6407_v2  ;;  %v1673_v55 = vsel %vm1550_vm5, %v1672_v41, %v6366_v28  ;;  %v2328_v60 = vmul.f32 %v2173_v9, %v712_v35  ;;  %v713_v45 = vpop.f32.mrf.mxu2 }
 0x239   :  { %v2307_v63 = vmul.f32 %v2306_v56, %v6355_v42  ;;  %v7313_v15 = vxor.u32 2147483648, %v6466_v19  ;;  %vm1853_vm10 = vcmp.eq.s32.totalorder %v1851_v59, 0  ;;  %vm1856_vm11 = vcmp.eq.s32.totalorder %v1851_v59, 2 }
 0x23a   :  { %v1669_v49 = vmul.f32 %v1668_v47, %v1666_v34  ;;  %v2484_v47 = vsel %vm2482_vm0, %v2170_v61, %v6430_v51  ;;  %vm2634_vm13 = vcmp.eq.s32.totalorder %v2632_v17, 0  ;;  %v6503_v28 = vsel %vm6479_vm9, 0, %v1673_v55 }
 0x23b   :  { %v6499_v7 = vadd.f32 1.0, %v2307_v63  ;;  %vm2637_vm2 = vcmp.eq.s32.totalorder %v2632_v17, 2  ;;  %v6505_v42 = vpack.c.bf16 %v1390_v52, %v1390_v52  ;;  %v2485_v51 = vsel %vm2478_vm12, %v2481_v33, %v2484_v47  ;;  %v619_v63 = vpop.f32.mrf.mxu1 }
 0x23c   :  { %v1670_v29 = vxor.u32 2147483648, %v1669_v49  ;;  %v6511_v6 = vpack.c.bf16 %v2328_v60, %v2328_v60  ;;  %v2005_v40 = vadd.s32 3, %v6503_v28  ;;  %v6517_v43 = vadd.f32 %v4551_v10, %v713_v45 }
 0x23d   :  { %v7312_v61 = vxor.u32 2147483648, %v6499_v7  ;;  %v2636_v34 = vsel %vm2634_vm13, %v6499_v7, %v7313_v15  ;;  %vm2317_vm14 = vweird.f32 %v7394_v53  ;;  %vm1852_vm15 = vcmp.lt.s32.totalorder %v1851_v59, 2 }
 0x23e   :  { %v1671_v57 = vsel %vm1550_vm5, %v1670_v29, %v1669_v49  ;;  %vm2633_vm5 = vcmp.lt.s32.totalorder %v2632_v17, 2  ;;  %3304 = vrot.lane.b32.xlu0 %v6461_v22, %s5162_s26  ;;  %v2486_v49 = vsel %vm2163_vm8, nan, %v2485_v51  ;;  %v1858_v4 = vsel %vm1856_vm11, %v1544_v54, %v6375_v1 }
 0x23f   :  { %v1674_v32 = vsel %vm6479_vm9, %v6104_v26, %v1671_v57  ;;  %v2639_v25 = vsel %vm2637_vm2, %v7312_v61, %v6466_v19  ;;  %v2642_v10 = vmul.f32 %v2486_v49, %v712_v35  ;;  %v1855_v29 = vsel %vm1853_vm10, %v6372_v23, %v1541_v48  ;;  %v6594_v49 = vld [vmem:[%s7259_s24] sm:$0xff]  ;;  %s5166_s24 = smov 104  }
 0x240   :  { %v1676_v8 = vmul.f32 %v1674_v32, %v1674_v32  ;;  %v2640_v5 = vsel %vm2633_vm5, %v2636_v34, %v2639_v25  ;;  %v2006_v9 = vand.u32 3, %v2005_v40  ;;  %v3433_v57 = vunpack.c.l.b16 %v6511_v6  ;;  %4451 = vmatpush.msk.msra.mxu3 %vm376_vm1, %v6594_v49 }
 0x241   :  { %v2641_v14 = vsel %vm2317_vm14, nan, %v2640_v5  ;;  %v3297_v17 = vunpack.c.l.b16 %v6505_v42  ;;  %v1859_v52 = vsel %vm1852_vm15, %v1855_v29, %v1858_v4  ;;  %v2644_v23 = vpack.c.bf16 %v2642_v10, %v2642_v10  ;;  %v3438_v5 = vpop.permute.xlu0 %3437  ;;  %v3440_v4 = vpop.permute.xlu1 %3439 }
 0x242   :  { %v1677_v2 = vmul.f32 -0.001358992, %v1676_v8  ;;  %v1684_v16 = vmul.f32 -0.00019511016, %v1676_v8  ;;  %v6536_v33 = vmul.f32 %v2641_v14, %v6517_v43  ;;  %vm2011_vm3 = vcmp.eq.s32.totalorder %v2006_v9, 2 }
 0x243   :  { %v6542_v48 = vpack.c.b16 %v3433_v57, %v3433_v57  ;;  %v6544_v55 = vpack.c.b16 %v3297_v17, %v3297_v17  ;;  %vm2008_vm8 = vcmp.eq.s32.totalorder %v2006_v9, 0  ;;  %vm2007_vm6 = vcmp.lt.s32.totalorder %v2006_v9, 2 }
 0x244   :  { %v1678_v31 = vadd.f32 0.041655596, %v1677_v2  ;;  %v1685_v27 = vadd.f32 0.008332121, %v1684_v16  ;;  %v6561_v45 = vadd.f32 %v6395_v37, %v619_v63  ;;  %vm1691_vm9 = vweird.f32 %v6104_v26 }
 0x245   :  { %3435 = vrot.lane.b32.xlu2 %v6542_v48, %s5164_s19  ;;  %3299 = vrot.lane.b32.xlu1 %v6544_v55, %s5161_s16  ;;  %v3322_v51 = vunpack.c.l.b16 %v2644_v23  ;;  %vm3311_vm12 = vcmask 64512   ;;  %vm3315_vm0 = vcmask 130048   ;;  %vm3318_vm10 = vcmask 195584  }
 0x246   :  { %v1679_v50 = vmul.f32 %v1678_v31, %v1676_v8  ;;  %v1686_v41 = vmul.f32 %v1685_v27, %v1676_v8  ;;  %vm7401_vm11 = vcmask 261120  }
 0x247   :  { %vm7402_vm13 = vmmov %vm7401_vm11 }
 0x248   :  { %v1680_v3 = vadd.f32 -0.4999988, %v1679_v50  ;;  %v1687_v56 = vadd.f32 -0.16666654, %v1686_v41  ;;  %v6601_v50 = vld [vmem:[%s7341_s11] sm:$0xff]  ;;  %v3335_v41 = vpop.permute.xlu2 %3334  ;;  %vm7403_vm2 = vmmov %vm7401_vm11 }
 0x249   :  { %vm7404_vm5 = vmmov %vm7403_vm2 }
 0x24a   :  { %v1681_v54 = vmul.f32 %v1680_v3, %v1676_v8  ;;  %v1688_v35 = vmul.f32 %v1687_v56, %v1676_v8  ;;  %v1860_v8 = vsel %vm1537_vm7, nan, %v1859_v52  ;;  %vm7400_vm7 = vcmask 15360   ;;  %v3330_v56 = vpop.permute.xlu0 %3329 }
 0x24b   :  { %v2016_v16 = vmul.f32 %v1860_v8, %v6411_v46  ;;  %v6574_v46 = vpack.c.b16 %v3322_v51, %v3322_v51  ;;  %4452 = vmatmul.msk.f32.vlgmr.msra.gmra.mxu3 %vm7400_vm7, %v6601_v50  ;;  %v7308_v52 = vrot.slane %v6594_v49, 2  ;;  %vm7405_vm15 = vmmov %vm7400_vm7 }
 0x24c   :  { %v6540_v1 = vadd.f32 1.0, %v1681_v54  ;;  %v1689_v59 = vadd.f32 1.0, %v1688_v35 }
 0x24d   :  { %v6569_v34 = vpack.c.bf16 %v2016_v16, %v2016_v16  ;;  %3324 = vrot.lane.b32.xlu2 %v6574_v46, %s5161_s16 }
 0x24e   :  { %v6546_v60 = vmul.f32 %v1689_v59, %v1674_v32  ;;  %v7309_v47 = vxor.u32 2147483648, %v6540_v1 }
 0x24f   :  { %v3307_v37 = vunpack.c.l.b16 %v6569_v34 }
 0x250   :  { %v7310_v2 = vxor.u32 2147483648, %v6546_v60  ;;  %v2013_v32 = vsel %vm2011_vm3, %v7309_v47, %v6546_v60  ;;  %vm7408_vm3 = vmmov %vm7400_vm7 }
 0x251   :  { %v6579_v25 = vpack.c.b16 %v3307_v37, %v3307_v37  ;;  %vm7413_vm7 = vmmov %vm7403_vm2 }
 0x252   :  { %v2010_v44 = vsel %vm2008_vm8, %v6540_v1, %v7310_v2  ;;  %vm7409_vm8 = vmmov %vm7408_vm3 }
 0x253   :  { %v2014_v31 = vsel %vm2007_vm6, %v2010_v44, %v2013_v32  ;;  %vm7411_vm6 = vmmov %vm7403_vm2 }
 0x254   :  { %v2015_v27 = vsel %vm1691_vm9, nan, %v2014_v31 }
 0x255   :  { %v6572_v40 = vmul.f32 %v2015_v27, %v6561_v45  ;;  %3423 = vrot.lane.b32.xlu2 %v6579_v25, %s5162_s26 }
 0x25d   :  { %3309 = vrot.lane.b32.xlu2 %v6579_v25, %s5163_s27 }
 0x265   :  { %3538 = vrot.lane.b32.xlu2 %v6542_v48, %s5165_s4 }
 0x26d   :  { %3640 = vrot.lane.b32.xlu2 %v6574_v46, %s5165_s4 }
 0x275   :  { %3525 = vrot.lane.b32.xlu2 %v6463_v38, %s5165_s4 }
 0x29f   :  { %v3436_v10 = vpop.permute.xlu2 %3435 }
 0x2a0   :  { %v3443_v29 = vsel %vm3311_vm12, %v3436_v10, %v2644_v23 }
 0x2a1   :  { %v3445_v3 = vsel %vm3315_vm0, %v3443_v29, %v3438_v5 }
 0x2a2   :  { %v3447_v14 = vsel %vm3318_vm10, %v3445_v3, %v3440_v4 }
 0x2a3   :  { %v3450_v9 = vsel %vm7401_vm11, %v3447_v14, 0  ;;  %vm7414_vm11 = vmmov %vm7403_vm2 }
 0x2a4   :  { %3459 = vmatpush.bf16.xpose.msrb.mxu3 %v3450_v9 }
 0x2a5   :  { %v3420_v17 = vpop.permute.xlu1 %3419 }
 0x2a6   :  { %v3427_v63 = vsel %vm3311_vm12, %v3420_v17, %v6505_v42 }
 0x2a7   :  { %v3325_v57 = vpop.permute.xlu2 %3324 }
 0x2a8   :  { %v3338_v54 = vsel %vm3311_vm12, %v6511_v6, %v3325_v57  ;;  %v3422_v23 = vpop.permute.xlu0 %3421  ;;  %v3479_v57 = vunpack.c.l.b16 %v6264_v0  ;;  %v3269_v0 = vld [vmem:[%s7260_s25] sm:$0x3] }
 0x2a9   :  { %v3340_v35 = vsel %vm3315_vm0, %v3338_v54, %v3330_v56  ;;  %v3429_v32 = vsel %vm3315_vm0, %v3427_v63, %v3422_v23  ;;  %v7406_v54 = vld [vmem:[#allocation55_spill] sm:$0xff]  ;;  %4446 = vmatpush.msk.msra.mxu0 %vm376_vm1, %v3269_v0 }
 0x2aa   :  { %v3342_v59 = vsel %vm3318_vm10, %v3340_v35, %v3335_v41  ;;  %v6630_v41 = vpop.f32.mrf.mxu3  ;;  %v6637_v17 = vpack.c.b16 %v3479_v57, %v3479_v57  ;;  %v7407_v35 = vld [vmem:[#allocation52_spill] sm:$0xff] }
 0x2ab   :  { %v3345_v8 = vsel %vm7402_vm13, %v3342_v59, 0  ;;  %vm7415_vm13 = vmmov %vm7403_vm2 }
 0x2ac   :  { %3354 = vmatpush.bf16.xpose.msra.mxu1 %v3345_v8 }
 0x2af   :  { %v3424_v6 = vpop.permute.xlu2 %3423 }
 0x2b0   :  { %v3431_v16 = vsel %vm3318_vm10, %v3429_v32, %v3424_v6  ;;  %v3305_v51 = vpop.permute.xlu0 %3304 }
 0x2b1   :  { %4453 = vmatmul.msk.bf16.vlgmr.msrb.gmra.mxu3 %vm7403_vm2, %v3431_v16 }
 0x2b4   :  { %4455 = vmatpush.msk.msrb.mxu1 %vm376_vm1, %v7308_v52 }
 0x2b7   :  { %v3300_v44 = vpop.permute.xlu1 %3299  ;;  %v3310_v42 = vpop.permute.xlu2 %3309 }
 0x2b8   :  { %v3314_v31 = vsel %vm3311_vm12, %v6440_v21, %v3300_v44 }
 0x2b9   :  { %v3317_v27 = vsel %vm3315_vm0, %v3314_v31, %v3305_v51 }
 0x2ba   :  { %v3320_v37 = vsel %vm3318_vm10, %v3317_v27, %v3310_v42 }
 0x2bb   :  { %4449 = vmatmul.msk.bf16.vlgmr.msra.gmra.mxu1 %vm7404_vm5, %v3320_v37 }
 0x2bf   :  { %v3539_v42 = vpop.permute.xlu2 %3538 }
 0x2cb   :  { %4456 = vmatmul.msk.f32.vlgmr.msrb.gmra.mxu1 %vm7405_vm15, %v6601_v50 }
 0x2ce   :  { %v6632_v5 = vpop.f32.mrf.mxu3 }
 0x334   :  { %v3461_v4 = vpop.f32.mrf.mxu3 }
 0x335   :  { %v3465_v10 = vmul.f32 0.17677669, %v3461_v4 }
 0x337   :  { %v3466_v29 = vsel %vm3311_vm12, %v3465_v10, -inf }
 0x338   :  { %v3356_v3 = vpop.f32.mrf.mxu1  ;;  %3467 = vmax.xlane.f32.xlu0 %v3466_v29 }
 0x339   :  { %v3360_v21 = vmul.f32 0.17677669, %v3356_v3  ;;  %v7410_v3 = vld [vmem:[#allocation50_spill] sm:$0xff] }
 0x33b   :  { %v3361_v56 = vsel %vm3311_vm12, %v3360_v21, -inf }
 0x33c   :  { %3362 = vmax.xlane.f32.xlu1 %v3361_v56  ;;  %v3463_v14 = vpop.f32.mrf.mxu3 }
 0x340   :  { %v3358_v9 = vpop.f32.mrf.mxu1 }
 0x34c   :  { %3481 = vrot.lane.b32.xlu0 %v6637_v17, %s5164_s19 }
 0x354   :  { %3638 = vrot.lane.b32.xlu0 %v6542_v48, %s5166_s24  ;;  %v4598_v48 = vld [vmem:[%s7342_s14] sm:$0xff] }
 0x355   :  { %3540 = vrot.lane.b32.xlu1 %v6574_v46, %s5164_s19  ;;  %4447 = vmatmul.msk.f32.vlgmr.msra.gmra.mxu0 %vm7408_vm3, %v4598_v48  ;;  %v4599_v46 = vld [vmem:[%s7342_s14 + $0x8] sm:$0xff] }
 0x35c   :  { %3542 = vrot.lane.b32.xlu0 %v7406_v54, %s5161_s16 }
 0x35d   :  { %3642 = vrot.lane.b32.xlu1 %v7407_v35, %s5164_s19  ;;  %4448 = vmatmul.msk.f32.gmra.mxu0 %vm7409_vm8, %v4599_v46  ;;  %v7412_v35 = vld [vmem:[#allocation53_spill] sm:$0xff] }
 0x364   :  { %3527 = vrot.lane.b32.xlu0 %v6544_v55, %s5164_s19 }
 0x365   :  { %3625 = vrot.lane.b32.xlu1 %v6463_v38, %s5166_s24 }
 0x36c   :  { %3529 = vrot.lane.b32.xlu0 %v6579_v25, %s5161_s16 }
 0x3ab   :  { %v3468_v38 = vpop.xlane.xlu0 %3467 }
 0x3ac   :  { %v3469_v25 = vsub.f32 %v3465_v10, %v3468_v38  ;;  %v3641_v10 = vpop.permute.xlu2 %3640 }
 0x3ae   :  { %v3470_v59 = vmul.f32 1.442695, %v3469_v25 }
 0x3af   :  { %v3363_v23 = vpop.xlane.xlu1 %3362 }
 0x3b0   :  { %4565 = vpow2.f32 %v3470_v59  ;;  %v3364_v63 = vsub.f32 %v3360_v21, %v3363_v23 }
 0x3b2   :  { %v3365_v8 = vmul.f32 1.442695, %v3364_v63 }
 0x3b4   :  { %4567 = vpow2.f32 %v3365_v8  ;;  %v3526_v38 = vpop.permute.xlu2 %3525 }
 0x3b6   :  { %v4566_v32 = vpop.eup %4565 }
 0x3b7   :  { %v3472_v6 = vsel %vm3311_vm12, %v4566_v32, 0.0 }
 0x3b8   :  { %3473 = vadd.xlane.f32.xlu1 %v3472_v6 }
 0x3ba   :  { %v4568_v16 = vpop.eup %4567 }
 0x3bb   :  { %v3367_v51 = vsel %vm3311_vm12, %v4568_v16, 0.0 }
 0x3bc   :  { %3368 = vadd.xlane.f32.xlu2 %v3367_v51 }
 0x3be   :  { %v3482_v44 = vpop.permute.xlu0 %3481 }
 0x3bf   :  { %v3487_v31 = vsel %vm3376_vm4, %v3482_v44, 0 }
 0x3c0   :  { %3496 = vmatpush.bf16.msrb.mxu0 %v3487_v31 }
 0x3c6   :  { %v3639_v27 = vpop.permute.xlu0 %3638 }
 0x3c7   :  { %v3541_v37 = vpop.permute.xlu1 %3540  ;;  %v3646_v56 = vsel %vm3311_vm12, %v3639_v27, %v3641_v10 }
 0x3c8   :  { %v3546_v4 = vsel %vm3311_vm12, %v3539_v42, %v3541_v37 }
 0x3c9   :  { %v3548_v21 = vsel %vm3315_vm0, %v3546_v4, %v7410_v3 }
 0x3ce   :  { %v3543_v29 = vpop.permute.xlu0 %3542 }
 0x3cf   :  { %v3643_v14 = vpop.permute.xlu1 %3642  ;;  %v3550_v9 = vsel %vm3318_vm10, %v3548_v21, %v3543_v29  ;;  %v2803_v29 = vand.u32 2139095040, %v6206_v39 }
 0x3d0   :  { %v3648_v57 = vsel %vm3315_vm0, %v3646_v56, %v3643_v14  ;;  %v3553_v54 = vsel %vm7411_vm6, %v3550_v9, 0  ;;  %v6705_v56 = vpop.f32.mrf.mxu0 }
 0x3d1   :  { %v3650_v0 = vsel %vm3318_vm10, %v3648_v57, %v7412_v35  ;;  %3629 = vrot.lane.b32.xlu1 %v6461_v22, %s5164_s19  ;;  %3562 = vmatpush.bf16.xpose.msrb.mxu2 %v3553_v54  ;;  %v2804_v3 = vshrl.u32 %v2803_v29, 23 }
 0x3d2   :  { %v3653_v48 = vsel %vm7413_vm7, %v3650_v0, 0 }
 0x3d3   :  { %3662 = vmatpush.bf16.xpose.msra.mxu0 %v3653_v48  ;;  %v4437_v21 = vadd.s32 4294967169, %v2804_v3  ;;  %v7311_v48 = vand.u32 2147483647, %v6206_v39 }
 0x3d4   :  { %3627 = vrot.lane.b32.xlu2 %v6544_v55, %s5165_s4 }
 0x3d5   :  { %v2810_v14 = vadd.s32 1, %v4437_v21 }
 0x3d6   :  { %v3528_v51 = vpop.permute.xlu0 %3527 }
 0x3d7   :  { %v3626_v46 = vpop.permute.xlu1 %3625  ;;  %vm2811_vm2 = vcmp.gt.s32.totalorder %v2810_v14, 0 }
 0x3d8   :  { %v2812_v9 = vsel %vm2811_vm2, %v2810_v14, 0 }
 0x3d9   :  { %v2814_v57 = vand.u32 31, %v2812_v9 }
 0x3db   :  { %v6709_v54 = vsub.s32 32, %v2814_v57 }
 0x3dd   :  { %v2827_v0 = vshrl.u32 %v7377_v18, %v6709_v54 }
 0x3de   :  { %v3530_v37 = vpop.permute.xlu0 %3529 }
 0x42b   :  { %v3474_v25 = vpop.xlane.xlu1 %3473 }
 0x42c   :  { %4569 = vrcp.f32 %v3474_v25  ;;  %v2830_v25 = vshrl.u32 %v7378_v20, %v6709_v54 }
 0x42f   :  { %v3369_v59 = vpop.xlane.xlu2 %3368 }
 0x430   :  { %4571 = vrcp.f32 %v3369_v59  ;;  %v2817_v59 = vshll.u32 %v7364_v24, %v2814_v57 }
 0x432   :  { %v4570_v23 = vpop.eup %4569 }
 0x433   :  { %v6684_v63 = vmul.f32 %v4570_v23, %v4566_v32  ;;  %v2820_v23 = vshll.u32 %v7379_v58, %v2814_v57 }
 0x435   :  { %v3477_v8 = vpack.c.bf16 %v6684_v63, %v6684_v63 }
 0x436   :  { %v4572_v22 = vpop.eup %4571 }
 0x437   :  { %v6688_v6 = vmul.f32 %v4572_v22, %v4568_v16  ;;  %4454 = vmatmul.msk.bf16.vlgmr.msrb.gmra.mxu0 %vm3311_vm12, %v3477_v8  ;;  %v3628_v44 = vpop.permute.xlu2 %3627  ;;  %v3533_v16 = vsel %vm3311_vm12, %v3526_v38, %v3528_v51  ;;  %v2829_v38 = vshll.u32 %v7377_v18, %v2814_v57  ;;  %v2818_v8 = vshrl.u32 %v7379_v58, %v6709_v54 }
 0x438   :  { %v3633_v31 = vsel %vm3311_vm12, %v3626_v46, %v3628_v44  ;;  %v3535_v4 = vsel %vm3315_vm0, %v3533_v16, %v6442_v11  ;;  %v2826_v11 = vshll.u32 %v7381_v36, %v2814_v57  ;;  %v6717_v46 = vshrl.u32 %v2812_v9, 5 }
 0x439   :  { %v3372_v55 = vpack.c.bf16 %v6688_v6, %v6688_v6  ;;  %v3537_v10 = vsel %vm3318_vm10, %v3535_v4, %v3530_v37  ;;  %v2821_v22 = vshrl.u32 %v7380_v62, %v6709_v54  ;;  %v2824_v51 = vshrl.u32 %v7381_v36, %v6709_v54 }
 0x43a   :  { %v2828_v44 = vor.u32 %v2827_v0, %v2826_v11  ;;  %vm2835_vm5 = vcmp.lt.s32.totalorder %v6717_v46, 4  ;;  %vm2832_vm15 = vcmp.lt.s32.totalorder %v6717_v46, 1  ;;  %vm2834_vm3 = vcmp.lt.s32.totalorder %v6717_v46, 3 }
 0x43b   :  { %4450 = vmatmul.msk.bf16.vlgmr.msra.gmra.mxu2 %vm3311_vm12, %v3372_v55  ;;  %v2823_v55 = vshll.u32 %v7380_v62, %v2814_v57  ;;  %vm2833_vm8 = vcmp.lt.s32.totalorder %v6717_v46, 2 }
 0x43c   :  { %v2841_v4 = vsel %vm2835_vm5, %v2828_v44, 920167782 }
 0x43d   :  { %v6738_v16 = vor.u32 %v2824_v51, %v2823_v55 }
 0x43f   :  { %v2842_v21 = vsel %vm2834_vm3, %v6738_v16, %v2841_v4 }
 0x443   :  { %v3630_v42 = vpop.permute.xlu1 %3629 }
 0x444   :  { %v3635_v32 = vsel %vm3315_vm0, %v3633_v31, %v3630_v42  ;;  %v2807_v31 = vand.u32 8388607, %v7311_v48  ;;  %v2831_v42 = vor.u32 %v2830_v25, %v2829_v38 }
 0x445   :  { %v3637_v27 = vsel %vm3318_vm10, %v3635_v32, %v6569_v34  ;;  %v6707_v34 = vpop.f32.mrf.mxu0  ;;  %v6734_v32 = vor.u32 %v2818_v8, %v2817_v59 }
 0x446   :  { %v2845_v29 = vsel %vm2835_vm5, %v2831_v42, 1326507024 }
 0x447   :  { %4461 = vmatmul.msk.bf16.vlgmr.msra.gmra.mxu0 %vm7414_vm11, %v3637_v27  ;;  %v6736_v27 = vor.u32 %v2821_v22, %v2820_v23  ;;  %v2846_v9 = vsel %vm2834_vm3, %v2828_v44, %v2845_v29 }
 0x449   :  { %v2840_v3 = vsel %vm2832_vm15, %v6734_v32, %v6736_v27  ;;  %v2844_v14 = vsel %vm2832_vm15, %v6736_v27, %v6738_v16 }
 0x44a   :  { %v2843_v11 = vsel %vm2833_vm8, %v2840_v3, %v2842_v21  ;;  %v2847_v0 = vsel %vm2833_vm8, %v2844_v14, %v2846_v9 }
 0x44b   :  { %4457 = vmatmul.msk.bf16.vlgmr.msrb.gmra.mxu2 %vm7415_vm13, %v3537_v10  ;;  %v2808_v10 = vor.u32 8388608, %v2807_v31  ;;  %v2874_v59 = vshrl.u32 %v2843_v11, 16  ;;  %v2852_v8 = vshrl.u32 %v2847_v0, 16  ;;  %v2873_v55 = vand.u32 65535, %v2843_v11 }
 0x44c   :  { %v2851_v44 = vand.u32 65535, %v2847_v0 }
 0x44d   :  { %v6711_v35 = vpop.f32.mrf.mxu0  ;;  %v6762_v57 = vshll.u32 %v2808_v10, 8 }
 0x44e   :  { %7416 = vst [vmem:[#allocation54_spill] sm:$0xff] %v6711_v35 }
 0x44f   :  { %v2849_v25 = vand.u32 65535, %v6762_v57  ;;  %v2850_v22 = vshrl.u32 %v6762_v57, 16 }
 0x451   :  { %v2876_v51 = vmul.u32 %v2874_v59, %v2849_v25  ;;  %v2854_v31 = vmul.u32 %v2852_v8, %v2849_v25  ;;  %v2875_v10 = vmul.u32 %v2873_v55, %v2849_v25  ;;  %v2877_v29 = vmul.u32 %v2873_v55, %v2850_v22 }
 0x452   :  { %v2853_v14 = vmul.u32 %v2851_v44, %v2849_v25  ;;  %v2855_v9 = vmul.u32 %v2851_v44, %v2850_v22  ;;  %v2878_v48 = vmul.u32 %v2874_v59, %v2850_v22  ;;  %v2856_v61 = vmul.u32 %v2852_v8, %v2850_v22 }
 0x453   :  { %v2879_v3 = vshll.u32 %v2876_v51, 16  ;;  %v2881_v47 = vshll.u32 %v2877_v29, 16  ;;  %v2318_v8 = vand.u32 3, %v6458_v13  ;;  %v2880_v22 = vshrl.u32 %v2876_v51, 16 }
 0x454   :  { %v2859_v2 = vshll.u32 %v2855_v9, 16  ;;  %v2837_v51 = vsel %vm2835_vm5, %v6738_v16, 2102212464 }
 0x455   :  { %vm2883_vm6 = vc.u32 %v2875_v10, %v2879_v3  ;;  %v2885_v11 = vadd.s32 %v2879_v3, %v2875_v10  ;;  %vm2320_vm2 = vcmp.eq.s32.totalorder %v2318_v8, 0 }
 0x456   :  { %v2884_v55 = vsel %vm2883_vm6, 1, %v7368_v30  ;;  %vm2323_vm6 = vcmp.eq.s32.totalorder %v2318_v8, 2 }
 0x457   :  { %vm2887_vm11 = vc.u32 %v2885_v11, %v2881_v47  ;;  %v2886_v15 = vadd.s32 %v2884_v55, %v2878_v48  ;;  %v2860_v48 = vshrl.u32 %v2855_v9, 16 }
 0x458   :  { %v2888_v35 = vsel %vm2887_vm11, 1, %v7368_v30  ;;  %vm7422_vm11 = vcmask 15360  }
 0x459   :  { %v2890_v3 = vadd.s32 %v2888_v35, %v2886_v15  ;;  %v7418_v15 = vxor.u32 2147483648, %v6499_v7 }
 0x45b   :  { %v2325_v35 = vsel %vm2323_vm6, %v7418_v15, %v6466_v19 }
 0x4b4   :  { %v6740_v37 = vpop.f32.mrf.mxu0 }
 0x4bc   :  { %v3500_v38 = vpop.f32.mrf.mxu0 }
 0x4bd   :  { %v2857_v38 = vshll.u32 %v2854_v31, 16 }
 0x4be   :  { %v6769_v23 = vpop.f32.mrf.mxu2 }
 0x4bf   :  { %vm2861_vm7 = vc.u32 %v2853_v14, %v2857_v38  ;;  %v2863_v0 = vadd.s32 %v2857_v38, %v2853_v14  ;;  %v2858_v14 = vshrl.u32 %v2854_v31, 16 }
 0x4c1   :  { %vm2865_vm13 = vc.u32 %v2863_v0, %v2859_v2  ;;  %v2882_v0 = vshrl.u32 %v2877_v29, 16  ;;  %v2838_v29 = vsel %vm2834_vm3, %v6736_v27, %v2837_v51  ;;  %vm2802_vm3 = vcmp.lt.s32.totalorder %v6206_v39, 0 }
 0x4c2   :  { %v2866_v59 = vsel %vm2865_vm13, 1, %v7368_v30  ;;  %vm7423_vm13 = vmmov %vm7422_vm11 }
 0x4c4   :  { %v3664_v42 = vpop.f32.mrf.mxu0 }
 0x4c5   :  { %v6772_v4 = vmul.f32 0.17677669, %v3664_v42 }
 0x4c6   :  { %v3391_v21 = vpop.f32.mrf.mxu2 }
 0x4c7   :  { %v3669_v52 = vsel %vm3311_vm12, %v6772_v4, -inf  ;;  %v2862_v21 = vsel %vm2861_vm7, 1, %v7368_v30  ;;  %vm2319_vm7 = vcmp.lt.s32.totalorder %v2318_v8, 2 }
 0x4c8   :  { %3670 = vmax.xlane.f32.xlu2 %v3669_v52  ;;  %v2864_v52 = vadd.s32 %v2862_v21, %v2856_v61  ;;  %v2816_v61 = vshrl.u32 %v7364_v24, %v6709_v54  ;;  %v7417_v21 = vxor.u32 2147483648, %v6466_v19 }
 0x4ca   :  { %v2868_v38 = vadd.s32 %v2866_v59, %v2864_v52  ;;  %v2322_v13 = vsel %vm2320_vm2, %v6499_v7, %v7417_v21  ;;  %v2836_v54 = vsel %vm2832_vm15, %v2816_v61, %v6734_v32  ;;  %v2889_v52 = vadd.s32 %v2885_v11, %v2881_v47 }
 0x4cb   :  { %v2839_v19 = vsel %vm2833_vm8, %v2836_v54, %v2838_v29  ;;  %v3602_v29 = vrot.slane %v6594_v49, 4 }
 0x4cc   :  { %v3666_v42 = vpop.f32.mrf.mxu0  ;;  %v2869_v55 = vadd.s32 %v2868_v38, %v2858_v14  ;;  %v2893_v59 = vmul.u32 %v6762_v57, %v2839_v19  ;;  %v7419_v19 = vand.u32 2147483647, %v6206_v39 }
 0x4cd   :  { %v2891_v42 = vadd.s32 %v2890_v3, %v2880_v22  ;;  %4459 = vmatpush.msk.msra.mxu3 %vm376_vm1, %v3602_v29 }
 0x4ce   :  { %v3564_v25 = vpop.f32.mrf.mxu2  ;;  %v2870_v9 = vadd.s32 %v2869_v55, %v2860_v48  ;;  %vm6822_vm8 = vcmp.le.f32.partialorder %v7419_v19, 0.7853982  ;;  %4460 = vmatmul.msk.f32.vlgmr.msra.gmra.mxu3 %vm7422_vm11, %v6601_v50  ;;  %v4600_v19 = vld [vmem:[#allocation28] ss:$0 sm:$0xff] }
 0x4cf   :  { %v6778_v44 = vmul.f32 0.17677669, %v3564_v25  ;;  %v2892_v31 = vadd.s32 %v2891_v42, %v2882_v0  ;;  %v2326_v25 = vsel %vm2319_vm7, %v2322_v13, %v2325_v35 }
 0x4d0   :  { %v2327_v7 = vsel %vm2317_vm14, nan, %v2326_v25  ;;  %vm2895_vm5 = vc.u32 %v2870_v9, %v2889_v52  ;;  %v2894_v48 = vadd.s32 %v2889_v52, %v2870_v9 }
 0x4d1   :  { %v3569_v10 = vsel %vm3311_vm12, %v6778_v44, -inf  ;;  %v2329_v16 = vmul.f32 %v2327_v7, %v6517_v43  ;;  %v3702_v7 = vrot.slane %v6594_v49, 6 }
 0x4d2   :  { %3570 = vmax.xlane.f32.xlu0 %v3569_v10  ;;  %v2896_v10 = vadd.s32 1, %v2892_v31 }
 0x4d3   :  { %v6808_v32 = vpack.c.bf16 %v2329_v16, %v2329_v16  ;;  %4463 = vmatpush.msk.msrb.mxu3 %vm376_vm1, %v3702_v7 }
 0x4d4   :  { %v2897_v8 = vsel %vm2895_vm5, %v2896_v10, %v2892_v31  ;;  %vm2943_vm5 = vweird.f32 %v6206_v39 }
 0x4d5   :  { %v2898_v27 = vadd.s32 %v2897_v8, %v2893_v59  ;;  %v3937_v47 = vunpack.c.l.b16 %v6808_v32 }
 0x4d6   :  { %v3566_v2 = vpop.f32.mrf.mxu2  ;;  %4464 = vmatmul.msk.f32.vlgmr.msrb.gmra.mxu3 %vm7423_vm13, %v6601_v50 }
 0x4d7   :  { %v2899_v53 = vadd.s32 536870912, %v2898_v27  ;;  %v6813_v11 = vpack.c.b16 %v3937_v47, %v3937_v47 }
 0x4d9   :  { %v2900_v46 = vshrl.u32 %v2899_v53, 30 }
 0x4db   :  { %v2901_v43 = vshll.u32 %v2900_v46, 30 }
 0x4dd   :  { %v2902_v22 = vsub.s32 %v2898_v27, %v2901_v43 }
 0x4df   :  { %v2904_v3 = vsub.s32 0, %v2902_v22  ;;  %vm2903_vm14 = vcmp.lt.s32.totalorder %v2902_v22, 0 }
 0x4e1   :  { %v2905_v57 = vsel %vm2903_vm14, %v2904_v3, %v2902_v22 }
 0x4e2   :  { %v2906_v14 = vclz %v2905_v57  ;;  %v2924_v57 = vsub.s32 4, %v2900_v46 }
 0x4e4   :  { %v4438_v38 = vadd.s32 4294967294, %v2906_v14 }
 0x4e6   :  { %3681 = vrot.lane.b32.xlu0 %v6637_v17, %s5166_s24  ;;  %vm4439_vm15 = vcmp.lt.s32.totalorder %v4438_v38, 0 }
 0x4e7   :  { %v2909_v2 = vsel %vm4439_vm15, 0, %v4438_v38 }
 0x4e8   :  { %v2914_v61 = vsub.s32 4294967266, %v2909_v2  ;;  %v2910_v0 = vsub.s32 32, %v2909_v2  ;;  %v2911_v55 = vshll.u32 %v2902_v22, %v2909_v2  ;;  %v2925_v2 = vsel %vm2802_vm3, %v2924_v57, %v2900_v46 }
 0x4ea   :  { %v2915_v42 = vadd.s32 127, %v2914_v61  ;;  %v2912_v21 = vshrl.u32 %v2894_v48, %v2910_v0 }
 0x4ec   :  { %v2916_v13 = vshll.u32 %v2915_v42, 23  ;;  %v2913_v15 = vor.u32 %v2912_v21, %v2911_v55  ;;  %v2927_v55 = vsel %vm6822_vm8, 0, %v2925_v2  ;;  %v1692_v2 = vand.u32 3, %v6503_v28 }
 0x4ed   :  { %v7425_v28 = vxor.u32 2147483648, %v6540_v1 }
 0x4ee   :  { %3939 = vrot.lane.b32.xlu0 %v6813_v11, %s5164_s19  ;;  %v2917_v35 = vor.u32 4788187, %v2916_v13  ;;  %v2920_v31 = vcvt.s32.f32 %v2913_v15  ;;  %vm1697_vm11 = vcmp.eq.s32.totalorder %v1692_v2, 2  ;;  %vm1693_vm13 = vcmp.lt.s32.totalorder %v1692_v2, 2 }
 0x4f0   :  { %v2918_v51 = vand.u32 2147483647, %v2917_v35  ;;  %v3255_v35 = vadd.s32 3, %v2927_v55 }
 0x4f2   :  { %v2921_v25 = vmul.f32 %v2920_v31, %v2918_v51  ;;  %v3256_v31 = vand.u32 3, %v3255_v35 }
 0x4f4   :  { %v2922_v54 = vxor.u32 2147483648, %v2921_v25  ;;  %vm3258_vm2 = vcmp.eq.s32.totalorder %v3256_v31, 0  ;;  %vm3261_vm6 = vcmp.eq.s32.totalorder %v3256_v31, 2  ;;  %vm3257_vm7 = vcmp.lt.s32.totalorder %v3256_v31, 2 }
 0x4f6   :  { %v2923_v52 = vsel %vm2802_vm3, %v2922_v54, %v2921_v25 }
 0x4f7   :  { %v2926_v10 = vsel %vm6822_vm8, %v6206_v39, %v2923_v52  ;;  %v764_v52 = vadd.f32 %v4600_v19, %v6630_v41  ;;  %vm1694_vm8 = vcmp.eq.s32.totalorder %v1692_v2, 0 }
 0x4f8   :  { %v2928_v16 = vmul.f32 %v2926_v10, %v2926_v10 }
 0x4fa   :  { %v2936_v59 = vmul.f32 -0.00019511016, %v2928_v16  ;;  %v2929_v27 = vmul.f32 -0.001358992, %v2928_v16 }
 0x4fc   :  { %v2937_v8 = vadd.f32 0.008332121, %v2936_v59  ;;  %v2930_v3 = vadd.f32 0.041655596, %v2929_v27  ;;  %v6856_v59 = vpack.c.bf16 %v764_v52, %v764_v52 }
 0x4fe   :  { %v2938_v43 = vmul.f32 %v2937_v8, %v2928_v16  ;;  %v2931_v38 = vmul.f32 %v2930_v3, %v2928_v16  ;;  %v2944_v8 = vand.u32 3, %v2927_v55 }
 0x500   :  { %v2939_v14 = vadd.f32 -0.16666654, %v2938_v43  ;;  %v2932_v42 = vadd.f32 -0.4999988, %v2931_v38  ;;  %v3885_v43 = vsel %vm3376_vm4, %v6856_v59, 0  ;;  %vm2946_vm14 = vcmp.eq.s32.totalorder %v2944_v8, 0 }
 0x501   :  { %vm2949_vm15 = vcmp.eq.s32.totalorder %v2944_v8, 2  ;;  %vm2945_vm3 = vcmp.lt.s32.totalorder %v2944_v8, 2 }
 0x502   :  { %v2940_v50 = vmul.f32 %v2939_v14, %v2928_v16  ;;  %v2933_v15 = vmul.f32 %v2932_v42, %v2928_v16 }
 0x504   :  { %v2941_v13 = vadd.f32 1.0, %v2940_v50  ;;  %v2934_v51 = vadd.f32 1.0, %v2933_v15 }
 0x506   :  { %v2942_v46 = vmul.f32 %v2941_v13, %v2926_v10  ;;  %v2950_v9 = vxor.u32 2147483648, %v2934_v51 }
 0x508   :  { %v2947_v54 = vxor.u32 2147483648, %v2942_v46  ;;  %v3263_v10 = vsel %vm3261_vm6, %v2950_v9, %v2942_v46  ;;  %v2951_v57 = vsel %vm2949_vm15, %v2950_v9, %v2942_v46 }
 0x50a   :  { %v3260_v16 = vsel %vm3258_vm2, %v2934_v51, %v2947_v54  ;;  %v2948_v3 = vsel %vm2946_vm14, %v2934_v51, %v2947_v54 }
 0x50b   :  { %v2952_v14 = vsel %vm2945_vm3, %v2948_v3, %v2951_v57 }
 0x50c   :  { %v2953_v38 = vsel %vm2943_vm5, nan, %v2952_v14 }
 0x50d   :  { %v6870_v50 = vpack.c.bf16 %v2953_v38, %v2953_v38 }
 0x53b   :  { %v3671_v47 = vpop.xlane.xlu2 %3670 }
 0x53c   :  { %v3672_v53 = vsub.f32 %v6772_v4, %v3671_v47 }
 0x53e   :  { %v3673_v22 = vmul.f32 1.442695, %v3672_v53  ;;  %v3264_v53 = vsel %vm3257_vm7, %v3260_v16, %v3263_v10 }
 0x53f   :  { %v3265_v41 = vsel %vm2943_vm5, nan, %v3264_v53 }
 0x540   :  { %4573 = vpow2.f32 %v3673_v22  ;;  %v6862_v22 = vpack.c.bf16 %v3265_v41, %v3265_v41 }
 0x542   :  { %v3840_v39 = vunpack.c.l.b16 %v6862_v22 }
 0x545   :  { %v3571_v61 = vpop.xlane.xlu0 %3570 }
 0x546   :  { %v6844_v48 = vpop.eup %4573  ;;  %v3572_v0 = vsub.f32 %v6778_v44, %v3571_v61  ;;  %v6868_v61 = vpack.c.b16 %v3840_v39, %v3840_v39 }
 0x547   :  { %v3675_v4 = vsel %vm3311_vm12, %v6844_v48, 0.0 }
 0x548   :  { %v3573_v21 = vmul.f32 1.442695, %v3572_v0  ;;  %3676 = vadd.xlane.f32.xlu1 %v3675_v4  ;;  %v7424_v0 = vxor.u32 2147483648, %v6546_v60  ;;  %v1699_v4 = vsel %vm1697_vm11, %v7425_v28, %v6546_v60  ;;  %v4601_v60 = vld [vmem:[#allocation5] ss:$0 sm:$0xff] }
 0x549   :  { %v6900_v46 = vadd.f32 %v4601_v60, %v6359_v12 }
 0x54a   :  { %4575 = vpow2.f32 %v3573_v21  ;;  %v1696_v42 = vsel %vm1694_vm8, %v6540_v1, %v7424_v0 }
 0x54b   :  { %v1700_v55 = vsel %vm1693_vm13, %v1696_v42, %v1699_v4  ;;  %v925_v26 = vand.u32 2139095040, %v6900_v46  ;;  %v922_v12 = vand.u32 2147483647, %v6900_v46  ;;  %vm7426_vm13 = vcmask 261120  }
 0x550   :  { %v6851_v25 = vpop.eup %4575 }
 0x551   :  { %v3575_v44 = vsel %vm3311_vm12, %v6851_v25, 0.0 }
 0x552   :  { %3576 = vadd.xlane.f32.xlu2 %v3575_v44 }
 0x558   :  { %v3682_v27 = vpop.permute.xlu0 %3681 }
 0x559   :  { %v3687_v47 = vsel %vm3376_vm4, %v3682_v27, 0 }
 0x55a   :  { %3696 = vmatpush.bf16.msra.mxu2 %v3687_v47 }
 0x55e   :  { %3894 = vmatpush.bf16.msrb.mxu2 %v3885_v43 }
 0x561   :  { %3581 = vrot.lane.b32.xlu1 %v6637_v17, %s5165_s4  ;;  %v3835_v17 = vunpack.c.l.b16 %v6870_v50 }
 0x563   :  { %v6883_v21 = vpack.c.b16 %v3835_v17, %v3835_v17 }
 0x569   :  { %3943 = vrot.lane.b32.xlu1 %v6868_v61, %s5162_s26 }
 0x56a   :  { %3741 = vrot.lane.b32.xlu2 %v6740_v37, %s5161_s16  ;;  %v1701_v37 = vsel %vm1691_vm9, nan, %v1700_v55 }
 0x56b   :  { %v1703_v13 = vmul.f32 %v1701_v37, %v6561_v45  ;;  %v926_v45 = vshrl.u32 %v925_v26, 23  ;;  %v6960_v37 = vld [vmem:[#allocation29 + $0x8] sm:$0xff] }
 0x56c   :  { %3800 = vmatpush.bf16.msra.mxu3 %v6960_v37 }
 0x56d   :  { %v6890_v15 = vpack.c.bf16 %v1703_v13, %v1703_v13  ;;  %v4401_v51 = vadd.s32 4294967169, %v926_v45 }
 0x56f   :  { %v3813_v35 = vunpack.c.l.b16 %v6890_v15  ;;  %v932_v31 = vadd.s32 1, %v4401_v51 }
 0x571   :  { %v6895_v1 = vpack.c.b16 %v3813_v35, %v3813_v35  ;;  %vm933_vm9 = vcmp.gt.s32.totalorder %v932_v31, 0 }
 0x572   :  { %3941 = vrot.lane.b32.xlu2 %v6883_v21, %s5161_s16  ;;  %v934_v44 = vsel %vm933_vm9, %v932_v31, 0 }
 0x573   :  { %v936_v54 = vand.u32 31, %v934_v44  ;;  %v6911_v16 = vshrl.u32 %v934_v44, 5  ;;  %v6965_v44 = vld [vmem:[#allocation29] sm:$0xff] }
 0x574   :  { %3801 = vmatpush.bf16.msra.mxu3 %v6965_v44 }
 0x575   :  { %v6905_v19 = vsub.s32 32, %v936_v54  ;;  %v948_v52 = vshll.u32 %v7381_v36, %v936_v54  ;;  %v951_v10 = vshll.u32 %v7377_v18, %v936_v54  ;;  %v939_v27 = vshll.u32 %v7364_v24, %v936_v54 }
 0x576   :  { %v942_v47 = vshll.u32 %v7379_v58, %v936_v54  ;;  %v945_v41 = vshll.u32 %v7380_v62, %v936_v54  ;;  %vm957_vm2 = vcmp.lt.s32.totalorder %v6911_v16, 4  ;;  %vm954_vm6 = vcmp.lt.s32.totalorder %v6911_v16, 1 }
 0x577   :  { %v949_v9 = vshrl.u32 %v7377_v18, %v6905_v19  ;;  %v952_v8 = vshrl.u32 %v7378_v20, %v6905_v19  ;;  %v940_v53 = vshrl.u32 %v7379_v58, %v6905_v19  ;;  %v943_v43 = vshrl.u32 %v7380_v62, %v6905_v19 }
 0x578   :  { %v946_v3 = vshrl.u32 %v7381_v36, %v6905_v19  ;;  %v929_v18 = vand.u32 8388607, %v922_v12  ;;  %vm956_vm7 = vcmp.lt.s32.totalorder %v6911_v16, 3  ;;  %vm955_vm5 = vcmp.lt.s32.totalorder %v6911_v16, 2 }
 0x579   :  { %v950_v57 = vor.u32 %v949_v9, %v948_v52  ;;  %v953_v20 = vor.u32 %v952_v8, %v951_v10  ;;  %v6928_v14 = vor.u32 %v940_v53, %v939_v27  ;;  %v6930_v39 = vor.u32 %v943_v43, %v942_v47 }
 0x57a   :  { %3837 = vrot.lane.b32.xlu2 %v6883_v21, %s5162_s26  ;;  %v6932_v58 = vor.u32 %v946_v3, %v945_v41  ;;  %v930_v36 = vor.u32 8388608, %v929_v18 }
 0x57b   :  { %v963_v62 = vsel %vm957_vm2, %v950_v57, 920167782  ;;  %v967_v38 = vsel %vm957_vm2, %v953_v20, 1326507024  ;;  %v962_v2 = vsel %vm954_vm6, %v6928_v14, %v6930_v39 }
 0x57c   :  { %v964_v17 = vsel %vm956_vm7, %v6932_v58, %v963_v62  ;;  %v966_v0 = vsel %vm954_vm6, %v6930_v39, %v6932_v58  ;;  %v968_v42 = vsel %vm956_vm7, %v950_v57, %v967_v38  ;;  %v6954_v28 = vshll.u32 %v930_v36, 8  ;;  %v3622_v62 = vpop.f32.mrf.mxu3 }
 0x57d   :  { %v965_v4 = vsel %vm955_vm5, %v962_v2, %v964_v17  ;;  %v969_v55 = vsel %vm955_vm5, %v966_v0, %v968_v42 }
 0x57e   :  { %v971_v13 = vand.u32 65535, %v6954_v28  ;;  %v996_v35 = vshrl.u32 %v965_v4, 16  ;;  %v974_v60 = vshrl.u32 %v969_v55, 16  ;;  %v972_v45 = vshrl.u32 %v6954_v28, 16 }
 0x57f   :  { %v995_v51 = vand.u32 65535, %v965_v4  ;;  %v973_v54 = vand.u32 65535, %v969_v55 }
 0x580   :  { %v998_v31 = vmul.u32 %v996_v35, %v971_v13  ;;  %v976_v52 = vmul.u32 %v974_v60, %v971_v13  ;;  %v1000_v2 = vmul.u32 %v996_v35, %v972_v45  ;;  %v978_v17 = vmul.u32 %v974_v60, %v972_v45 }
 0x581   :  { %v997_v9 = vmul.u32 %v995_v51, %v971_v13  ;;  %v999_v10 = vmul.u32 %v995_v51, %v972_v45  ;;  %v975_v47 = vmul.u32 %v973_v54, %v971_v13  ;;  %v977_v53 = vmul.u32 %v973_v54, %v972_v45 }
 0x582   :  { %3925 = vrot.lane.b32.xlu2 %v6895_v1, %s5161_s16  ;;  %v1001_v8 = vshll.u32 %v998_v31, 16  ;;  %v979_v43 = vshll.u32 %v976_v52, 16  ;;  %v1002_v35 = vshrl.u32 %v998_v31, 16  ;;  %v980_v60 = vshrl.u32 %v976_v52, 16  ;;  %v3522_v52 = vpop.f32.mrf.mxu1 }
 0x583   :  { %v1003_v3 = vshll.u32 %v999_v10, 16  ;;  %v981_v36 = vshll.u32 %v977_v53, 16 }
 0x584   :  { %vm1005_vm14 = vc.u32 %v997_v9, %v1001_v8  ;;  %v1007_v57 = vadd.s32 %v1001_v8, %v997_v9  ;;  %vm983_vm15 = vc.u32 %v975_v47, %v979_v43  ;;  %v985_v38 = vadd.s32 %v979_v43, %v975_v47  ;;  %v3722_v9 = vpop.f32.mrf.mxu3 }
 0x585   :  { %v1006_v0 = vsel %vm1005_vm14, 1, %v7368_v30  ;;  %v938_v47 = vshrl.u32 %v7364_v24, %v6905_v19  ;;  %v1004_v43 = vshrl.u32 %v999_v10, 16 }
 0x586   :  { %vm1009_vm3 = vc.u32 %v1007_v57, %v1003_v3  ;;  %vm987_vm8 = vc.u32 %v985_v38, %v981_v36  ;;  %v1008_v42 = vadd.s32 %v1006_v0, %v1000_v2  ;;  %v982_v36 = vshrl.u32 %v977_v53, 16 }
 0x587   :  { %v1010_v55 = vsel %vm1009_vm3, 1, %v7368_v30  ;;  %v988_v13 = vsel %vm987_vm8, 1, %v7368_v30  ;;  %v958_v24 = vsel %vm954_vm6, %v938_v47, %v6928_v14  ;;  %v6999_v2 = vpack.c.bf16 %v6536_v33, %v6536_v33 }
 0x588   :  { %v1012_v54 = vadd.s32 %v1010_v55, %v1008_v42  ;;  %vm924_vm6 = vcmp.lt.s32.totalorder %v6900_v46, 0  ;;  %vm1065_vm3 = vweird.f32 %v6900_v46 }
 0x58a   :  { %3815 = vrot.lane.b32.xlu2 %v6895_v1, %s5162_s26 }
 0x5bb   :  { %v3677_v26 = vpop.xlane.xlu1 %3676 }
 0x5bc   :  { %4577 = vrcp.f32 %v3677_v26 }
 0x5c2   :  { %v4578_v27 = vpop.eup %4577 }
 0x5c3   :  { %v6969_v41 = vmul.f32 %v4578_v27, %v6844_v48  ;;  %v984_v48 = vsel %vm983_vm15, 1, %v7368_v30  ;;  %v3762_v27 = vpack.c.bf16 %v3722_v9, %v3622_v62  ;;  %v959_v30 = vsel %vm957_vm2, %v6932_v58, 2102212464  ;;  %v3940_v58 = vpop.permute.xlu0 %3939 }
 0x5c4   :  { %v986_v4 = vadd.s32 %v984_v48, %v978_v17  ;;  %v960_v19 = vsel %vm956_vm7, %v6930_v39, %v959_v30  ;;  %v1011_v62 = vadd.s32 %v1007_v57, %v1003_v3  ;;  %v3761_v17 = vpack.c.bf16 %v3522_v52, %v6632_v5 }
 0x5c5   :  { %v3680_v18 = vpack.c.bf16 %v6969_v41, %v6969_v41  ;;  %v3577_v20 = vpop.xlane.xlu2 %3576  ;;  %v3947_v14 = vsel %vm3311_vm12, %v3940_v58, %v6999_v2  ;;  %v961_v39 = vsel %vm955_vm5, %v958_v24, %v960_v19  ;;  %vm7016_vm7 = vcmp.le.f32.partialorder %v922_v12, 0.7853982 }
 0x5c6   :  { %4579 = vrcp.f32 %v3577_v20  ;;  %v990_v45 = vadd.s32 %v988_v13, %v986_v4  ;;  %v1015_v57 = vmul.u32 %v6954_v28, %v961_v39 }
 0x5c7   :  { %4462 = vmatmul.msk.bf16.vlgmr.msra.gmra.mxu2 %vm3311_vm12, %v3680_v18  ;;  %v1013_v18 = vadd.s32 %v1012_v54, %v1002_v35 }
 0x5c8   :  { %v991_v31 = vadd.s32 %v990_v45, %v980_v60 }
 0x5c9   :  { %v1014_v10 = vadd.s32 %v1013_v18, %v1004_v43 }
 0x5ca   :  { %v992_v53 = vadd.s32 %v991_v31, %v982_v36 }
 0x5cb   :  { %v1018_v48 = vadd.s32 1, %v1014_v10 }
 0x5cc   :  { %v4580_v51 = vpop.eup %4579  ;;  %vm1017_vm11 = vc.u32 %v992_v53, %v1011_v62  ;;  %v1016_v43 = vadd.s32 %v1011_v62, %v992_v53 }
 0x5cd   :  { %v6978_v26 = vpop.permute.xlu2 %3741  ;;  %v6981_v8 = vmul.f32 %v4580_v51, %v6851_v25  ;;  %v1019_v4 = vsel %vm1017_vm11, %v1018_v48, %v1014_v10 }
 0x5ce   :  { %v1020_v55 = vadd.s32 %v1019_v4, %v1015_v57 }
 0x5cf   :  { %v3580_v25 = vpack.c.bf16 %v6981_v8, %v6981_v8 }
 0x5d0   :  { %v1021_v13 = vadd.s32 536870912, %v1020_v55 }
 0x5d2   :  { %v1022_v16 = vshrl.u32 %v1021_v13, 30 }
 0x5d3   :  { %v3582_v20 = vpop.permute.xlu1 %3581 }
 0x5d4   :  { %v3587_v38 = vsel %vm3376_vm4, %v3582_v20, 0  ;;  %v1023_v51 = vshll.u32 %v1022_v16, 30 }
 0x5d5   :  { %3596 = vmatpush.bf16.msra.mxu1 %v3587_v38  ;;  %v3942_v0 = vpop.permute.xlu2 %3941 }
 0x5d6   :  { %v3949_v42 = vsel %vm3315_vm0, %v3947_v14, %v3942_v0  ;;  %v1024_v35 = vsub.s32 %v1020_v55, %v1023_v51 }
 0x5d8   :  { %4458 = vmatmul.msk.bf16.vlgmr.msra.gmra.mxu1 %vm3311_vm12, %v3580_v25  ;;  %v1026_v54 = vsub.s32 0, %v1024_v35  ;;  %vm1025_vm9 = vcmp.lt.s32.totalorder %v1024_v35, 0 }
 0x5d9   :  { %3772 = vmatpush.bf16.msrb.mxu1 %v3762_v27 }
 0x5da   :  { %v1027_v9 = vsel %vm1025_vm9, %v1026_v54, %v1024_v35  ;;  %vm7429_vm9 = vcmask 261120  }
 0x5db   :  { %v3944_v3 = vpop.permute.xlu1 %3943  ;;  %v1028_v60 = vclz %v1027_v9 }
 0x5dc   :  { %v3951_v33 = vsel %vm3318_vm10, %v3949_v42, %v3944_v3 }
 0x5dd   :  { %3773 = vmatpush.bf16.msrb.mxu1 %v3761_v17  ;;  %v3954_v5 = vsel %vm7426_vm13, %v3951_v33, 0  ;;  %v4402_v45 = vadd.s32 4294967294, %v1028_v60 }
 0x5de   :  { %3963 = vmatpush.bf16.xpose.msrb.mxu3 %v3954_v5  ;;  %v1046_v5 = vsub.s32 4, %v1022_v16 }
 0x5df   :  { %vm4403_vm2 = vcmp.lt.s32.totalorder %v4402_v45, 0 }
 0x5e0   :  { %v1031_v27 = vsel %vm4403_vm2, 0, %v4402_v45  ;;  %v1047_v55 = vsel %vm924_vm6, %v1046_v5, %v1022_v16  ;;  %v7032_v16 = vpack.c.bf16 %v6572_v40, %v6572_v40  ;;  %vm7430_vm2 = vmmov %vm7429_vm9 }
 0x5e1   :  { %4477 = vmatpush.msk.msra.mxu1 %vm376_vm1, %v6594_v49  ;;  %v1036_v47 = vsub.s32 4294967266, %v1031_v27  ;;  %v1032_v18 = vsub.s32 32, %v1031_v27  ;;  %v1033_v30 = vshll.u32 %v1024_v35, %v1031_v27  ;;  %v1049_v13 = vsel %vm7016_vm7, 0, %v1047_v55 }
 0x5e2   :  { %v1066_v54 = vand.u32 3, %v1049_v13  ;;  %v1379_v27 = vadd.s32 3, %v1049_v13 }
 0x5e3   :  { %v1037_v20 = vadd.s32 127, %v1036_v47  ;;  %v1034_v28 = vshrl.u32 %v1016_v43, %v1032_v18 }
 0x5e4   :  { %vm1068_vm5 = vcmp.eq.s32.totalorder %v1066_v54, 0  ;;  %vm1071_vm14 = vcmp.eq.s32.totalorder %v1066_v54, 2  ;;  %vm1067_vm15 = vcmp.lt.s32.totalorder %v1066_v54, 2  ;;  %v1380_v18 = vand.u32 3, %v1379_v27 }
 0x5e5   :  { %v1038_v36 = vshll.u32 %v1037_v20, 23  ;;  %v1035_v31 = vor.u32 %v1034_v28, %v1033_v30  ;;  %v4602_v30 = vld [vmem:[#allocation14] ss:$0 sm:$0xff] }
 0x5e6   :  { %v586_v28 = vadd.f32 %v4602_v30, %v6705_v56  ;;  %vm1382_vm8 = vcmp.eq.s32.totalorder %v1380_v18, 0  ;;  %vm1385_vm11 = vcmp.eq.s32.totalorder %v1380_v18, 2  ;;  %vm1381_vm13 = vcmp.lt.s32.totalorder %v1380_v18, 2 }
 0x5e7   :  { %v1039_v38 = vor.u32 4788187, %v1038_v36  ;;  %v1042_v25 = vcvt.s32.f32 %v1035_v31 }
 0x5e9   :  { %v1040_v52 = vand.u32 2147483647, %v1039_v38  ;;  %v3818_v38 = vunpack.c.l.b16 %v7032_v16 }
 0x5eb   :  { %v1043_v24 = vmul.f32 %v1042_v25, %v1040_v52  ;;  %v3830_v25 = vunpack.c.l.b16 %v6999_v2  ;;  %v7043_v56 = vpack.c.b16 %v3818_v38, %v3818_v38 }
 0x5ed   :  { %v1044_v19 = vxor.u32 2147483648, %v1043_v24 }
 0x5ef   :  { %v1045_v58 = vsel %vm924_vm6, %v1044_v19, %v1043_v24  ;;  %vm7431_vm6 = vmmov %vm7430_vm2 }
 0x5f0   :  { %v1048_v53 = vsel %vm7016_vm7, %v6900_v46, %v1045_v58  ;;  %v3752_v46 = vsel %vm3311_vm12, %v6769_v23, %v6978_v26  ;;  %vm7432_vm7 = vmmov %vm7430_vm2 }
 0x5f1   :  { %v1050_v62 = vmul.f32 %v1048_v53, %v1048_v53 }
 0x5f3   :  { %v1058_v17 = vmul.f32 -0.00019511016, %v1050_v62  ;;  %v1051_v0 = vmul.f32 -0.001358992, %v1050_v62 }
 0x5f5   :  { %v1059_v14 = vadd.f32 0.008332121, %v1058_v17  ;;  %v1052_v39 = vadd.f32 0.041655596, %v1051_v0 }
 0x5f7   :  { %v1060_v48 = vmul.f32 %v1059_v14, %v1050_v62  ;;  %v1053_v42 = vmul.f32 %v1052_v39, %v1050_v62 }
 0x5f9   :  { %v1061_v3 = vadd.f32 -0.16666654, %v1060_v48  ;;  %v1054_v33 = vadd.f32 -0.4999988, %v1053_v42 }
 0x5fb   :  { %v1062_v12 = vmul.f32 %v1061_v3, %v1050_v62  ;;  %v1055_v57 = vmul.f32 %v1054_v33, %v1050_v62 }
 0x5fd   :  { %v1063_v4 = vadd.f32 1.0, %v1062_v12  ;;  %v1056_v51 = vadd.f32 1.0, %v1055_v57 }
 0x5ff   :  { %v1064_v35 = vmul.f32 %v1063_v4, %v1048_v53  ;;  %v1072_v45 = vxor.u32 2147483648, %v1056_v51  ;;  %v7047_v53 = vpack.c.b16 %v3830_v25, %v3830_v25  ;;  %v3838_v4 = vpop.permute.xlu2 %3837 }
 0x601   :  { %v1069_v60 = vxor.u32 2147483648, %v1064_v35  ;;  %v1073_v43 = vsel %vm1071_vm14, %v1072_v45, %v1064_v35  ;;  %v1387_v19 = vsel %vm1385_vm11, %v1072_v45, %v1064_v35 }
 0x603   :  { %v1070_v47 = vsel %vm1068_vm5, %v1056_v51, %v1069_v60  ;;  %v1384_v24 = vsel %vm1382_vm8, %v1056_v51, %v1069_v60  ;;  %vm7433_vm5 = vcmask 15360   ;;  %vm7437_vm8 = vmmov %vm7430_vm2 }
 0x604   :  { %v1074_v36 = vsel %vm1067_vm15, %v1070_v47, %v1073_v43  ;;  %v1388_v58 = vsel %vm1381_vm13, %v1384_v24, %v1387_v19  ;;  %vm7434_vm14 = vmmov %vm7433_vm5 }
 0x605   :  { %v1075_v40 = vsel %vm1065_vm3, nan, %v1074_v36  ;;  %v1389_v17 = vsel %vm1065_vm3, nan, %v1388_v58  ;;  %vm7435_vm15 = vmmov %vm7430_vm2 }
 0x606   :  { %v1077_v52 = vmul.f32 %v1075_v40, %v586_v28  ;;  %v1391_v2 = vmul.f32 %v1389_v17, %v586_v28  ;;  %v7088_v28 = vld [vmem:[%s7341_s11 + $0x8] sm:$0xff]  ;;  %vm7436_vm3 = vmmov %vm7430_vm2 }
 0x607   :  { %v3926_v54 = vpop.permute.xlu2 %3925  ;;  %vm7439_vm11 = vmmov %vm7433_vm5 }
 0x608   :  { %v1079_v10 = vpack.c.bf16 %v1077_v52, %v1077_v52  ;;  %v1393_v14 = vpack.c.bf16 %v1391_v2, %v1391_v2  ;;  %vm7440_vm13 = vmmov %vm7433_vm5 }
 0x60a   :  { %v3921_v0 = vunpack.c.l.b16 %v1079_v10  ;;  %v3808_v48 = vunpack.c.l.b16 %v1393_v14 }
 0x60c   :  { %v3922_v39 = vpack.c.b16 %v3921_v0, %v3921_v0  ;;  %v7056_v42 = vpack.c.b16 %v3808_v48, %v3808_v48 }
 0x60f   :  { %v3816_v47 = vpop.permute.xlu2 %3815 }
 0x64a   :  { %v3698_v9 = vpop.f32.mrf.mxu2 }
 0x64b   :  { %3749 = vrot.lane.b32.xlu1 %v3698_v9, %s5163_s27 }
 0x652   :  { %v3700_v20 = vpop.f32.mrf.mxu2 }
 0x653   :  { %3842 = vrot.lane.b32.xlu1 %v6868_v61, %s5163_s27 }
 0x655   :  { %v3598_v31 = vpop.f32.mrf.mxu1 }
 0x656   :  { %3745 = vrot.lane.b32.xlu0 %v3598_v31, %s5162_s26 }
 0x65b   :  { %3927 = vrot.lane.b32.xlu1 %v7043_v56, %s5162_s26 }
 0x65d   :  { %v3600_v62 = vpop.f32.mrf.mxu1 }
 0x65e   :  { %3832 = vrot.lane.b32.xlu0 %v7047_v53, %s5161_s16 }
 0x663   :  { %3820 = vrot.lane.b32.xlu1 %v7043_v56, %s5163_s27 }
 0x666   :  { %3923 = vrot.lane.b32.xlu0 %v3922_v39, %s5164_s19 }
 0x66e   :  { %3810 = vrot.lane.b32.xlu0 %v7056_v42, %s5161_s16 }
 0x6bd   :  { %v3750_v3 = vpop.permute.xlu1 %3749 }
 0x6c5   :  { %v3843_v55 = vpop.permute.xlu1 %3842 }
 0x6c8   :  { %v3746_v33 = vpop.permute.xlu0 %3745 }
 0x6c9   :  { %v3753_v12 = vsel %vm3315_vm0, %v3752_v46, %v3746_v33 }
 0x6ca   :  { %v3754_v5 = vsel %vm3318_vm10, %v3753_v12, %v3750_v3 }
 0x6cb   :  { %v3755_v57 = vpack.c.bf16 %v3754_v5, %v3754_v5 }
 0x6cd   :  { %4474 = vmatmul.msk.bf16.vlgmr.msra.gmra.mxu3 %vm7429_vm9, %v3755_v57  ;;  %v3928_v9 = vpop.permute.xlu1 %3927 }
 0x6ce   :  { %4485 = vmatpush.msk.msra.mxu3 %vm376_vm1, %v3602_v29 }
 0x6d0   :  { %v3833_v13 = vpop.permute.xlu0 %3832 }
 0x6d1   :  { %v3846_v51 = vsel %vm3311_vm12, %v6808_v32, %v3833_v13 }
 0x6d2   :  { %v3848_v23 = vsel %vm3315_vm0, %v3846_v51, %v3838_v4 }
 0x6d3   :  { %v3850_v26 = vsel %vm3318_vm10, %v3848_v23, %v3843_v55 }
 0x6d4   :  { %v3853_v35 = vsel %vm7430_vm2, %v3850_v26, 0 }
 0x6d5   :  { %3862 = vmatpush.bf16.xpose.msrb.mxu0 %v3853_v35  ;;  %v3821_v18 = vpop.permute.xlu1 %3820 }
 0x6d8   :  { %v3924_v60 = vpop.permute.xlu0 %3923 }
 0x6d9   :  { %v3931_v45 = vsel %vm3311_vm12, %v3924_v60, %v1393_v14 }
 0x6da   :  { %v3933_v27 = vsel %vm3315_vm0, %v3931_v45, %v3926_v54 }
 0x6db   :  { %v3935_v29 = vsel %vm3318_vm10, %v3933_v27, %v3928_v9 }
 0x6dd   :  { %4479 = vmatmul.msk.bf16.vlgmr.msrb.gmra.mxu3 %vm7431_vm6, %v3935_v29 }
 0x6de   :  { %4489 = vmatpush.msk.msrb.mxu3 %vm376_vm1, %v3702_v7 }
 0x6e0   :  { %v3811_v32 = vpop.permute.xlu0 %3810 }
 0x6e1   :  { %v3824_v43 = vsel %vm3311_vm12, %v1079_v10, %v3811_v32 }
 0x6e2   :  { %v3826_v20 = vsel %vm3315_vm0, %v3824_v43, %v3816_v47 }
 0x6e3   :  { %v3828_v30 = vsel %vm3318_vm10, %v3826_v20, %v3821_v18 }
 0x6e4   :  { %4475 = vmatmul.msk.bf16.vlgmr.msrb.gmra.mxu0 %vm7432_vm7, %v3828_v30 }
 0x6ed   :  { %4486 = vmatmul.msk.f32.vlgmr.msra.gmra.mxu3 %vm7433_vm5, %v7088_v28 }
 0x6ee   :  { %4279 = vmatpush.bf16.msra.mxu3 %v6960_v37 }
 0x6f2   :  { %4280 = vmatpush.bf16.msra.mxu3 %v6965_v44  ;;  %v3983_v44 = vunpack.c.l.b16 %v6856_v59 }
 0x6f4   :  { %v7103_v10 = vpack.c.b16 %v3983_v44, %v3983_v44 }
 0x6f5   :  { %4490 = vmatmul.msk.f32.vlgmr.msrb.gmra.mxu3 %vm7434_vm14, %v7088_v28 }
 0x750   :  { %v7096_v7 = vpop.f32.mrf.mxu3 }
 0x758   :  { %v3805_v36 = vpop.f32.mrf.mxu3 }
 0x760   :  { %v3965_v31 = vpop.f32.mrf.mxu3 }
 0x761   :  { %v3969_v38 = vmul.f32 0.17677669, %v3965_v31  ;;  %v3864_v40 = vpop.f32.mrf.mxu0 }
 0x762   :  { %v3868_v52 = vmul.f32 0.17677669, %v3864_v40 }
 0x763   :  { %v3970_v25 = vsel %vm3311_vm12, %v3969_v38, -inf }
 0x764   :  { %3971 = vmax.xlane.f32.xlu2 %v3970_v25  ;;  %v3869_v24 = vsel %vm3311_vm12, %v3868_v52, -inf }
 0x765   :  { %3870 = vmax.xlane.f32.xlu0 %v3869_v24 }
 0x768   :  { %v3967_v19 = vpop.f32.mrf.mxu3 }
 0x769   :  { %v3866_v37 = vpop.f32.mrf.mxu0 }
 0x76a   :  { %v7186_v37 = vld [vmem:[%s7444_s29] ss:$0 sm:$0xff] }
 0x779   :  { %4041 = vrot.lane.b32.xlu0 %v7047_v53, %s5164_s19 }
 0x77c   :  { %3985 = vrot.lane.b32.xlu2 %v7103_v10, %s5164_s19 }
 0x781   :  { %4138 = vrot.lane.b32.xlu0 %v7047_v53, %s5165_s4 }
 0x784   :  { %4136 = vrot.lane.b32.xlu2 %v6813_v11, %s5166_s24 }
 0x789   :  { %4026 = vrot.lane.b32.xlu0 %v3922_v39, %s5165_s4 }
 0x78c   :  { %4140 = vrot.lane.b32.xlu2 %v6883_v21, %s5164_s19 }
 0x794   :  { %4123 = vrot.lane.b32.xlu2 %v3922_v39, %s5166_s24 }
 0x79c   :  { %4127 = vrot.lane.b32.xlu2 %v6895_v1, %s5164_s19 }
 0x7a4   :  { %3726 = vrot.lane.b32.xlu2 %v6684_v63, %s5161_s16 }
 0x7ac   :  { %3730 = vrot.lane.b32.xlu2 %v6981_v8, %s5162_s26 }
 0x7b4   :  { %3734 = vrot.lane.b32.xlu2 %v6969_v41, %s5163_s27 }
 0x7d7   :  { %v3972_v59 = vpop.xlane.xlu2 %3971 }
 0x7d8   :  { %v3973_v58 = vsub.f32 %v3969_v38, %v3972_v59  ;;  %v3871_v53 = vpop.xlane.xlu0 %3870 }
 0x7d9   :  { %v3872_v62 = vsub.f32 %v3868_v52, %v3871_v53 }
 0x7da   :  { %v3974_v17 = vmul.f32 1.442695, %v3973_v58 }
 0x7db   :  { %v3873_v21 = vmul.f32 1.442695, %v3872_v62 }
 0x7dc   :  { %4581 = vpow2.f32 %v3974_v17 }
 0x7dd   :  { %4583 = vpow2.f32 %v3873_v21 }
 0x7df   :  { %v3986_v2 = vpop.permute.xlu2 %3985 }
 0x7e0   :  { %v3991_v1 = vsel %vm3376_vm4, %v3986_v2, 0 }
 0x7e1   :  { %4000 = vmatpush.bf16.msra.mxu0 %v3991_v1 }
 0x7e2   :  { %v4582_v0 = vpop.eup %4581 }
 0x7e3   :  { %v4584_v63 = vpop.eup %4583  ;;  %v3976_v14 = vsel %vm3311_vm12, %v4582_v0, 0.0 }
 0x7e4   :  { %3977 = vadd.xlane.f32.xlu0 %v3976_v14  ;;  %v3875_v8 = vsel %vm3311_vm12, %v4584_v63, 0.0 }
 0x7e5   :  { %3876 = vadd.xlane.f32.xlu1 %v3875_v8 }
 0x7e7   :  { %v4137_v41 = vpop.permute.xlu2 %4136 }
 0x7eb   :  { %v4042_v39 = vpop.permute.xlu0 %4041 }
 0x7ef   :  { %v4141_v48 = vpop.permute.xlu2 %4140 }
 0x7f3   :  { %v4139_v3 = vpop.permute.xlu0 %4138 }
 0x7f4   :  { %v4144_v46 = vsel %vm3311_vm12, %v4137_v41, %v4139_v3 }
 0x7f5   :  { %v4146_v33 = vsel %vm3315_vm0, %v4144_v46, %v4141_v48 }
 0x7f6   :  { %v4148_v12 = vsel %vm3318_vm10, %v4146_v33, %v6862_v22 }
 0x7f7   :  { %v4124_v5 = vpop.permute.xlu2 %4123  ;;  %v4151_v57 = vsel %vm7435_vm15, %v4148_v12, 0 }
 0x7f8   :  { %4125 = vrot.lane.b32.xlu0 %v7056_v42, %s5165_s4  ;;  %4160 = vmatpush.bf16.xpose.msrb.mxu0 %v4151_v57 }
 0x7fe   :  { %4039 = vrot.lane.b32.xlu1 %v6813_v11, %s5165_s4 }
 0x7ff   :  { %v4128_v4 = vpop.permute.xlu2 %4127 }
 0x806   :  { %4043 = vrot.lane.b32.xlu1 %v6868_v61, %s5161_s16  ;;  %v7438_v61 = vrot.slane %v6594_v49, 2 }
 0x807   :  { %v3727_v55 = vpop.permute.xlu2 %3726 }
 0x808   :  { %v3737_v22 = vsel %vm3311_vm12, %v6688_v6, %v3727_v55  ;;  %v4027_v6 = vpop.permute.xlu0 %4026 }
 0x80e   :  { %4028 = vrot.lane.b32.xlu1 %v7056_v42, %s5164_s19 }
 0x80f   :  { %v3731_v13 = vpop.permute.xlu2 %3730 }
 0x810   :  { %v3738_v51 = vsel %vm3315_vm0, %v3737_v22, %v3731_v13 }
 0x816   :  { %4030 = vrot.lane.b32.xlu1 %v7043_v56, %s5161_s16 }
 0x817   :  { %v3735_v23 = vpop.permute.xlu2 %3734 }
 0x818   :  { %v3739_v11 = vsel %vm3318_vm10, %v3738_v51, %v3735_v23 }
 0x819   :  { %v3760_v26 = vpack.c.bf16 %v3739_v11, %v3739_v11  ;;  %4302 = vst.msk [vmem:[#allocation33] sm:$0xff] %vm7436_vm3, %v3739_v11 }
 0x81b   :  { %4465 = vmatmul.msk.bf16.vlgmr.msrb.gmra.mxu1 %vm7437_vm8, %v3760_v26 }
 0x81c   :  { %4481 = vmatpush.msk.msrb.mxu1 %vm376_vm1, %v7438_v61  ;;  %vm7441_vm1 = vmmov %vm7430_vm2 }
 0x81d   :  { %vm7442_vm9 = vmmov %vm7441_vm1 }
 0x81e   :  { %vm7443_vm2 = vmmov %vm7441_vm1 }
 0x81f   :  { %vm7445_vm6 = vmmov %vm7441_vm1 }
 0x820   :  { %vm7447_vm7 = vmmov %vm7441_vm1 }
 0x821   :  { %vm7448_vm5 = vmmov %vm7441_vm1 }
 0x82b   :  { %4478 = vmatmul.msk.f32.vlgmr.msra.gmra.mxu1 %vm7439_vm11, %v7088_v28 }
 0x833   :  { %4482 = vmatmul.msk.f32.vlgmr.msrb.gmra.mxu1 %vm7440_vm13, %v7088_v28 }
 0x857   :  { %v3978_v56 = vpop.xlane.xlu0 %3977 }
 0x858   :  { %4585 = vrcp.f32 %v3978_v56  ;;  %v3877_v42 = vpop.xlane.xlu1 %3876 }
 0x859   :  { %4587 = vrcp.f32 %v3877_v42  ;;  %v4120_v42 = vpop.f32.mrf.mxu3 }
 0x85e   :  { %v4586_v35 = vpop.eup %4585 }
 0x85f   :  { %v4588_v54 = vpop.eup %4587  ;;  %v7154_v9 = vmul.f32 %v4586_v35, %v4582_v0 }
 0x860   :  { %v7156_v60 = vmul.f32 %v4588_v54, %v4584_v63 }
 0x861   :  { %v3981_v49 = vpack.c.bf16 %v7154_v9, %v7154_v9  ;;  %v4217_v54 = vpop.f32.mrf.mxu3 }
 0x862   :  { %v3880_v45 = vpack.c.bf16 %v7156_v60, %v7156_v60 }
 0x863   :  { %4480 = vmatmul.msk.bf16.vlgmr.msra.gmra.mxu0 %vm3311_vm12, %v3981_v49  ;;  %v4253_v49 = vpack.c.bf16 %v4217_v54, %v4120_v42 }
 0x864   :  { %4476 = vmatmul.msk.bf16.vlgmr.msrb.gmra.mxu2 %vm3311_vm12, %v3880_v45 }
 0x86a   :  { %v4126_v27 = vpop.permute.xlu0 %4125 }
 0x86b   :  { %v4131_v29 = vsel %vm3311_vm12, %v4124_v5, %v4126_v27 }
 0x86c   :  { %v4133_v32 = vsel %vm3315_vm0, %v4131_v29, %v4128_v4 }
 0x86d   :  { %v4135_v43 = vsel %vm3318_vm10, %v4133_v32, %v7032_v16 }
 0x870   :  { %v4040_v47 = vpop.permute.xlu1 %4039 }
 0x871   :  { %v4047_v18 = vsel %vm3311_vm12, %v4040_v47, %v4042_v39 }
 0x872   :  { %v4049_v30 = vsel %vm3315_vm0, %v4047_v18, %v6870_v50  ;;  %v7180_v50 = vld [vmem:[#allocation31] ss:$0 sm:$0xff] }
 0x873   :  { %4487 = vmatmul.msk.bf16.vlgmr.msrb.gmra.mxu0 %vm7441_vm1, %v4135_v43 }
 0x878   :  { %v4044_v20 = vpop.permute.xlu1 %4043 }
 0x879   :  { %v4051_v28 = vsel %vm3318_vm10, %v4049_v30, %v4044_v20 }
 0x87a   :  { %v4054_v36 = vsel %vm7442_vm9, %v4051_v28, 0 }
 0x87b   :  { %4063 = vmatpush.bf16.xpose.msra.mxu2 %v4054_v36 }
 0x880   :  { %v4029_v31 = vpop.permute.xlu1 %4028 }
 0x881   :  { %v4034_v38 = vsel %vm3311_vm12, %v4027_v6, %v4029_v31 }
 0x882   :  { %v4036_v16 = vsel %vm3315_vm0, %v4034_v38, %v6890_v15 }
 0x888   :  { %v4031_v40 = vpop.permute.xlu1 %4030 }
 0x889   :  { %v4038_v52 = vsel %vm3318_vm10, %v4036_v16, %v4031_v40 }
 0x88a   :  { %4483 = vmatmul.msk.bf16.vlgmr.msra.gmra.mxu2 %vm7443_vm2, %v4038_v52 }
 0x898   :  { %v3775_v25 = vpop.f32.mrf.mxu1 }
 0x899   :  { %v3804_v24 = vadd.f32 %v7096_v7, %v3775_v25 }
 0x89b   :  { %v4286_v19 = vsub.f32 %v3804_v24, %v6707_v34 }
 0x89d   :  { %v4292_v44 = vadd.f32 %v7180_v50, %v4286_v19 }
 0x89f   :  { %v4298_v15 = vadd.f32 %v7186_v37, %v4292_v44 }
 0x8a0   :  { %v3777_v59 = vpop.f32.mrf.mxu1 }
 0x8a1   :  { %4300 = vst.msk [vmem:[#allocation32] sm:$0xff] %vm7445_vm6, %v4298_v15 }
 0x8a8   :  { %v3917_v35 = vpop.f32.mrf.mxu1 }
 0x8e0   :  { %v4002_v58 = vpop.f32.mrf.mxu0 }
 0x8e7   :  { %v7191_v53 = vpop.f32.mrf.mxu2 }
 0x8e8   :  { %v4004_v7 = vpop.f32.mrf.mxu0 }
 0x8ef   :  { %v3898_v62 = vpop.f32.mrf.mxu2 }
 0x8f0   :  { %v4162_v17 = vpop.f32.mrf.mxu0 }
 0x8f1   :  { %v4166_v21 = vmul.f32 0.17677669, %v4162_v17 }
 0x8f3   :  { %v4167_v34 = vsel %vm3311_vm12, %v4166_v21, -inf }
 0x8f4   :  { %4168 = vmax.xlane.f32.xlu0 %v4167_v34 }
 0x8f8   :  { %v4164_v2 = vpop.f32.mrf.mxu0 }
 0x90d   :  { %v4065_v1 = vpop.f32.mrf.mxu2 }
 0x90e   :  { %v4069_v0 = vmul.f32 0.17677669, %v4065_v1 }
 0x910   :  { %v4070_v63 = vsel %vm3311_vm12, %v4069_v0, -inf }
 0x911   :  { %4071 = vmax.xlane.f32.xlu1 %v4070_v63 }
 0x915   :  { %v4067_v14 = vpop.f32.mrf.mxu2 }
 0x92a   :  { %4179 = vrot.lane.b32.xlu1 %v7103_v10, %s5166_s24 }
 0x967   :  { %v4169_v8 = vpop.xlane.xlu0 %4168 }
 0x968   :  { %v4170_v41 = vsub.f32 %v4166_v21, %v4169_v8 }
 0x96a   :  { %v4171_v39 = vmul.f32 1.442695, %v4170_v41 }
 0x96c   :  { %4589 = vpow2.f32 %v4171_v39 }
 0x972   :  { %v4590_v48 = vpop.eup %4589 }
 0x973   :  { %v4173_v3 = vsel %vm3311_vm12, %v4590_v48, 0.0 }
 0x974   :  { %4174 = vadd.xlane.f32.xlu2 %v4173_v3 }
 0x984   :  { %v4072_v46 = vpop.xlane.xlu1 %4071 }
 0x985   :  { %v4073_v33 = vsub.f32 %v4069_v0, %v4072_v46 }
 0x987   :  { %v4074_v12 = vmul.f32 1.442695, %v4073_v33 }
 0x989   :  { %4591 = vpow2.f32 %v4074_v12 }
 0x98f   :  { %v4592_v5 = vpop.eup %4591 }
 0x990   :  { %v4076_v57 = vsel %vm3311_vm12, %v4592_v5, 0.0 }
 0x991   :  { %4077 = vadd.xlane.f32.xlu0 %v4076_v57 }
 0x99c   :  { %v4180_v4 = vpop.permute.xlu1 %4179 }
 0x99d   :  { %v4185_v55 = vsel %vm3376_vm4, %v4180_v4, 0 }
 0x99e   :  { %4194 = vmatpush.bf16.msrb.mxu2 %v4185_v55 }
 0x9a5   :  { %4082 = vrot.lane.b32.xlu0 %v7103_v10, %s5165_s4 }
 0x9ad   :  { %4236 = vrot.lane.b32.xlu0 %v4002_v58, %s5161_s16  ;;  %v7450_v58 = vld [vmem:[#allocation54_spill] sm:$0xff] }
 0x9b5   :  { %4221 = vrot.lane.b32.xlu0 %v7154_v9, %s5161_s16  ;;  %v4023_v9 = vpop.f32.mrf.mxu1 }
 0x9b6   :  { %v4252_v45 = vpack.c.bf16 %v4023_v9, %v3917_v35 }
 0x9e7   :  { %v4175_v13 = vpop.xlane.xlu2 %4174 }
 0x9e8   :  { %4593 = vrcp.f32 %v4175_v13 }
 0x9ee   :  { %v4594_v22 = vpop.eup %4593 }
 0x9ef   :  { %v4177_v51 = vmul.f32 %v4594_v22, %v4590_v48 }
 0x9f1   :  { %4229 = vrot.lane.b32.xlu0 %v4177_v51, %s5163_s27  ;;  %v4178_v23 = vpack.c.bf16 %v4177_v51, %v4177_v51 }
 0x9f3   :  { %4488 = vmatmul.msk.bf16.vlgmr.msrb.gmra.mxu2 %vm3311_vm12, %v4178_v23 }
 0xa04   :  { %v4078_v11 = vpop.xlane.xlu0 %4077 }
 0xa05   :  { %4595 = vrcp.f32 %v4078_v11 }
 0xa0b   :  { %v4596_v26 = vpop.eup %4595 }
 0xa0c   :  { %v4080_v61 = vmul.f32 %v4596_v26, %v4592_v5 }
 0xa0e   :  { %v4081_v56 = vpack.c.bf16 %v4080_v61, %v4080_v61 }
 0xa17   :  { %v4083_v6 = vpop.permute.xlu0 %4082 }
 0xa18   :  { %v4088_v10 = vsel %vm3376_vm4, %v4083_v6, 0  ;;  %vm7446_vm4 = vmmov %vm7441_vm1 }
 0xa19   :  { %4097 = vmatpush.bf16.msra.mxu1 %v4088_v10 }
 0xa1c   :  { %4484 = vmatmul.msk.bf16.vlgmr.msra.gmra.mxu1 %vm3311_vm12, %v4081_v56 }
 0xa1d   :  { %4263 = vmatpush.bf16.msrb.mxu1 %v4253_v49 }
 0xa1f   :  { %v4237_v43 = vpop.permute.xlu0 %4236 }
 0xa20   :  { %v4247_v40 = vsel %vm3311_vm12, %v7191_v53, %v4237_v43 }
 0xa21   :  { %4264 = vmatpush.bf16.msrb.mxu1 %v4252_v45 }
 0xa27   :  { %v4222_v20 = vpop.permute.xlu0 %4221 }
 0xa28   :  { %v4232_v30 = vsel %vm3311_vm12, %v7156_v60, %v4222_v20  ;;  %vm7452_vm12 = vmmov %vm7441_vm1 }
 0xa63   :  { %v4230_v36 = vpop.permute.xlu0 %4229 }
 0xa76   :  { %v4196_v27 = vpop.f32.mrf.mxu2 }
 0xa77   :  { %4244 = vrot.lane.b32.xlu1 %v4196_v27, %s5163_s27  ;;  %s7451_s27 = sld [smem:[#allocation73_spill]] }
 0xa7d   :  { %s4310_s19 = sshll.u32 %s7451_s27, 4  ;;  %s4311_s19 = int_to_ptr.hbm [resolvable:$true] %s4310_s19 }
 0xa7e   :  { %v4198_v29 = vpop.f32.mrf.mxu2 }
 0xa7f   :  { %4225 = vrot.lane.b32.xlu1 %v4080_v61, %s5162_s26 }
 0xa99   :  { %v4099_v32 = vpop.f32.mrf.mxu1 }
 0xa9a   :  { %4240 = vrot.lane.b32.xlu2 %v4099_v32, %s5162_s26 }
 0xaa1   :  { %v4101_v47 = vpop.f32.mrf.mxu1 }
 0xae9   :  { %v4245_v18 = vpop.permute.xlu1 %4244 }
 0xaf1   :  { %v4226_v28 = vpop.permute.xlu1 %4225 }
 0xaf2   :  { %v4233_v31 = vsel %vm3315_vm0, %v4232_v30, %v4226_v28 }
 0xaf3   :  { %v4234_v38 = vsel %vm3318_vm10, %v4233_v31, %v4230_v36 }
 0xaf4   :  { %v4251_v16 = vpack.c.bf16 %v4234_v38, %v4234_v38  ;;  %4303 = vst.msk [vmem:[#allocation33 + $0x8] sm:$0xff] %vm7446_vm4, %v4234_v38  ;;  %v4241_v52 = vpop.permute.xlu2 %4240 }
 0xaf5   :  { %v4248_v25 = vsel %vm3315_vm0, %v4247_v40, %v4241_v52  ;;  %4329 = dma.vmem_to_hbm [thread:$0]  %s4322_s1, 256, %s4324_s18, [#allocation34], %s5168_s17, %s5168_s17, %s5161_s16  }
 0xaf6   :  { %v4249_v24 = vsel %vm3318_vm10, %v4248_v25, %v4245_v18  ;;  %4491 = vmatmul.msk.bf16.vlgmr.msrb.gmra.mxu1 %vm7447_vm7, %v4251_v16 }
 0xaf7   :  { %v4250_v60 = vpack.c.bf16 %v4249_v24, %v4249_v24 }
 0xaf9   :  { %4492 = vmatmul.msk.bf16.vlgmr.msra.gmra.mxu3 %vm7448_vm5, %v4250_v60 }
 0xb73   :  { %v4266_v19 = vpop.f32.mrf.mxu1 }
 0xb7b   :  { %v4268_v44 = vpop.f32.mrf.mxu1 }
 0xb7c   :  { %v4282_v15 = vpop.f32.mrf.mxu3 }
 0xb7d   :  { %v4283_v59 = vadd.f32 %v4282_v15, %v4266_v19 }
 0xb7f   :  { %v4287_v53 = vsub.f32 %v4283_v59, %v7450_v58 }
 0xb81   :  { %v4293_v7 = vadd.f32 %v7180_v50, %v4287_v53 }
 0xb83   :  { %v4299_v62 = vadd.f32 %v7186_v37, %v4293_v7 }
 0xb84   :  { %v4284_v17 = vpop.f32.mrf.mxu3 }
 0xb85   :  { %4301 = vst.msk [vmem:[#allocation32 + $0x8] sm:$0xff] %vm7452_vm12, %v4299_v62 }
 0xb86   :  { %4316 = dma.vmem_to_hbm [thread:$0]  %s4309_s28, 256, %s4311_s19, [#allocation4], %s5168_s17, %s5168_s17, %s5161_s16  }
 0xb87   :  { %5128 = dma.done.wait [#allocation4], 256  }
 0xb88   :  { %5129 = vsyncadd [#allocation4], 4294967040 }
 0xb89   :  { %5130 = dma.done.wait [#allocation34], 256  }
 0xb8a   :  { %5131 = vsyncadd [#allocation34], 4294967040 }
 0xb8b   :  { %4338 = vsyncpa [#allocation3], 1 }
 0xb8c   :  { %4339 = vsyncpa [#allocation6], 1 }
 0xb8d   :  { %4340 = vsyncpa [#allocation9], 1 }
 0xb8e   :  { %4341 = vsyncpa [#allocation12], 1 }
 0xb8f   :  { %4342 = vsyncpa [#allocation15], 1 }
 0xb90   :  { %4343 = vsyncpa [#allocation18], 1 }
 0xb91   :  { %4344 = vsyncpa [#allocation21], 1 }
 0xb92   :  { %4345 = vsyncpa [#allocation24], 1 }
 0xb93   :  { %4346 = vsyncpa [#allocation27], 1 }
 0xb94   :  { %4347 = vsyncpa [#allocation30], 1 }
 0xb95   :  { %4348 = vsyncpa [#allocation4], 1 }
 0xb96   :  { %4349 = vsyncpa [#allocation34], 1 }

</bundles_post_ra>
